<compile_context>
chip_gen: v7x
topology: tpu7x:2x2x1
jax: 0.10.0
libtpu: 0.0.40
codegen_flags: <defaults>
</compile_context>

<pallas_src>
import functools

import jax
import jax.numpy as jnp
from jax import lax
from jax.experimental import pallas as pl
from jax.experimental.pallas import tpu as pltpu

LANE = 128          # lane tile (last dim)
SUBLANE_PAD = 16    # bf16 packed sublane tile (second-to-last dim)


def _round_up(x, m):
    return (x + m - 1) // m * m


# ----------------------------- Pallas kernel --------------------------------

def _bilstm_layer_kernel(x_ref, wih_ref, whh_ref, b_ref, y_ref, xproj_ref, *,
                         seq_len, batch_pad, hidden_pad):
    """One LSTM layer, one direction per grid step (grid=(n_dir,), 'parallel').

    x_ref:     (n_src, T*Bp, Din_pad)  bf16  time-major inputs, shared by both dirs
    wih_ref:   (1, n_src, Din_pad, 4*Hp) bf16  this direction's W_ih^T (per source)
    whh_ref:   (1, Hp, 4*Hp)           bf16  this direction's W_hh^T
    b_ref:     (1, 1, 4*Hp)            f32   this direction's b_ih + b_hh
    y_ref:     (1, T*Bp, Hp)           bf16  this direction's per-timestep hidden states
    xproj_ref: (T*Bp, 4*Hp)            f32   VMEM scratch: hoisted input projection
    Gate order follows PyTorch: i, f, g, o (each gate occupies its own 128-lane tile).
    """
    T, Bp, Hp = seq_len, batch_pad, hidden_pad
    n_src = x_ref.shape[0]
    direction = pl.program_id(0)

    # ---- Hoisted input projection: one large MXU matmul per source, bias added once ----
    gates_x = jnp.dot(x_ref[0], wih_ref[0, 0], preferred_element_type=jnp.float32)
    for s in range(1, n_src):                       # static (1 or 2 sources)
        gates_x = gates_x + jnp.dot(x_ref[s], wih_ref[0, s],
                                    preferred_element_type=jnp.float32)
    xproj_ref[...] = gates_x + b_ref[0]             # (T*Bp, 4Hp) f32

    # ---- Recurrence: only the (Bp,Hp) x (Hp,4Hp) matmul stays in the time loop ----
    def step(t, carry):
        h, c = carry                                            # f32 (Bp, Hp)
        # forward reads/writes t; backward reads/writes T-1-t (no flipped copies needed)
        t_idx = jnp.where(direction == 0, t, T - 1 - t)
        row = pl.multiple_of(t_idx * Bp, Bp)                    # sublane-tile aligned
        gates = xproj_ref[pl.ds(row, Bp), :] + jnp.dot(
            h.astype(jnp.bfloat16), whh_ref[0],
            preferred_element_type=jnp.float32)                 # (Bp, 4Hp)
        # Hp == 128 -> each gate slice is a full lane tile (no relayouts).
        i = jax.nn.sigmoid(gates[:, 0 * Hp:1 * Hp])
        f = jax.nn.sigmoid(gates[:, 1 * Hp:2 * Hp])
        g = jnp.tanh(gates[:, 2 * Hp:3 * Hp])
        o = jax.nn.sigmoid(gates[:, 3 * Hp:4 * Hp])
        c_new = f * c + i * g
        h_new = o * jnp.tanh(c_new)
        y_ref[0, pl.ds(row, Bp), :] = h_new.astype(y_ref.dtype)  # lane-dense (Bp,128) store
        return (h_new, c_new)

    zeros = jnp.zeros((Bp, Hp), jnp.float32)
    lax.fori_loop(0, T, step, (zeros, zeros), unroll=True)


# ----------------------------- pallas_call wrapper ---------------------------

def bilstm_layer(x, w_ih, w_hh, bias, *, seq_len, batch_pad):
    """x: (n_src, T*Bp, Din_pad) bf16; weights stacked over directions.

    w_ih: (n_dir, n_src, Din_pad, 4*Hp) bf16
    w_hh: (n_dir, Hp, 4*Hp)             bf16
    bias: (n_dir, 1, 4*Hp)              f32
    returns (n_dir, T*Bp, Hp) bf16 (time-major hidden states per direction).
    """
    n_dir, n_src, d_in, g4 = w_ih.shape
    Hp = w_hh.shape[-2]
    TB = x.shape[1]

    kernel = functools.partial(_bilstm_layer_kernel, seq_len=seq_len,
                               batch_pad=batch_pad, hidden_pad=Hp)
    return pl.pallas_call(
        kernel,
        out_shape=jax.ShapeDtypeStruct((n_dir, TB, Hp), jnp.bfloat16),
        grid_spec=pltpu.PrefetchScalarGridSpec(
            num_scalar_prefetch=0,
            grid=(n_dir,),
            in_specs=[
                pl.BlockSpec((n_src, TB, d_in), lambda d: (0, 0, 0)),        # shared input
                pl.BlockSpec((1, n_src, d_in, g4), lambda d: (d, 0, 0, 0)),  # dir's W_ih^T
                pl.BlockSpec((1, Hp, g4), lambda d: (d, 0, 0)),              # dir's W_hh^T
                pl.BlockSpec((1, 1, g4), lambda d: (d, 0, 0)),               # dir's bias
            ],
            out_specs=pl.BlockSpec((1, TB, Hp), lambda d: (d, 0, 0)),
            scratch_shapes=[pltpu.VMEM((TB, g4), jnp.float32)],
        ),
        compiler_params=pltpu.CompilerParams(
            dimension_semantics=("parallel",)),   # fwd/bwd on the two TCs on v7x
    )(x, w_ih, w_hh, bias)


# ----------------------------- Parameters ------------------------------------

def init_params(key, n_vocab, hidden_dim, embedding_dim, n_layers,
                bidirectional=True):
    """PyTorch-layout parameters mirroring the nn.Module's shapes."""
    params = {}
    key, k_emb = jax.random.split(key)
    emb = 0.1 * jax.random.normal(k_emb, (n_vocab, embedding_dim), jnp.float32)
    emb = emb.at[0].set(0.0)                       # padding_idx=0 row is zero
    params["embedding"] = emb

    n_dir = 2 if bidirectional else 1
    bound = 1.0 / jnp.sqrt(hidden_dim)
    lstm_layers = []
    for layer in range(n_layers):
        din = embedding_dim if layer == 0 else hidden_dim * n_dir
        dirs = {}
        for name in (["fwd", "bwd"] if bidirectional else ["fwd"]):
            key, k1, k2, k3, k4 = jax.random.split(key, 5)
            dirs[name] = {
                "w_ih": jax.random.uniform(k1, (4 * hidden_dim, din),
                                           jnp.float32, -bound, bound),
                "w_hh": jax.random.uniform(k2, (4 * hidden_dim, hidden_dim),
                                           jnp.float32, -bound, bound),
                "b_ih": jax.random.uniform(k3, (4 * hidden_dim,),
                                           jnp.float32, -bound, bound),
                "b_hh": jax.random.uniform(k4, (4 * hidden_dim,),
                                           jnp.float32, -bound, bound),
            }
        lstm_layers.append(dirs)
    params["lstm"] = lstm_layers

    cls_in = hidden_dim * n_dir
    cbound = 1.0 / jnp.sqrt(cls_in)
    key, k5, k6 = jax.random.split(key, 3)
    params["cls_w"] = jax.random.uniform(k5, (1, cls_in), jnp.float32,
                                         -cbound, cbound)
    params["cls_b"] = jax.random.uniform(k6, (1,), jnp.float32, -cbound, cbound)
    return params


def prepare_params(params, hidden_dim, embedding_dim, n_layers, bidirectional=True):
    """One-time prep: pad to HW tiles, pre-transpose weights, combine biases, cast bf16."""
    H = hidden_dim
    Hp = _round_up(H, LANE)
    Ep = _round_up(embedding_dim, LANE)
    n_dir = 2 if bidirectional else 1
    dir_names = ("fwd", "bwd")[:n_dir]

    emb = params["embedding"].astype(jnp.bfloat16)
    emb_p = jnp.zeros((emb.shape[0], Ep), jnp.bfloat16).at[:, :embedding_dim].set(emb)

    def pack_wih(w_ih, n_src, src_dim, src_pad):
        # (4H, n_src*src_dim) -> (n_src, src_pad, 4*Hp), gate-blocks lane-aligned, zero-padded.
        w = w_ih.reshape(4, H, n_src, src_dim)
        blocks = []
        for s in range(n_src):
            blk = jnp.zeros((4, Hp, src_pad), jnp.float32)
            blk = blk.at[:, :H, :src_dim].set(w[:, :, s, :])
            blocks.append(blk.reshape(4 * Hp, src_pad).T)          # (src_pad, 4Hp)
        return jnp.stack(blocks).astype(jnp.bfloat16)

    def pack_whh(w_hh):
        blk = jnp.zeros((4, Hp, Hp), jnp.float32).at[:, :H, :H].set(w_hh.reshape(4, H, H))
        return blk.reshape(4 * Hp, Hp).T.astype(jnp.bfloat16)       # (Hp, 4Hp)

    def pack_bias(b_ih, b_hh):
        b = jnp.zeros((4, Hp), jnp.float32).at[:, :H].set((b_ih + b_hh).reshape(4, H))
        return b.reshape(1, 4 * Hp)

    layers = []
    for layer in range(n_layers):
        if layer == 0:
            n_src, src_dim, src_pad = 1, embedding_dim, Ep
        else:
            n_src, src_dim, src_pad = n_dir, H, Hp
        p = params["lstm"][layer]
        layers.append({
            "w_ih": jnp.stack([pack_wih(p[d]["w_ih"], n_src, src_dim, src_pad)
                               for d in dir_names]),
            "w_hh": jnp.stack([pack_whh(p[d]["w_hh"]) for d in dir_names]),
            "bias": jnp.stack([pack_bias(p[d]["b_ih"], p[d]["b_hh"]) for d in dir_names]),
        })

    return {"embedding": emb_p, "lstm": layers,
            "cls_w": params["cls_w"], "cls_b": params["cls_b"]}


# ----------------------------- Forward ----------------------------------------

def sentence_classifier_forward(prepared, token_ids, *, hidden_dim, n_layers,
                                bidirectional=True):
    """token_ids: (B, T) int32 -> probabilities (B, 1) (matches PyTorch forward)."""
    B, T = token_ids.shape
    H = hidden_dim

    # Pad batch with padding_idx=0 rows and go time-major ONCE; activations stay
    # time-major bf16 through all layers (no per-layer transposes or reversals).
    Bp = _round_up(B, SUBLANE_PAD)
    ids = jnp.zeros((Bp, T), token_ids.dtype).at[:B, :].set(token_ids)
    x = jnp.take(prepared["embedding"], ids.T, axis=0)     # (T, Bp, Ep) bf16 gather
    x = x.reshape(1, T * Bp, -1)                           # (n_src=1, T*Bp, Ep)

    for lp in prepared["lstm"]:
        x = bilstm_layer(x, lp["w_ih"], lp["w_hh"], lp["bias"],
                         seq_len=T, batch_pad=Bp)          # (n_dir, T*Bp, Hp)
        # TODO(synk): inter-layer nn.Dropout omitted (identity at inference).

    # output[:, -1, :] == last time-step rows of each direction's stream.
    last = x[:, (T - 1) * Bp:(T - 1) * Bp + B, :H]          # (n_dir, B, H)
    last_output = last.transpose(1, 0, 2).reshape(B, -1).astype(jnp.float32)
    # TODO(synk): nn.Dropout before classifier omitted (identity at inference).
    # Classifier (out_dim=1) + sigmoid left to XLA: a Pallas launch would cost more
    # than the compute (1-lane masked store, 1/128th of MXU N).
    logits = last_output @ prepared["cls_w"].T + prepared["cls_b"]
    return jax.nn.sigmoid(logits)


# ----------------------------- Pure-JAX reference ------------------------------

def reference_forward(params, token_ids, hidden_dim, n_layers, bidirectional=True):
    H = hidden_dim
    x = jnp.take(params["embedding"], token_ids, axis=0)   # (B, T, E) f32
    B, T, _ = x.shape

    def run_dir(inp, p, reverse):
        h = jnp.zeros((B, H), jnp.float32)
        c = jnp.zeros((B, H), jnp.float32)
        outs = [None] * T
        order = range(T - 1, -1, -1) if reverse else range(T)
        for t in order:
            gates = (inp[:, t, :] @ p["w_ih"].T + h @ p["w_hh"].T
                     + p["b_ih"] + p["b_hh"])
            i = jax.nn.sigmoid(gates[:, 0 * H:1 * H])
            f = jax.nn.sigmoid(gates[:, 1 * H:2 * H])
            g = jnp.tanh(gates[:, 2 * H:3 * H])
            o = jax.nn.sigmoid(gates[:, 3 * H:4 * H])
            c = f * c + i * g
            h = o * jnp.tanh(c)
            outs[t] = h
        return jnp.stack(outs, axis=1)                      # (B, T, H)

    for layer in range(n_layers):
        p = params["lstm"][layer]
        ys = [run_dir(x, p["fwd"], False)]
        if bidirectional:
            ys.append(run_dir(x, p["bwd"], True))
        x = jnp.concatenate(ys, axis=-1)

    last = x[:, -1, :]
    logits = last @ params["cls_w"].T + params["cls_b"]
    return jax.nn.sigmoid(logits)


# ----------------------------- Main ---------------------------------------------

if __name__ == "__main__":
    N_VOCAB = 32
    EMBEDDING_DIM = 16
    HIDDEN_DIM = 32
    N_LAYERS = 2
    BIDIRECTIONAL = True
    BATCH = 2
    SEQ = 8

    key = jax.random.PRNGKey(0)
    key, k_in, k_param = jax.random.split(key, 3)

    token_ids = jax.random.randint(k_in, (BATCH, SEQ), 0, N_VOCAB, dtype=jnp.int32)
    params = init_params(k_param, N_VOCAB, HIDDEN_DIM, EMBEDDING_DIM,
                         N_LAYERS, BIDIRECTIONAL)
    prepared = prepare_params(params, HIDDEN_DIM, EMBEDDING_DIM,
                              N_LAYERS, BIDIRECTIONAL)

    fwd = jax.jit(functools.partial(sentence_classifier_forward,
                                    hidden_dim=HIDDEN_DIM, n_layers=N_LAYERS,
                                    bidirectional=BIDIRECTIONAL))
    probs = jax.block_until_ready(fwd(prepared, token_ids))

    assert probs.shape == (BATCH, 1)
    assert bool(jnp.all(jnp.isfinite(probs)))
    assert bool(jnp.all((probs >= 0.0) & (probs <= 1.0)))

    # Correctness vs. f32 pure-JAX reference (generous tol for bf16 matmul operands).
    ref = jax.block_until_ready(
        reference_forward(params, token_ids, HIDDEN_DIM, N_LAYERS, BIDIRECTIONAL))
    assert float(jnp.max(jnp.abs(probs - ref))) < 3e-2, "mismatch vs. pure-JAX reference"

    print("KERNEL_OK")
</pallas_src>

<mosaic_0001>
module attributes {stable_mosaic.version = 11 : i64} {
  func.func @_bilstm_layer_kernel(%arg0: i32, %arg1: memref<2x128x128xbf16, #tpu.memory_space<vmem>>, %arg2: memref<1x2x128x512xbf16, #tpu.memory_space<vmem>>, %arg3: memref<1x128x512xbf16, #tpu.memory_space<vmem>>, %arg4: memref<1x1x512xf32, #tpu.memory_space<vmem>>, %arg5: memref<1x128x128xbf16, #tpu.memory_space<vmem>>, %arg6: memref<128x512xf32, #tpu.memory_space<vmem>>) attributes {dimension_semantics = [#tpu.dimension_semantics<parallel>], iteration_bounds = array<i64: 2>, scalar_prefetch = 0 : i64, scratch_operands = 1 : i64, tpu.core_type = #tpu.core_type<tc>, window_params = [{pipeline_mode = #tpu.pipeline_mode<synchronous>, transform_indices = @transform_0, window_bounds = array<i64: 2, 128, 128>}, {transform_indices = @transform_1, window_bounds = array<i64: 1, 2, 128, 512>}, {transform_indices = @transform_2, window_bounds = array<i64: 1, 128, 512>}, {transform_indices = @transform_3, window_bounds = array<i64: 1, 1, 512>}, {transform_indices = @transform_4, window_bounds = array<i64: 1, 128, 128>}]} {
    %c0 = arith.constant 0 : index
    %c0_0 = arith.constant 0 : index
    %c0_1 = arith.constant 0 : index
    %0 = vector.load %arg1[%c0, %c0_0, %c0_1] : memref<2x128x128xbf16, #tpu.memory_space<vmem>>, vector<1x128x128xbf16>
    %1 = vector.shape_cast %0 : vector<1x128x128xbf16> to vector<128x128xbf16>
    %c0_2 = arith.constant 0 : index
    %c0_3 = arith.constant 0 : index
    %c0_4 = arith.constant 0 : index
    %c0_5 = arith.constant 0 : index
    %2 = vector.load %arg2[%c0_2, %c0_3, %c0_4, %c0_5] : memref<1x2x128x512xbf16, #tpu.memory_space<vmem>>, vector<1x1x128x512xbf16>
    %3 = vector.shape_cast %2 : vector<1x1x128x512xbf16> to vector<128x512xbf16>
    %cst = arith.constant dense<0.000000e+00> : vector<128x512xf32>
    %4 = tpu.matmul %1, %3, %cst {dimension_numbers = #tpu.dot_dimension_numbers<[1], [0], [0], [1], [0, 0, 1, 1], [], []>} : vector<128x128xbf16>, vector<128x512xbf16>, vector<128x512xf32> -> vector<128x512xf32>
    %c1 = arith.constant 1 : index
    %c0_6 = arith.constant 0 : index
    %c0_7 = arith.constant 0 : index
    %5 = vector.load %arg1[%c1, %c0_6, %c0_7] : memref<2x128x128xbf16, #tpu.memory_space<vmem>>, vector<1x128x128xbf16>
    %6 = vector.shape_cast %5 : vector<1x128x128xbf16> to vector<128x128xbf16>
    %c0_8 = arith.constant 0 : index
    %c1_9 = arith.constant 1 : index
    %c0_10 = arith.constant 0 : index
    %c0_11 = arith.constant 0 : index
    %7 = vector.load %arg2[%c0_8, %c1_9, %c0_10, %c0_11] : memref<1x2x128x512xbf16, #tpu.memory_space<vmem>>, vector<1x1x128x512xbf16>
    %8 = vector.shape_cast %7 : vector<1x1x128x512xbf16> to vector<128x512xbf16>
    %cst_12 = arith.constant dense<0.000000e+00> : vector<128x512xf32>
    %9 = tpu.matmul %6, %8, %cst_12 {dimension_numbers = #tpu.dot_dimension_numbers<[1], [0], [0], [1], [0, 0, 1, 1], [], []>} : vector<128x128xbf16>, vector<128x512xbf16>, vector<128x512xf32> -> vector<128x512xf32>
    %10 = arith.addf %4, %9 : vector<128x512xf32>
    %c0_13 = arith.constant 0 : index
    %c0_14 = arith.constant 0 : index
    %c0_15 = arith.constant 0 : index
    %11 = vector.load %arg4[%c0_13, %c0_14, %c0_15] : memref<1x1x512xf32, #tpu.memory_space<vmem>>, vector<1x1x512xf32>
    %12 = vector.shape_cast %11 : vector<1x1x512xf32> to vector<1x512xf32>
    %13 = vector.broadcast %12 : vector<1x512xf32> to vector<128x512xf32>
    %14 = arith.addf %10, %13 : vector<128x512xf32>
    %c0_16 = arith.constant 0 : index
    %c0_17 = arith.constant 0 : index
    %15 = vector.load %arg6[%c0_16, %c0_17] : memref<128x512xf32, #tpu.memory_space<vmem>>, vector<128x512xf32>
    tpu.vector_store %arg6[%c0_16, %c0_17], %14 {strides = array<i32>} : memref<128x512xf32, #tpu.memory_space<vmem>>, vector<128x512xf32>,
    %cst_18 = arith.constant 0.000000e+00 : f32
    %16 = vector.broadcast %cst_18 : f32 to vector<16x128xf32>
    %c0_i32 = arith.constant 0 : i32
    %c0_i32_19 = arith.constant 0 : i32
    %17 = arith.cmpi eq, %arg0, %c0_i32_19 : i32
    %c7_i32 = arith.constant 7 : i32
    %18 = arith.subi %c7_i32, %c0_i32 : i32
    %19 = arith.select %17, %c0_i32, %18 : i32
    %c16_i32 = arith.constant 16 : i32
    %20 = arith.muli %19, %c16_i32 : i32
    %21 = tpu.assume_multiple %20, 16 : i32
    %22 = arith.index_cast %21 : i32 to index
    %c0_20 = arith.constant 0 : index
    %23 = vector.load %arg6[%22, %c0_20] : memref<128x512xf32, #tpu.memory_space<vmem>>, vector<16x512xf32>
    %24 = arith.truncf %16 : vector<16x128xf32> to vector<16x128xbf16>
    %c0_21 = arith.constant 0 : index
    %c0_22 = arith.constant 0 : index
    %c0_23 = arith.constant 0 : index
    %25 = vector.load %arg3[%c0_21, %c0_22, %c0_23] : memref<1x128x512xbf16, #tpu.memory_space<vmem>>, vector<1x128x512xbf16>
    %26 = vector.shape_cast %25 : vector<1x128x512xbf16> to vector<128x512xbf16>
    %cst_24 = arith.constant dense<0.000000e+00> : vector<16x512xf32>
    %27 = tpu.matmul %24, %26, %cst_24 {dimension_numbers = #tpu.dot_dimension_numbers<[1], [0], [0], [1], [0, 0, 1, 1], [], []>} : vector<16x128xbf16>, vector<128x512xbf16>, vector<16x512xf32> -> vector<16x512xf32>
    %28 = arith.addf %23, %27 : vector<16x512xf32>
    %29 = vector.extract_strided_slice %28 {offsets = [0, 0], sizes = [16, 128], strides = [1, 1]} : vector<16x512xf32> to vector<16x128xf32>
    %30 = arith.negf %29 : vector<16x128xf32>
    %31 = math.exp %30 : vector<16x128xf32>
    %cst_25 = arith.constant 1.000000e+00 : f32
    %32 = vector.broadcast %cst_25 : f32 to vector<16x128xf32>
    %33 = arith.addf %32, %31 : vector<16x128xf32>
    %34 = arith.divf %32, %33 : vector<16x128xf32>
    %35 = vector.extract_strided_slice %28 {offsets = [0, 128], sizes = [16, 128], strides = [1, 1]} : vector<16x512xf32> to vector<16x128xf32>
    %36 = arith.negf %35 : vector<16x128xf32>
    %37 = math.exp %36 : vector<16x128xf32>
    %cst_26 = arith.constant 1.000000e+00 : f32
    %38 = vector.broadcast %cst_26 : f32 to vector<16x128xf32>
    %39 = arith.addf %38, %37 : vector<16x128xf32>
    %40 = arith.divf %38, %39 : vector<16x128xf32>
    %41 = vector.extract_strided_slice %28 {offsets = [0, 256], sizes = [16, 128], strides = [1, 1]} : vector<16x512xf32> to vector<16x128xf32>
    %42 = math.tanh %41 : vector<16x128xf32>
    %43 = vector.extract_strided_slice %28 {offsets = [0, 384], sizes = [16, 128], strides = [1, 1]} : vector<16x512xf32> to vector<16x128xf32>
    %44 = arith.negf %43 : vector<16x128xf32>
    %45 = math.exp %44 : vector<16x128xf32>
    %cst_27 = arith.constant 1.000000e+00 : f32
    %46 = vector.broadcast %cst_27 : f32 to vector<16x128xf32>
    %47 = arith.addf %46, %45 : vector<16x128xf32>
    %48 = arith.divf %46, %47 : vector<16x128xf32>
    %49 = arith.mulf %40, %16 : vector<16x128xf32>
    %50 = arith.mulf %34, %42 : vector<16x128xf32>
    %51 = arith.addf %49, %50 : vector<16x128xf32>
    %52 = math.tanh %51 : vector<16x128xf32>
    %53 = arith.mulf %48, %52 : vector<16x128xf32>
    %54 = arith.truncf %53 : vector<16x128xf32> to vector<16x128xbf16>
    %c0_28 = arith.constant 0 : index
    %55 = arith.index_cast %21 : i32 to index
    %c0_29 = arith.constant 0 : index
    %56 = vector.load %arg5[%c0_28, %55, %c0_29] : memref<1x128x128xbf16, #tpu.memory_space<vmem>>, vector<1x16x128xbf16>
    %57 = vector.shape_cast %56 : vector<1x16x128xbf16> to vector<16x128xbf16>
    %58 = vector.shape_cast %54 : vector<16x128xbf16> to vector<1x16x128xbf16>
    tpu.vector_store %arg5[%c0_28, %55, %c0_29], %58 {strides = array<i32>} : memref<1x128x128xbf16, #tpu.memory_space<vmem>>, vector<1x16x128xbf16>,
    %c1_i32 = arith.constant 1 : i32
    %c0_i32_30 = arith.constant 0 : i32
    %59 = arith.cmpi eq, %arg0, %c0_i32_30 : i32
    %c7_i32_31 = arith.constant 7 : i32
    %60 = arith.subi %c7_i32_31, %c1_i32 : i32
    %61 = arith.select %59, %c1_i32, %60 : i32
    %c16_i32_32 = arith.constant 16 : i32
    %62 = arith.muli %61, %c16_i32_32 : i32
    %63 = tpu.assume_multiple %62, 16 : i32
    %64 = arith.index_cast %63 : i32 to index
    %c0_33 = arith.constant 0 : index
    %65 = vector.load %arg6[%64, %c0_33] : memref<128x512xf32, #tpu.memory_space<vmem>>, vector<16x512xf32>
    %66 = arith.truncf %53 : vector<16x128xf32> to vector<16x128xbf16>
    %c0_34 = arith.constant 0 : index
    %c0_35 = arith.constant 0 : index
    %c0_36 = arith.constant 0 : index
    %67 = vector.load %arg3[%c0_34, %c0_35, %c0_36] : memref<1x128x512xbf16, #tpu.memory_space<vmem>>, vector<1x128x512xbf16>
    %68 = vector.shape_cast %67 : vector<1x128x512xbf16> to vector<128x512xbf16>
    %cst_37 = arith.constant dense<0.000000e+00> : vector<16x512xf32>
    %69 = tpu.matmul %66, %68, %cst_37 {dimension_numbers = #tpu.dot_dimension_numbers<[1], [0], [0], [1], [0, 0, 1, 1], [], []>} : vector<16x128xbf16>, vector<128x512xbf16>, vector<16x512xf32> -> vector<16x512xf32>
    %70 = arith.addf %65, %69 : vector<16x512xf32>
    %71 = vector.extract_strided_slice %70 {offsets = [0, 0], sizes = [16, 128], strides = [1, 1]} : vector<16x512xf32> to vector<16x128xf32>
    %72 = arith.negf %71 : vector<16x128xf32>
    %73 = math.exp %72 : vector<16x128xf32>
    %cst_38 = arith.constant 1.000000e+00 : f32
    %74 = vector.broadcast %cst_38 : f32 to vector<16x128xf32>
    %75 = arith.addf %74, %73 : vector<16x128xf32>
    %76 = arith.divf %74, %75 : vector<16x128xf32>
    %77 = vector.extract_strided_slice %70 {offsets = [0, 128], sizes = [16, 128], strides = [1, 1]} : vector<16x512xf32> to vector<16x128xf32>
    %78 = arith.negf %77 : vector<16x128xf32>
    %79 = math.exp %78 : vector<16x128xf32>
    %cst_39 = arith.constant 1.000000e+00 : f32
    %80 = vector.broadcast %cst_39 : f32 to vector<16x128xf32>
    %81 = arith.addf %80, %79 : vector<16x128xf32>
    %82 = arith.divf %80, %81 : vector<16x128xf32>
    %83 = vector.extract_strided_slice %70 {offsets = [0, 256], sizes = [16, 128], strides = [1, 1]} : vector<16x512xf32> to vector<16x128xf32>
    %84 = math.tanh %83 : vector<16x128xf32>
    %85 = vector.extract_strided_slice %70 {offsets = [0, 384], sizes = [16, 128], strides = [1, 1]} : vector<16x512xf32> to vector<16x128xf32>
    %86 = arith.negf %85 : vector<16x128xf32>
    %87 = math.exp %86 : vector<16x128xf32>
    %cst_40 = arith.constant 1.000000e+00 : f32
    %88 = vector.broadcast %cst_40 : f32 to vector<16x128xf32>
    %89 = arith.addf %88, %87 : vector<16x128xf32>
    %90 = arith.divf %88, %89 : vector<16x128xf32>
    %91 = arith.mulf %82, %51 : vector<16x128xf32>
    %92 = arith.mulf %76, %84 : vector<16x128xf32>
    %93 = arith.addf %91, %92 : vector<16x128xf32>
    %94 = math.tanh %93 : vector<16x128xf32>
    %95 = arith.mulf %90, %94 : vector<16x128xf32>
    %96 = arith.truncf %95 : vector<16x128xf32> to vector<16x128xbf16>
    %c0_41 = arith.constant 0 : index
    %97 = arith.index_cast %63 : i32 to index
    %c0_42 = arith.constant 0 : index
    %98 = vector.load %arg5[%c0_41, %97, %c0_42] : memref<1x128x128xbf16, #tpu.memory_space<vmem>>, vector<1x16x128xbf16>
    %99 = vector.shape_cast %98 : vector<1x16x128xbf16> to vector<16x128xbf16>
    %100 = vector.shape_cast %96 : vector<16x128xbf16> to vector<1x16x128xbf16>
    tpu.vector_store %arg5[%c0_41, %97, %c0_42], %100 {strides = array<i32>} : memref<1x128x128xbf16, #tpu.memory_space<vmem>>, vector<1x16x128xbf16>,
    %c2_i32 = arith.constant 2 : i32
    %c0_i32_43 = arith.constant 0 : i32
    %101 = arith.cmpi eq, %arg0, %c0_i32_43 : i32
    %c7_i32_44 = arith.constant 7 : i32
    %102 = arith.subi %c7_i32_44, %c2_i32 : i32
    %103 = arith.select %101, %c2_i32, %102 : i32
    %c16_i32_45 = arith.constant 16 : i32
    %104 = arith.muli %103, %c16_i32_45 : i32
    %105 = tpu.assume_multiple %104, 16 : i32
    %106 = arith.index_cast %105 : i32 to index
    %c0_46 = arith.constant 0 : index
    %107 = vector.load %arg6[%106, %c0_46] : memref<128x512xf32, #tpu.memory_space<vmem>>, vector<16x512xf32>
    %108 = arith.truncf %95 : vector<16x128xf32> to vector<16x128xbf16>
    %c0_47 = arith.constant 0 : index
    %c0_48 = arith.constant 0 : index
    %c0_49 = arith.constant 0 : index
    %109 = vector.load %arg3[%c0_47, %c0_48, %c0_49] : memref<1x128x512xbf16, #tpu.memory_space<vmem>>, vector<1x128x512xbf16>
    %110 = vector.shape_cast %109 : vector<1x128x512xbf16> to vector<128x512xbf16>
    %cst_50 = arith.constant dense<0.000000e+00> : vector<16x512xf32>
    %111 = tpu.matmul %108, %110, %cst_50 {dimension_numbers = #tpu.dot_dimension_numbers<[1], [0], [0], [1], [0, 0, 1, 1], [], []>} : vector<16x128xbf16>, vector<128x512xbf16>, vector<16x512xf32> -> vector<16x512xf32>
    %112 = arith.addf %107, %111 : vector<16x512xf32>
    %113 = vector.extract_strided_slice %112 {offsets = [0, 0], sizes = [16, 128], strides = [1, 1]} : vector<16x512xf32> to vector<16x128xf32>
    %114 = arith.negf %113 : vector<16x128xf32>
    %115 = math.exp %114 : vector<16x128xf32>
    %cst_51 = arith.constant 1.000000e+00 : f32
    %116 = vector.broadcast %cst_51 : f32 to vector<16x128xf32>
    %117 = arith.addf %116, %115 : vector<16x128xf32>
    %118 = arith.divf %116, %117 : vector<16x128xf32>
    %119 = vector.extract_strided_slice %112 {offsets = [0, 128], sizes = [16, 128], strides = [1, 1]} : vector<16x512xf32> to vector<16x128xf32>
    %120 = arith.negf %119 : vector<16x128xf32>
    %121 = math.exp %120 : vector<16x128xf32>
    %cst_52 = arith.constant 1.000000e+00 : f32
    %122 = vector.broadcast %cst_52 : f32 to vector<16x128xf32>
    %123 = arith.addf %122, %121 : vector<16x128xf32>
    %124 = arith.divf %122, %123 : vector<16x128xf32>
    %125 = vector.extract_strided_slice %112 {offsets = [0, 256], sizes = [16, 128], strides = [1, 1]} : vector<16x512xf32> to vector<16x128xf32>
    %126 = math.tanh %125 : vector<16x128xf32>
    %127 = vector.extract_strided_slice %112 {offsets = [0, 384], sizes = [16, 128], strides = [1, 1]} : vector<16x512xf32> to vector<16x128xf32>
    %128 = arith.negf %127 : vector<16x128xf32>
    %129 = math.exp %128 : vector<16x128xf32>
    %cst_53 = arith.constant 1.000000e+00 : f32
    %130 = vector.broadcast %cst_53 : f32 to vector<16x128xf32>
    %131 = arith.addf %130, %129 : vector<16x128xf32>
    %132 = arith.divf %130, %131 : vector<16x128xf32>
    %133 = arith.mulf %124, %93 : vector<16x128xf32>
    %134 = arith.mulf %118, %126 : vector<16x128xf32>
    %135 = arith.addf %133, %134 : vector<16x128xf32>
    %136 = math.tanh %135 : vector<16x128xf32>
    %137 = arith.mulf %132, %136 : vector<16x128xf32>
    %138 = arith.truncf %137 : vector<16x128xf32> to vector<16x128xbf16>
    %c0_54 = arith.constant 0 : index
    %139 = arith.index_cast %105 : i32 to index
    %c0_55 = arith.constant 0 : index
    %140 = vector.load %arg5[%c0_54, %139, %c0_55] : memref<1x128x128xbf16, #tpu.memory_space<vmem>>, vector<1x16x128xbf16>
    %141 = vector.shape_cast %140 : vector<1x16x128xbf16> to vector<16x128xbf16>
    %142 = vector.shape_cast %138 : vector<16x128xbf16> to vector<1x16x128xbf16>
    tpu.vector_store %arg5[%c0_54, %139, %c0_55], %142 {strides = array<i32>} : memref<1x128x128xbf16, #tpu.memory_space<vmem>>, vector<1x16x128xbf16>,
    %c3_i32 = arith.constant 3 : i32
    %c0_i32_56 = arith.constant 0 : i32
    %143 = arith.cmpi eq, %arg0, %c0_i32_56 : i32
    %c7_i32_57 = arith.constant 7 : i32
    %144 = arith.subi %c7_i32_57, %c3_i32 : i32
    %145 = arith.select %143, %c3_i32, %144 : i32
    %c16_i32_58 = arith.constant 16 : i32
    %146 = arith.muli %145, %c16_i32_58 : i32
    %147 = tpu.assume_multiple %146, 16 : i32
    %148 = arith.index_cast %147 : i32 to index
    %c0_59 = arith.constant 0 : index
    %149 = vector.load %arg6[%148, %c0_59] : memref<128x512xf32, #tpu.memory_space<vmem>>, vector<16x512xf32>
    %150 = arith.truncf %137 : vector<16x128xf32> to vector<16x128xbf16>
    %c0_60 = arith.constant 0 : index
    %c0_61 = arith.constant 0 : index
    %c0_62 = arith.constant 0 : index
    %151 = vector.load %arg3[%c0_60, %c0_61, %c0_62] : memref<1x128x512xbf16, #tpu.memory_space<vmem>>, vector<1x128x512xbf16>
    %152 = vector.shape_cast %151 : vector<1x128x512xbf16> to vector<128x512xbf16>
    %cst_63 = arith.constant dense<0.000000e+00> : vector<16x512xf32>
    %153 = tpu.matmul %150, %152, %cst_63 {dimension_numbers = #tpu.dot_dimension_numbers<[1], [0], [0], [1], [0, 0, 1, 1], [], []>} : vector<16x128xbf16>, vector<128x512xbf16>, vector<16x512xf32> -> vector<16x512xf32>
    %154 = arith.addf %149, %153 : vector<16x512xf32>
    %155 = vector.extract_strided_slice %154 {offsets = [0, 0], sizes = [16, 128], strides = [1, 1]} : vector<16x512xf32> to vector<16x128xf32>
    %156 = arith.negf %155 : vector<16x128xf32>
    %157 = math.exp %156 : vector<16x128xf32>
    %cst_64 = arith.constant 1.000000e+00 : f32
    %158 = vector.broadcast %cst_64 : f32 to vector<16x128xf32>
    %159 = arith.addf %158, %157 : vector<16x128xf32>
    %160 = arith.divf %158, %159 : vector<16x128xf32>
    %161 = vector.extract_strided_slice %154 {offsets = [0, 128], sizes = [16, 128], strides = [1, 1]} : vector<16x512xf32> to vector<16x128xf32>
    %162 = arith.negf %161 : vector<16x128xf32>
    %163 = math.exp %162 : vector<16x128xf32>
    %cst_65 = arith.constant 1.000000e+00 : f32
    %164 = vector.broadcast %cst_65 : f32 to vector<16x128xf32>
    %165 = arith.addf %164, %163 : vector<16x128xf32>
    %166 = arith.divf %164, %165 : vector<16x128xf32>
    %167 = vector.extract_strided_slice %154 {offsets = [0, 256], sizes = [16, 128], strides = [1, 1]} : vector<16x512xf32> to vector<16x128xf32>
    %168 = math.tanh %167 : vector<16x128xf32>
    %169 = vector.extract_strided_slice %154 {offsets = [0, 384], sizes = [16, 128], strides = [1, 1]} : vector<16x512xf32> to vector<16x128xf32>
    %170 = arith.negf %169 : vector<16x128xf32>
    %171 = math.exp %170 : vector<16x128xf32>
    %cst_66 = arith.constant 1.000000e+00 : f32
    %172 = vector.broadcast %cst_66 : f32 to vector<16x128xf32>
    %173 = arith.addf %172, %171 : vector<16x128xf32>
    %174 = arith.divf %172, %173 : vector<16x128xf32>
    %175 = arith.mulf %166, %135 : vector<16x128xf32>
    %176 = arith.mulf %160, %168 : vector<16x128xf32>
    %177 = arith.addf %175, %176 : vector<16x128xf32>
    %178 = math.tanh %177 : vector<16x128xf32>
    %179 = arith.mulf %174, %178 : vector<16x128xf32>
    %180 = arith.truncf %179 : vector<16x128xf32> to vector<16x128xbf16>
    %c0_67 = arith.constant 0 : index
    %181 = arith.index_cast %147 : i32 to index
    %c0_68 = arith.constant 0 : index
    %182 = vector.load %arg5[%c0_67, %181, %c0_68] : memref<1x128x128xbf16, #tpu.memory_space<vmem>>, vector<1x16x128xbf16>
    %183 = vector.shape_cast %182 : vector<1x16x128xbf16> to vector<16x128xbf16>
    %184 = vector.shape_cast %180 : vector<16x128xbf16> to vector<1x16x128xbf16>
    tpu.vector_store %arg5[%c0_67, %181, %c0_68], %184 {strides = array<i32>} : memref<1x128x128xbf16, #tpu.memory_space<vmem>>, vector<1x16x128xbf16>,
    %c4_i32 = arith.constant 4 : i32
    %c0_i32_69 = arith.constant 0 : i32
    %185 = arith.cmpi eq, %arg0, %c0_i32_69 : i32
    %c7_i32_70 = arith.constant 7 : i32
    %186 = arith.subi %c7_i32_70, %c4_i32 : i32
    %187 = arith.select %185, %c4_i32, %186 : i32
    %c16_i32_71 = arith.constant 16 : i32
    %188 = arith.muli %187, %c16_i32_71 : i32
    %189 = tpu.assume_multiple %188, 16 : i32
    %190 = arith.index_cast %189 : i32 to index
    %c0_72 = arith.constant 0 : index
    %191 = vector.load %arg6[%190, %c0_72] : memref<128x512xf32, #tpu.memory_space<vmem>>, vector<16x512xf32>
    %192 = arith.truncf %179 : vector<16x128xf32> to vector<16x128xbf16>
    %c0_73 = arith.constant 0 : index
    %c0_74 = arith.constant 0 : index
    %c0_75 = arith.constant 0 : index
    %193 = vector.load %arg3[%c0_73, %c0_74, %c0_75] : memref<1x128x512xbf16, #tpu.memory_space<vmem>>, vector<1x128x512xbf16>
    %194 = vector.shape_cast %193 : vector<1x128x512xbf16> to vector<128x512xbf16>
    %cst_76 = arith.constant dense<0.000000e+00> : vector<16x512xf32>
    %195 = tpu.matmul %192, %194, %cst_76 {dimension_numbers = #tpu.dot_dimension_numbers<[1], [0], [0], [1], [0, 0, 1, 1], [], []>} : vector<16x128xbf16>, vector<128x512xbf16>, vector<16x512xf32> -> vector<16x512xf32>
    %196 = arith.addf %191, %195 : vector<16x512xf32>
    %197 = vector.extract_strided_slice %196 {offsets = [0, 0], sizes = [16, 128], strides = [1, 1]} : vector<16x512xf32> to vector<16x128xf32>
    %198 = arith.negf %197 : vector<16x128xf32>
    %199 = math.exp %198 : vector<16x128xf32>
    %cst_77 = arith.constant 1.000000e+00 : f32
    %200 = vector.broadcast %cst_77 : f32 to vector<16x128xf32>
    %201 = arith.addf %200, %199 : vector<16x128xf32>
    %202 = arith.divf %200, %201 : vector<16x128xf32>
    %203 = vector.extract_strided_slice %196 {offsets = [0, 128], sizes = [16, 128], strides = [1, 1]} : vector<16x512xf32> to vector<16x128xf32>
    %204 = arith.negf %203 : vector<16x128xf32>
    %205 = math.exp %204 : vector<16x128xf32>
    %cst_78 = arith.constant 1.000000e+00 : f32
    %206 = vector.broadcast %cst_78 : f32 to vector<16x128xf32>
    %207 = arith.addf %206, %205 : vector<16x128xf32>
    %208 = arith.divf %206, %207 : vector<16x128xf32>
    %209 = vector.extract_strided_slice %196 {offsets = [0, 256], sizes = [16, 128], strides = [1, 1]} : vector<16x512xf32> to vector<16x128xf32>
    %210 = math.tanh %209 : vector<16x128xf32>
    %211 = vector.extract_strided_slice %196 {offsets = [0, 384], sizes = [16, 128], strides = [1, 1]} : vector<16x512xf32> to vector<16x128xf32>
    %212 = arith.negf %211 : vector<16x128xf32>
    %213 = math.exp %212 : vector<16x128xf32>
    %cst_79 = arith.constant 1.000000e+00 : f32
    %214 = vector.broadcast %cst_79 : f32 to vector<16x128xf32>
    %215 = arith.addf %214, %213 : vector<16x128xf32>
    %216 = arith.divf %214, %215 : vector<16x128xf32>
    %217 = arith.mulf %208, %177 : vector<16x128xf32>
    %218 = arith.mulf %202, %210 : vector<16x128xf32>
    %219 = arith.addf %217, %218 : vector<16x128xf32>
    %220 = math.tanh %219 : vector<16x128xf32>
    %221 = arith.mulf %216, %220 : vector<16x128xf32>
    %222 = arith.truncf %221 : vector<16x128xf32> to vector<16x128xbf16>
    %c0_80 = arith.constant 0 : index
    %223 = arith.index_cast %189 : i32 to index
    %c0_81 = arith.constant 0 : index
    %224 = vector.load %arg5[%c0_80, %223, %c0_81] : memref<1x128x128xbf16, #tpu.memory_space<vmem>>, vector<1x16x128xbf16>
    %225 = vector.shape_cast %224 : vector<1x16x128xbf16> to vector<16x128xbf16>
    %226 = vector.shape_cast %222 : vector<16x128xbf16> to vector<1x16x128xbf16>
    tpu.vector_store %arg5[%c0_80, %223, %c0_81], %226 {strides = array<i32>} : memref<1x128x128xbf16, #tpu.memory_space<vmem>>, vector<1x16x128xbf16>,
    %c5_i32 = arith.constant 5 : i32
    %c0_i32_82 = arith.constant 0 : i32
    %227 = arith.cmpi eq, %arg0, %c0_i32_82 : i32
    %c7_i32_83 = arith.constant 7 : i32
    %228 = arith.subi %c7_i32_83, %c5_i32 : i32
    %229 = arith.select %227, %c5_i32, %228 : i32
    %c16_i32_84 = arith.constant 16 : i32
    %230 = arith.muli %229, %c16_i32_84 : i32
    %231 = tpu.assume_multiple %230, 16 : i32
    %232 = arith.index_cast %231 : i32 to index
    %c0_85 = arith.constant 0 : index
    %233 = vector.load %arg6[%232, %c0_85] : memref<128x512xf32, #tpu.memory_space<vmem>>, vector<16x512xf32>
    %234 = arith.truncf %221 : vector<16x128xf32> to vector<16x128xbf16>
    %c0_86 = arith.constant 0 : index
    %c0_87 = arith.constant 0 : index
    %c0_88 = arith.constant 0 : index
    %235 = vector.load %arg3[%c0_86, %c0_87, %c0_88] : memref<1x128x512xbf16, #tpu.memory_space<vmem>>, vector<1x128x512xbf16>
    %236 = vector.shape_cast %235 : vector<1x128x512xbf16> to vector<128x512xbf16>
    %cst_89 = arith.constant dense<0.000000e+00> : vector<16x512xf32>
    %237 = tpu.matmul %234, %236, %cst_89 {dimension_numbers = #tpu.dot_dimension_numbers<[1], [0], [0], [1], [0, 0, 1, 1], [], []>} : vector<16x128xbf16>, vector<128x512xbf16>, vector<16x512xf32> -> vector<16x512xf32>
    %238 = arith.addf %233, %237 : vector<16x512xf32>
    %239 = vector.extract_strided_slice %238 {offsets = [0, 0], sizes = [16, 128], strides = [1, 1]} : vector<16x512xf32> to vector<16x128xf32>
    %240 = arith.negf %239 : vector<16x128xf32>
    %241 = math.exp %240 : vector<16x128xf32>
    %cst_90 = arith.constant 1.000000e+00 : f32
    %242 = vector.broadcast %cst_90 : f32 to vector<16x128xf32>
    %243 = arith.addf %242, %241 : vector<16x128xf32>
    %244 = arith.divf %242, %243 : vector<16x128xf32>
    %245 = vector.extract_strided_slice %238 {offsets = [0, 128], sizes = [16, 128], strides = [1, 1]} : vector<16x512xf32> to vector<16x128xf32>
    %246 = arith.negf %245 : vector<16x128xf32>
    %247 = math.exp %246 : vector<16x128xf32>
    %cst_91 = arith.constant 1.000000e+00 : f32
    %248 = vector.broadcast %cst_91 : f32 to vector<16x128xf32>
    %249 = arith.addf %248, %247 : vector<16x128xf32>
    %250 = arith.divf %248, %249 : vector<16x128xf32>
    %251 = vector.extract_strided_slice %238 {offsets = [0, 256], sizes = [16, 128], strides = [1, 1]} : vector<16x512xf32> to vector<16x128xf32>
    %252 = math.tanh %251 : vector<16x128xf32>
    %253 = vector.extract_strided_slice %238 {offsets = [0, 384], sizes = [16, 128], strides = [1, 1]} : vector<16x512xf32> to vector<16x128xf32>
    %254 = arith.negf %253 : vector<16x128xf32>
    %255 = math.exp %254 : vector<16x128xf32>
    %cst_92 = arith.constant 1.000000e+00 : f32
    %256 = vector.broadcast %cst_92 : f32 to vector<16x128xf32>
    %257 = arith.addf %256, %255 : vector<16x128xf32>
    %258 = arith.divf %256, %257 : vector<16x128xf32>
    %259 = arith.mulf %250, %219 : vector<16x128xf32>
    %260 = arith.mulf %244, %252 : vector<16x128xf32>
    %261 = arith.addf %259, %260 : vector<16x128xf32>
    %262 = math.tanh %261 : vector<16x128xf32>
    %263 = arith.mulf %258, %262 : vector<16x128xf32>
    %264 = arith.truncf %263 : vector<16x128xf32> to vector<16x128xbf16>
    %c0_93 = arith.constant 0 : index
    %265 = arith.index_cast %231 : i32 to index
    %c0_94 = arith.constant 0 : index
    %266 = vector.load %arg5[%c0_93, %265, %c0_94] : memref<1x128x128xbf16, #tpu.memory_space<vmem>>, vector<1x16x128xbf16>
    %267 = vector.shape_cast %266 : vector<1x16x128xbf16> to vector<16x128xbf16>
    %268 = vector.shape_cast %264 : vector<16x128xbf16> to vector<1x16x128xbf16>
    tpu.vector_store %arg5[%c0_93, %265, %c0_94], %268 {strides = array<i32>} : memref<1x128x128xbf16, #tpu.memory_space<vmem>>, vector<1x16x128xbf16>,
    %c6_i32 = arith.constant 6 : i32
    %c0_i32_95 = arith.constant 0 : i32
    %269 = arith.cmpi eq, %arg0, %c0_i32_95 : i32
    %c7_i32_96 = arith.constant 7 : i32
    %270 = arith.subi %c7_i32_96, %c6_i32 : i32
    %271 = arith.select %269, %c6_i32, %270 : i32
    %c16_i32_97 = arith.constant 16 : i32
    %272 = arith.muli %271, %c16_i32_97 : i32
    %273 = tpu.assume_multiple %272, 16 : i32
    %274 = arith.index_cast %273 : i32 to index
    %c0_98 = arith.constant 0 : index
    %275 = vector.load %arg6[%274, %c0_98] : memref<128x512xf32, #tpu.memory_space<vmem>>, vector<16x512xf32>
    %276 = arith.truncf %263 : vector<16x128xf32> to vector<16x128xbf16>
    %c0_99 = arith.constant 0 : index
    %c0_100 = arith.constant 0 : index
    %c0_101 = arith.constant 0 : index
    %277 = vector.load %arg3[%c0_99, %c0_100, %c0_101] : memref<1x128x512xbf16, #tpu.memory_space<vmem>>, vector<1x128x512xbf16>
    %278 = vector.shape_cast %277 : vector<1x128x512xbf16> to vector<128x512xbf16>
    %cst_102 = arith.constant dense<0.000000e+00> : vector<16x512xf32>
    %279 = tpu.matmul %276, %278, %cst_102 {dimension_numbers = #tpu.dot_dimension_numbers<[1], [0], [0], [1], [0, 0, 1, 1], [], []>} : vector<16x128xbf16>, vector<128x512xbf16>, vector<16x512xf32> -> vector<16x512xf32>
    %280 = arith.addf %275, %279 : vector<16x512xf32>
    %281 = vector.extract_strided_slice %280 {offsets = [0, 0], sizes = [16, 128], strides = [1, 1]} : vector<16x512xf32> to vector<16x128xf32>
    %282 = arith.negf %281 : vector<16x128xf32>
    %283 = math.exp %282 : vector<16x128xf32>
    %cst_103 = arith.constant 1.000000e+00 : f32
    %284 = vector.broadcast %cst_103 : f32 to vector<16x128xf32>
    %285 = arith.addf %284, %283 : vector<16x128xf32>
    %286 = arith.divf %284, %285 : vector<16x128xf32>
    %287 = vector.extract_strided_slice %280 {offsets = [0, 128], sizes = [16, 128], strides = [1, 1]} : vector<16x512xf32> to vector<16x128xf32>
    %288 = arith.negf %287 : vector<16x128xf32>
    %289 = math.exp %288 : vector<16x128xf32>
    %cst_104 = arith.constant 1.000000e+00 : f32
    %290 = vector.broadcast %cst_104 : f32 to vector<16x128xf32>
    %291 = arith.addf %290, %289 : vector<16x128xf32>
    %292 = arith.divf %290, %291 : vector<16x128xf32>
    %293 = vector.extract_strided_slice %280 {offsets = [0, 256], sizes = [16, 128], strides = [1, 1]} : vector<16x512xf32> to vector<16x128xf32>
    %294 = math.tanh %293 : vector<16x128xf32>
    %295 = vector.extract_strided_slice %280 {offsets = [0, 384], sizes = [16, 128], strides = [1, 1]} : vector<16x512xf32> to vector<16x128xf32>
    %296 = arith.negf %295 : vector<16x128xf32>
    %297 = math.exp %296 : vector<16x128xf32>
    %cst_105 = arith.constant 1.000000e+00 : f32
    %298 = vector.broadcast %cst_105 : f32 to vector<16x128xf32>
    %299 = arith.addf %298, %297 : vector<16x128xf32>
    %300 = arith.divf %298, %299 : vector<16x128xf32>
    %301 = arith.mulf %292, %261 : vector<16x128xf32>
    %302 = arith.mulf %286, %294 : vector<16x128xf32>
    %303 = arith.addf %301, %302 : vector<16x128xf32>
    %304 = math.tanh %303 : vector<16x128xf32>
    %305 = arith.mulf %300, %304 : vector<16x128xf32>
    %306 = arith.truncf %305 : vector<16x128xf32> to vector<16x128xbf16>
    %c0_106 = arith.constant 0 : index
    %307 = arith.index_cast %273 : i32 to index
    %c0_107 = arith.constant 0 : index
    %308 = vector.load %arg5[%c0_106, %307, %c0_107] : memref<1x128x128xbf16, #tpu.memory_space<vmem>>, vector<1x16x128xbf16>
    %309 = vector.shape_cast %308 : vector<1x16x128xbf16> to vector<16x128xbf16>
    %310 = vector.shape_cast %306 : vector<16x128xbf16> to vector<1x16x128xbf16>
    tpu.vector_store %arg5[%c0_106, %307, %c0_107], %310 {strides = array<i32>} : memref<1x128x128xbf16, #tpu.memory_space<vmem>>, vector<1x16x128xbf16>,
    %c7_i32_108 = arith.constant 7 : i32
    %c0_i32_109 = arith.constant 0 : i32
    %311 = arith.cmpi eq, %arg0, %c0_i32_109 : i32
    %c7_i32_110 = arith.constant 7 : i32
    %312 = arith.subi %c7_i32_110, %c7_i32_108 : i32
    %313 = arith.select %311, %c7_i32_108, %312 : i32
    %c16_i32_111 = arith.constant 16 : i32
    %314 = arith.muli %313, %c16_i32_111 : i32
    %315 = tpu.assume_multiple %314, 16 : i32
    %316 = arith.index_cast %315 : i32 to index
    %c0_112 = arith.constant 0 : index
    %317 = vector.load %arg6[%316, %c0_112] : memref<128x512xf32, #tpu.memory_space<vmem>>, vector<16x512xf32>
    %318 = arith.truncf %305 : vector<16x128xf32> to vector<16x128xbf16>
    %c0_113 = arith.constant 0 : index
    %c0_114 = arith.constant 0 : index
    %c0_115 = arith.constant 0 : index
    %319 = vector.load %arg3[%c0_113, %c0_114, %c0_115] : memref<1x128x512xbf16, #tpu.memory_space<vmem>>, vector<1x128x512xbf16>
    %320 = vector.shape_cast %319 : vector<1x128x512xbf16> to vector<128x512xbf16>
    %cst_116 = arith.constant dense<0.000000e+00> : vector<16x512xf32>
    %321 = tpu.matmul %318, %320, %cst_116 {dimension_numbers = #tpu.dot_dimension_numbers<[1], [0], [0], [1], [0, 0, 1, 1], [], []>} : vector<16x128xbf16>, vector<128x512xbf16>, vector<16x512xf32> -> vector<16x512xf32>
    %322 = arith.addf %317, %321 : vector<16x512xf32>
    %323 = vector.extract_strided_slice %322 {offsets = [0, 0], sizes = [16, 128], strides = [1, 1]} : vector<16x512xf32> to vector<16x128xf32>
    %324 = arith.negf %323 : vector<16x128xf32>
    %325 = math.exp %324 : vector<16x128xf32>
    %cst_117 = arith.constant 1.000000e+00 : f32
    %326 = vector.broadcast %cst_117 : f32 to vector<16x128xf32>
    %327 = arith.addf %326, %325 : vector<16x128xf32>
    %328 = arith.divf %326, %327 : vector<16x128xf32>
    %329 = vector.extract_strided_slice %322 {offsets = [0, 128], sizes = [16, 128], strides = [1, 1]} : vector<16x512xf32> to vector<16x128xf32>
    %330 = arith.negf %329 : vector<16x128xf32>
    %331 = math.exp %330 : vector<16x128xf32>
    %cst_118 = arith.constant 1.000000e+00 : f32
    %332 = vector.broadcast %cst_118 : f32 to vector<16x128xf32>
    %333 = arith.addf %332, %331 : vector<16x128xf32>
    %334 = arith.divf %332, %333 : vector<16x128xf32>
    %335 = vector.extract_strided_slice %322 {offsets = [0, 256], sizes = [16, 128], strides = [1, 1]} : vector<16x512xf32> to vector<16x128xf32>
    %336 = math.tanh %335 : vector<16x128xf32>
    %337 = vector.extract_strided_slice %322 {offsets = [0, 384], sizes = [16, 128], strides = [1, 1]} : vector<16x512xf32> to vector<16x128xf32>
    %338 = arith.negf %337 : vector<16x128xf32>
    %339 = math.exp %338 : vector<16x128xf32>
    %cst_119 = arith.constant 1.000000e+00 : f32
    %340 = vector.broadcast %cst_119 : f32 to vector<16x128xf32>
    %341 = arith.addf %340, %339 : vector<16x128xf32>
    %342 = arith.divf %340, %341 : vector<16x128xf32>
    %343 = arith.mulf %334, %303 : vector<16x128xf32>
    %344 = arith.mulf %328, %336 : vector<16x128xf32>
    %345 = arith.addf %343, %344 : vector<16x128xf32>
    %346 = math.tanh %345 : vector<16x128xf32>
    %347 = arith.mulf %342, %346 : vector<16x128xf32>
    %348 = arith.truncf %347 : vector<16x128xf32> to vector<16x128xbf16>
    %c0_120 = arith.constant 0 : index
    %349 = arith.index_cast %315 : i32 to index
    %c0_121 = arith.constant 0 : index
    %350 = vector.load %arg5[%c0_120, %349, %c0_121] : memref<1x128x128xbf16, #tpu.memory_space<vmem>>, vector<1x16x128xbf16>
    %351 = vector.shape_cast %350 : vector<1x16x128xbf16> to vector<16x128xbf16>
    %352 = vector.shape_cast %348 : vector<16x128xbf16> to vector<1x16x128xbf16>
    tpu.vector_store %arg5[%c0_120, %349, %c0_121], %352 {strides = array<i32>} : memref<1x128x128xbf16, #tpu.memory_space<vmem>>, vector<1x16x128xbf16>,
    %c8_i32 = arith.constant 8 : i32
    return
  }
  func.func @transform_0(%arg0: i32) -> (i32, i32, i32) {
    %c0_i32 = arith.constant 0 : i32
    %c0_i32_0 = arith.constant 0 : i32
    %c0_i32_1 = arith.constant 0 : i32
    %c0_i32_2 = arith.constant 0 : i32
    return %c0_i32, %c0_i32_0, %c0_i32_1 : i32, i32, i32
  }
  func.func @transform_1(%arg0: i32) -> (i32, i32, i32, i32) {
    %c0_i32 = arith.constant 0 : i32
    %c0_i32_0 = arith.constant 0 : i32
    %c0_i32_1 = arith.constant 0 : i32
    %c0_i32_2 = arith.constant 0 : i32
    return %arg0, %c0_i32, %c0_i32_0, %c0_i32_1 : i32, i32, i32, i32
  }
  func.func @transform_2(%arg0: i32) -> (i32, i32, i32) {
    %c0_i32 = arith.constant 0 : i32
    %c0_i32_0 = arith.constant 0 : i32
    %c0_i32_1 = arith.constant 0 : i32
    return %arg0, %c0_i32, %c0_i32_0 : i32, i32, i32
  }
  func.func @transform_3(%arg0: i32) -> (i32, i32, i32) {
    %c0_i32 = arith.constant 0 : i32
    %c0_i32_0 = arith.constant 0 : i32
    %c0_i32_1 = arith.constant 0 : i32
    return %arg0, %c0_i32, %c0_i32_0 : i32, i32, i32
  }
  func.func @transform_4(%arg0: i32) -> (i32, i32, i32) {
    %c0_i32 = arith.constant 0 : i32
    %c0_i32_0 = arith.constant 0 : i32
    %c0_i32_1 = arith.constant 0 : i32
    return %arg0, %c0_i32, %c0_i32_0 : i32, i32, i32
  }
}

module attributes {stable_mosaic.version = 11 : i64} {
  func.func @_bilstm_layer_kernel(%arg0: i32, %arg1: memref<1x128x128xbf16, #tpu.memory_space<vmem>>, %arg2: memref<1x1x128x512xbf16, #tpu.memory_space<vmem>>, %arg3: memref<1x128x512xbf16, #tpu.memory_space<vmem>>, %arg4: memref<1x1x512xf32, #tpu.memory_space<vmem>>, %arg5: memref<1x128x128xbf16, #tpu.memory_space<vmem>>, %arg6: memref<128x512xf32, #tpu.memory_space<vmem>>) attributes {dimension_semantics = [#tpu.dimension_semantics<parallel>], iteration_bounds = array<i64: 2>, scalar_prefetch = 0 : i64, scratch_operands = 1 : i64, tpu.core_type = #tpu.core_type<tc>, window_params = [{pipeline_mode = #tpu.pipeline_mode<synchronous>, transform_indices = @transform_0, window_bounds = array<i64: 1, 128, 128>}, {transform_indices = @transform_1, window_bounds = array<i64: 1, 1, 128, 512>}, {transform_indices = @transform_2, window_bounds = array<i64: 1, 128, 512>}, {transform_indices = @transform_3, window_bounds = array<i64: 1, 1, 512>}, {transform_indices = @transform_4, window_bounds = array<i64: 1, 128, 128>}]} {
    %c0 = arith.constant 0 : index
    %c0_0 = arith.constant 0 : index
    %c0_1 = arith.constant 0 : index
    %0 = vector.load %arg1[%c0, %c0_0, %c0_1] : memref<1x128x128xbf16, #tpu.memory_space<vmem>>, vector<1x128x128xbf16>
    %1 = vector.shape_cast %0 : vector<1x128x128xbf16> to vector<128x128xbf16>
    %c0_2 = arith.constant 0 : index
    %c0_3 = arith.constant 0 : index
    %c0_4 = arith.constant 0 : index
    %c0_5 = arith.constant 0 : index
    %2 = vector.load %arg2[%c0_2, %c0_3, %c0_4, %c0_5] : memref<1x1x128x512xbf16, #tpu.memory_space<vmem>>, vector<1x1x128x512xbf16>
    %3 = vector.shape_cast %2 : vector<1x1x128x512xbf16> to vector<128x512xbf16>
    %cst = arith.constant dense<0.000000e+00> : vector<128x512xf32>
    %4 = tpu.matmul %1, %3, %cst {dimension_numbers = #tpu.dot_dimension_numbers<[1], [0], [0], [1], [0, 0, 1, 1], [], []>} : vector<128x128xbf16>, vector<128x512xbf16>, vector<128x512xf32> -> vector<128x512xf32>
    %c0_6 = arith.constant 0 : index
    %c0_7 = arith.constant 0 : index
    %c0_8 = arith.constant 0 : index
    %5 = vector.load %arg4[%c0_6, %c0_7, %c0_8] : memref<1x1x512xf32, #tpu.memory_space<vmem>>, vector<1x1x512xf32>
    %6 = vector.shape_cast %5 : vector<1x1x512xf32> to vector<1x512xf32>
    %7 = vector.broadcast %6 : vector<1x512xf32> to vector<128x512xf32>
    %8 = arith.addf %4, %7 : vector<128x512xf32>
    %c0_9 = arith.constant 0 : index
    %c0_10 = arith.constant 0 : index
    %9 = vector.load %arg6[%c0_9, %c0_10] : memref<128x512xf32, #tpu.memory_space<vmem>>, vector<128x512xf32>
    tpu.vector_store %arg6[%c0_9, %c0_10], %8 {strides = array<i32>} : memref<128x512xf32, #tpu.memory_space<vmem>>, vector<128x512xf32>,
    %cst_11 = arith.constant 0.000000e+00 : f32
    %10 = vector.broadcast %cst_11 : f32 to vector<16x128xf32>
    %c0_i32 = arith.constant 0 : i32
    %c0_i32_12 = arith.constant 0 : i32
    %11 = arith.cmpi eq, %arg0, %c0_i32_12 : i32
    %c7_i32 = arith.constant 7 : i32
    %12 = arith.subi %c7_i32, %c0_i32 : i32
    %13 = arith.select %11, %c0_i32, %12 : i32
    %c16_i32 = arith.constant 16 : i32
    %14 = arith.muli %13, %c16_i32 : i32
    %15 = tpu.assume_multiple %14, 16 : i32
    %16 = arith.index_cast %15 : i32 to index
    %c0_13 = arith.constant 0 : index
    %17 = vector.load %arg6[%16, %c0_13] : memref<128x512xf32, #tpu.memory_space<vmem>>, vector<16x512xf32>
    %18 = arith.truncf %10 : vector<16x128xf32> to vector<16x128xbf16>
    %c0_14 = arith.constant 0 : index
    %c0_15 = arith.constant 0 : index
    %c0_16 = arith.constant 0 : index
    %19 = vector.load %arg3[%c0_14, %c0_15, %c0_16] : memref<1x128x512xbf16, #tpu.memory_space<vmem>>, vector<1x128x512xbf16>
    %20 = vector.shape_cast %19 : vector<1x128x512xbf16> to vector<128x512xbf16>
    %cst_17 = arith.constant dense<0.000000e+00> : vector<16x512xf32>
    %21 = tpu.matmul %18, %20, %cst_17 {dimension_numbers = #tpu.dot_dimension_numbers<[1], [0], [0], [1], [0, 0, 1, 1], [], []>} : vector<16x128xbf16>, vector<128x512xbf16>, vector<16x512xf32> -> vector<16x512xf32>
    %22 = arith.addf %17, %21 : vector<16x512xf32>
    %23 = vector.extract_strided_slice %22 {offsets = [0, 0], sizes = [16, 128], strides = [1, 1]} : vector<16x512xf32> to vector<16x128xf32>
    %24 = arith.negf %23 : vector<16x128xf32>
    %25 = math.exp %24 : vector<16x128xf32>
    %cst_18 = arith.constant 1.000000e+00 : f32
    %26 = vector.broadcast %cst_18 : f32 to vector<16x128xf32>
    %27 = arith.addf %26, %25 : vector<16x128xf32>
    %28 = arith.divf %26, %27 : vector<16x128xf32>
    %29 = vector.extract_strided_slice %22 {offsets = [0, 128], sizes = [16, 128], strides = [1, 1]} : vector<16x512xf32> to vector<16x128xf32>
    %30 = arith.negf %29 : vector<16x128xf32>
    %31 = math.exp %30 : vector<16x128xf32>
    %cst_19 = arith.constant 1.000000e+00 : f32
    %32 = vector.broadcast %cst_19 : f32 to vector<16x128xf32>
    %33 = arith.addf %32, %31 : vector<16x128xf32>
    %34 = arith.divf %32, %33 : vector<16x128xf32>
    %35 = vector.extract_strided_slice %22 {offsets = [0, 256], sizes = [16, 128], strides = [1, 1]} : vector<16x512xf32> to vector<16x128xf32>
    %36 = math.tanh %35 : vector<16x128xf32>
    %37 = vector.extract_strided_slice %22 {offsets = [0, 384], sizes = [16, 128], strides = [1, 1]} : vector<16x512xf32> to vector<16x128xf32>
    %38 = arith.negf %37 : vector<16x128xf32>
    %39 = math.exp %38 : vector<16x128xf32>
    %cst_20 = arith.constant 1.000000e+00 : f32
    %40 = vector.broadcast %cst_20 : f32 to vector<16x128xf32>
    %41 = arith.addf %40, %39 : vector<16x128xf32>
    %42 = arith.divf %40, %41 : vector<16x128xf32>
    %43 = arith.mulf %34, %10 : vector<16x128xf32>
    %44 = arith.mulf %28, %36 : vector<16x128xf32>
    %45 = arith.addf %43, %44 : vector<16x128xf32>
    %46 = math.tanh %45 : vector<16x128xf32>
    %47 = arith.mulf %42, %46 : vector<16x128xf32>
    %48 = arith.truncf %47 : vector<16x128xf32> to vector<16x128xbf16>
    %c0_21 = arith.constant 0 : index
    %49 = arith.index_cast %15 : i32 to index
    %c0_22 = arith.constant 0 : index
    %50 = vector.load %arg5[%c0_21, %49, %c0_22] : memref<1x128x128xbf16, #tpu.memory_space<vmem>>, vector<1x16x128xbf16>
    %51 = vector.shape_cast %50 : vector<1x16x128xbf16> to vector<16x128xbf16>
    %52 = vector.shape_cast %48 : vector<16x128xbf16> to vector<1x16x128xbf16>
    tpu.vector_store %arg5[%c0_21, %49, %c0_22], %52 {strides = array<i32>} : memref<1x128x128xbf16, #tpu.memory_space<vmem>>, vector<1x16x128xbf16>,
    %c1_i32 = arith.constant 1 : i32
    %c0_i32_23 = arith.constant 0 : i32
    %53 = arith.cmpi eq, %arg0, %c0_i32_23 : i32
    %c7_i32_24 = arith.constant 7 : i32
    %54 = arith.subi %c7_i32_24, %c1_i32 : i32
    %55 = arith.select %53, %c1_i32, %54 : i32
    %c16_i32_25 = arith.constant 16 : i32
    %56 = arith.muli %55, %c16_i32_25 : i32
    %57 = tpu.assume_multiple %56, 16 : i32
    %58 = arith.index_cast %57 : i32 to index
    %c0_26 = arith.constant 0 : index
    %59 = vector.load %arg6[%58, %c0_26] : memref<128x512xf32, #tpu.memory_space<vmem>>, vector<16x512xf32>
    %60 = arith.truncf %47 : vector<16x128xf32> to vector<16x128xbf16>
    %c0_27 = arith.constant 0 : index
    %c0_28 = arith.constant 0 : index
    %c0_29 = arith.constant 0 : index
    %61 = vector.load %arg3[%c0_27, %c0_28, %c0_29] : memref<1x128x512xbf16, #tpu.memory_space<vmem>>, vector<1x128x512xbf16>
    %62 = vector.shape_cast %61 : vector<1x128x512xbf16> to vector<128x512xbf16>
    %cst_30 = arith.constant dense<0.000000e+00> : vector<16x512xf32>
    %63 = tpu.matmul %60, %62, %cst_30 {dimension_numbers = #tpu.dot_dimension_numbers<[1], [0], [0], [1], [0, 0, 1, 1], [], []>} : vector<16x128xbf16>, vector<128x512xbf16>, vector<16x512xf32> -> vector<16x512xf32>
    %64 = arith.addf %59, %63 : vector<16x512xf32>
    %65 = vector.extract_strided_slice %64 {offsets = [0, 0], sizes = [16, 128], strides = [1, 1]} : vector<16x512xf32> to vector<16x128xf32>
    %66 = arith.negf %65 : vector<16x128xf32>
    %67 = math.exp %66 : vector<16x128xf32>
    %cst_31 = arith.constant 1.000000e+00 : f32
    %68 = vector.broadcast %cst_31 : f32 to vector<16x128xf32>
    %69 = arith.addf %68, %67 : vector<16x128xf32>
    %70 = arith.divf %68, %69 : vector<16x128xf32>
    %71 = vector.extract_strided_slice %64 {offsets = [0, 128], sizes = [16, 128], strides = [1, 1]} : vector<16x512xf32> to vector<16x128xf32>
    %72 = arith.negf %71 : vector<16x128xf32>
    %73 = math.exp %72 : vector<16x128xf32>
    %cst_32 = arith.constant 1.000000e+00 : f32
    %74 = vector.broadcast %cst_32 : f32 to vector<16x128xf32>
    %75 = arith.addf %74, %73 : vector<16x128xf32>
    %76 = arith.divf %74, %75 : vector<16x128xf32>
    %77 = vector.extract_strided_slice %64 {offsets = [0, 256], sizes = [16, 128], strides = [1, 1]} : vector<16x512xf32> to vector<16x128xf32>
    %78 = math.tanh %77 : vector<16x128xf32>
    %79 = vector.extract_strided_slice %64 {offsets = [0, 384], sizes = [16, 128], strides = [1, 1]} : vector<16x512xf32> to vector<16x128xf32>
    %80 = arith.negf %79 : vector<16x128xf32>
    %81 = math.exp %80 : vector<16x128xf32>
    %cst_33 = arith.constant 1.000000e+00 : f32
    %82 = vector.broadcast %cst_33 : f32 to vector<16x128xf32>
    %83 = arith.addf %82, %81 : vector<16x128xf32>
    %84 = arith.divf %82, %83 : vector<16x128xf32>
    %85 = arith.mulf %76, %45 : vector<16x128xf32>
    %86 = arith.mulf %70, %78 : vector<16x128xf32>
    %87 = arith.addf %85, %86 : vector<16x128xf32>
    %88 = math.tanh %87 : vector<16x128xf32>
    %89 = arith.mulf %84, %88 : vector<16x128xf32>
    %90 = arith.truncf %89 : vector<16x128xf32> to vector<16x128xbf16>
    %c0_34 = arith.constant 0 : index
    %91 = arith.index_cast %57 : i32 to index
    %c0_35 = arith.constant 0 : index
    %92 = vector.load %arg5[%c0_34, %91, %c0_35] : memref<1x128x128xbf16, #tpu.memory_space<vmem>>, vector<1x16x128xbf16>
    %93 = vector.shape_cast %92 : vector<1x16x128xbf16> to vector<16x128xbf16>
    %94 = vector.shape_cast %90 : vector<16x128xbf16> to vector<1x16x128xbf16>
    tpu.vector_store %arg5[%c0_34, %91, %c0_35], %94 {strides = array<i32>} : memref<1x128x128xbf16, #tpu.memory_space<vmem>>, vector<1x16x128xbf16>,
    %c2_i32 = arith.constant 2 : i32
    %c0_i32_36 = arith.constant 0 : i32
    %95 = arith.cmpi eq, %arg0, %c0_i32_36 : i32
    %c7_i32_37 = arith.constant 7 : i32
    %96 = arith.subi %c7_i32_37, %c2_i32 : i32
    %97 = arith.select %95, %c2_i32, %96 : i32
    %c16_i32_38 = arith.constant 16 : i32
    %98 = arith.muli %97, %c16_i32_38 : i32
    %99 = tpu.assume_multiple %98, 16 : i32
    %100 = arith.index_cast %99 : i32 to index
    %c0_39 = arith.constant 0 : index
    %101 = vector.load %arg6[%100, %c0_39] : memref<128x512xf32, #tpu.memory_space<vmem>>, vector<16x512xf32>
    %102 = arith.truncf %89 : vector<16x128xf32> to vector<16x128xbf16>
    %c0_40 = arith.constant 0 : index
    %c0_41 = arith.constant 0 : index
    %c0_42 = arith.constant 0 : index
    %103 = vector.load %arg3[%c0_40, %c0_41, %c0_42] : memref<1x128x512xbf16, #tpu.memory_space<vmem>>, vector<1x128x512xbf16>
    %104 = vector.shape_cast %103 : vector<1x128x512xbf16> to vector<128x512xbf16>
    %cst_43 = arith.constant dense<0.000000e+00> : vector<16x512xf32>
    %105 = tpu.matmul %102, %104, %cst_43 {dimension_numbers = #tpu.dot_dimension_numbers<[1], [0], [0], [1], [0, 0, 1, 1], [], []>} : vector<16x128xbf16>, vector<128x512xbf16>, vector<16x512xf32> -> vector<16x512xf32>
    %106 = arith.addf %101, %105 : vector<16x512xf32>
    %107 = vector.extract_strided_slice %106 {offsets = [0, 0], sizes = [16, 128], strides = [1, 1]} : vector<16x512xf32> to vector<16x128xf32>
    %108 = arith.negf %107 : vector<16x128xf32>
    %109 = math.exp %108 : vector<16x128xf32>
    %cst_44 = arith.constant 1.000000e+00 : f32
    %110 = vector.broadcast %cst_44 : f32 to vector<16x128xf32>
    %111 = arith.addf %110, %109 : vector<16x128xf32>
    %112 = arith.divf %110, %111 : vector<16x128xf32>
    %113 = vector.extract_strided_slice %106 {offsets = [0, 128], sizes = [16, 128], strides = [1, 1]} : vector<16x512xf32> to vector<16x128xf32>
    %114 = arith.negf %113 : vector<16x128xf32>
    %115 = math.exp %114 : vector<16x128xf32>
    %cst_45 = arith.constant 1.000000e+00 : f32
    %116 = vector.broadcast %cst_45 : f32 to vector<16x128xf32>
    %117 = arith.addf %116, %115 : vector<16x128xf32>
    %118 = arith.divf %116, %117 : vector<16x128xf32>
    %119 = vector.extract_strided_slice %106 {offsets = [0, 256], sizes = [16, 128], strides = [1, 1]} : vector<16x512xf32> to vector<16x128xf32>
    %120 = math.tanh %119 : vector<16x128xf32>
    %121 = vector.extract_strided_slice %106 {offsets = [0, 384], sizes = [16, 128], strides = [1, 1]} : vector<16x512xf32> to vector<16x128xf32>
    %122 = arith.negf %121 : vector<16x128xf32>
    %123 = math.exp %122 : vector<16x128xf32>
    %cst_46 = arith.constant 1.000000e+00 : f32
    %124 = vector.broadcast %cst_46 : f32 to vector<16x128xf32>
    %125 = arith.addf %124, %123 : vector<16x128xf32>
    %126 = arith.divf %124, %125 : vector<16x128xf32>
    %127 = arith.mulf %118, %87 : vector<16x128xf32>
    %128 = arith.mulf %112, %120 : vector<16x128xf32>
    %129 = arith.addf %127, %128 : vector<16x128xf32>
    %130 = math.tanh %129 : vector<16x128xf32>
    %131 = arith.mulf %126, %130 : vector<16x128xf32>
    %132 = arith.truncf %131 : vector<16x128xf32> to vector<16x128xbf16>
    %c0_47 = arith.constant 0 : index
    %133 = arith.index_cast %99 : i32 to index
    %c0_48 = arith.constant 0 : index
    %134 = vector.load %arg5[%c0_47, %133, %c0_48] : memref<1x128x128xbf16, #tpu.memory_space<vmem>>, vector<1x16x128xbf16>
    %135 = vector.shape_cast %134 : vector<1x16x128xbf16> to vector<16x128xbf16>
    %136 = vector.shape_cast %132 : vector<16x128xbf16> to vector<1x16x128xbf16>
    tpu.vector_store %arg5[%c0_47, %133, %c0_48], %136 {strides = array<i32>} : memref<1x128x128xbf16, #tpu.memory_space<vmem>>, vector<1x16x128xbf16>,
    %c3_i32 = arith.constant 3 : i32
    %c0_i32_49 = arith.constant 0 : i32
    %137 = arith.cmpi eq, %arg0, %c0_i32_49 : i32
    %c7_i32_50 = arith.constant 7 : i32
    %138 = arith.subi %c7_i32_50, %c3_i32 : i32
    %139 = arith.select %137, %c3_i32, %138 : i32
    %c16_i32_51 = arith.constant 16 : i32
    %140 = arith.muli %139, %c16_i32_51 : i32
    %141 = tpu.assume_multiple %140, 16 : i32
    %142 = arith.index_cast %141 : i32 to index
    %c0_52 = arith.constant 0 : index
    %143 = vector.load %arg6[%142, %c0_52] : memref<128x512xf32, #tpu.memory_space<vmem>>, vector<16x512xf32>
    %144 = arith.truncf %131 : vector<16x128xf32> to vector<16x128xbf16>
    %c0_53 = arith.constant 0 : index
    %c0_54 = arith.constant 0 : index
    %c0_55 = arith.constant 0 : index
    %145 = vector.load %arg3[%c0_53, %c0_54, %c0_55] : memref<1x128x512xbf16, #tpu.memory_space<vmem>>, vector<1x128x512xbf16>
    %146 = vector.shape_cast %145 : vector<1x128x512xbf16> to vector<128x512xbf16>
    %cst_56 = arith.constant dense<0.000000e+00> : vector<16x512xf32>
    %147 = tpu.matmul %144, %146, %cst_56 {dimension_numbers = #tpu.dot_dimension_numbers<[1], [0], [0], [1], [0, 0, 1, 1], [], []>} : vector<16x128xbf16>, vector<128x512xbf16>, vector<16x512xf32> -> vector<16x512xf32>
    %148 = arith.addf %143, %147 : vector<16x512xf32>
    %149 = vector.extract_strided_slice %148 {offsets = [0, 0], sizes = [16, 128], strides = [1, 1]} : vector<16x512xf32> to vector<16x128xf32>
    %150 = arith.negf %149 : vector<16x128xf32>
    %151 = math.exp %150 : vector<16x128xf32>
    %cst_57 = arith.constant 1.000000e+00 : f32
    %152 = vector.broadcast %cst_57 : f32 to vector<16x128xf32>
    %153 = arith.addf %152, %151 : vector<16x128xf32>
    %154 = arith.divf %152, %153 : vector<16x128xf32>
    %155 = vector.extract_strided_slice %148 {offsets = [0, 128], sizes = [16, 128], strides = [1, 1]} : vector<16x512xf32> to vector<16x128xf32>
    %156 = arith.negf %155 : vector<16x128xf32>
    %157 = math.exp %156 : vector<16x128xf32>
    %cst_58 = arith.constant 1.000000e+00 : f32
    %158 = vector.broadcast %cst_58 : f32 to vector<16x128xf32>
    %159 = arith.addf %158, %157 : vector<16x128xf32>
    %160 = arith.divf %158, %159 : vector<16x128xf32>
    %161 = vector.extract_strided_slice %148 {offsets = [0, 256], sizes = [16, 128], strides = [1, 1]} : vector<16x512xf32> to vector<16x128xf32>
    %162 = math.tanh %161 : vector<16x128xf32>
    %163 = vector.extract_strided_slice %148 {offsets = [0, 384], sizes = [16, 128], strides = [1, 1]} : vector<16x512xf32> to vector<16x128xf32>
    %164 = arith.negf %163 : vector<16x128xf32>
    %165 = math.exp %164 : vector<16x128xf32>
    %cst_59 = arith.constant 1.000000e+00 : f32
    %166 = vector.broadcast %cst_59 : f32 to vector<16x128xf32>
    %167 = arith.addf %166, %165 : vector<16x128xf32>
    %168 = arith.divf %166, %167 : vector<16x128xf32>
    %169 = arith.mulf %160, %129 : vector<16x128xf32>
    %170 = arith.mulf %154, %162 : vector<16x128xf32>
    %171 = arith.addf %169, %170 : vector<16x128xf32>
    %172 = math.tanh %171 : vector<16x128xf32>
    %173 = arith.mulf %168, %172 : vector<16x128xf32>
    %174 = arith.truncf %173 : vector<16x128xf32> to vector<16x128xbf16>
    %c0_60 = arith.constant 0 : index
    %175 = arith.index_cast %141 : i32 to index
    %c0_61 = arith.constant 0 : index
    %176 = vector.load %arg5[%c0_60, %175, %c0_61] : memref<1x128x128xbf16, #tpu.memory_space<vmem>>, vector<1x16x128xbf16>
    %177 = vector.shape_cast %176 : vector<1x16x128xbf16> to vector<16x128xbf16>
    %178 = vector.shape_cast %174 : vector<16x128xbf16> to vector<1x16x128xbf16>
    tpu.vector_store %arg5[%c0_60, %175, %c0_61], %178 {strides = array<i32>} : memref<1x128x128xbf16, #tpu.memory_space<vmem>>, vector<1x16x128xbf16>,
    %c4_i32 = arith.constant 4 : i32
    %c0_i32_62 = arith.constant 0 : i32
    %179 = arith.cmpi eq, %arg0, %c0_i32_62 : i32
    %c7_i32_63 = arith.constant 7 : i32
    %180 = arith.subi %c7_i32_63, %c4_i32 : i32
    %181 = arith.select %179, %c4_i32, %180 : i32
    %c16_i32_64 = arith.constant 16 : i32
    %182 = arith.muli %181, %c16_i32_64 : i32
    %183 = tpu.assume_multiple %182, 16 : i32
    %184 = arith.index_cast %183 : i32 to index
    %c0_65 = arith.constant 0 : index
    %185 = vector.load %arg6[%184, %c0_65] : memref<128x512xf32, #tpu.memory_space<vmem>>, vector<16x512xf32>
    %186 = arith.truncf %173 : vector<16x128xf32> to vector<16x128xbf16>
    %c0_66 = arith.constant 0 : index
    %c0_67 = arith.constant 0 : index
    %c0_68 = arith.constant 0 : index
    %187 = vector.load %arg3[%c0_66, %c0_67, %c0_68] : memref<1x128x512xbf16, #tpu.memory_space<vmem>>, vector<1x128x512xbf16>
    %188 = vector.shape_cast %187 : vector<1x128x512xbf16> to vector<128x512xbf16>
    %cst_69 = arith.constant dense<0.000000e+00> : vector<16x512xf32>
    %189 = tpu.matmul %186, %188, %cst_69 {dimension_numbers = #tpu.dot_dimension_numbers<[1], [0], [0], [1], [0, 0, 1, 1], [], []>} : vector<16x128xbf16>, vector<128x512xbf16>, vector<16x512xf32> -> vector<16x512xf32>
    %190 = arith.addf %185, %189 : vector<16x512xf32>
    %191 = vector.extract_strided_slice %190 {offsets = [0, 0], sizes = [16, 128], strides = [1, 1]} : vector<16x512xf32> to vector<16x128xf32>
    %192 = arith.negf %191 : vector<16x128xf32>
    %193 = math.exp %192 : vector<16x128xf32>
    %cst_70 = arith.constant 1.000000e+00 : f32
    %194 = vector.broadcast %cst_70 : f32 to vector<16x128xf32>
    %195 = arith.addf %194, %193 : vector<16x128xf32>
    %196 = arith.divf %194, %195 : vector<16x128xf32>
    %197 = vector.extract_strided_slice %190 {offsets = [0, 128], sizes = [16, 128], strides = [1, 1]} : vector<16x512xf32> to vector<16x128xf32>
    %198 = arith.negf %197 : vector<16x128xf32>
    %199 = math.exp %198 : vector<16x128xf32>
    %cst_71 = arith.constant 1.000000e+00 : f32
    %200 = vector.broadcast %cst_71 : f32 to vector<16x128xf32>
    %201 = arith.addf %200, %199 : vector<16x128xf32>
    %202 = arith.divf %200, %201 : vector<16x128xf32>
    %203 = vector.extract_strided_slice %190 {offsets = [0, 256], sizes = [16, 128], strides = [1, 1]} : vector<16x512xf32> to vector<16x128xf32>
    %204 = math.tanh %203 : vector<16x128xf32>
    %205 = vector.extract_strided_slice %190 {offsets = [0, 384], sizes = [16, 128], strides = [1, 1]} : vector<16x512xf32> to vector<16x128xf32>
    %206 = arith.negf %205 : vector<16x128xf32>
    %207 = math.exp %206 : vector<16x128xf32>
    %cst_72 = arith.constant 1.000000e+00 : f32
    %208 = vector.broadcast %cst_72 : f32 to vector<16x128xf32>
    %209 = arith.addf %208, %207 : vector<16x128xf32>
    %210 = arith.divf %208, %209 : vector<16x128xf32>
    %211 = arith.mulf %202, %171 : vector<16x128xf32>
    %212 = arith.mulf %196, %204 : vector<16x128xf32>
    %213 = arith.addf %211, %212 : vector<16x128xf32>
    %214 = math.tanh %213 : vector<16x128xf32>
    %215 = arith.mulf %210, %214 : vector<16x128xf32>
    %216 = arith.truncf %215 : vector<16x128xf32> to vector<16x128xbf16>
    %c0_73 = arith.constant 0 : index
    %217 = arith.index_cast %183 : i32 to index
    %c0_74 = arith.constant 0 : index
    %218 = vector.load %arg5[%c0_73, %217, %c0_74] : memref<1x128x128xbf16, #tpu.memory_space<vmem>>, vector<1x16x128xbf16>
    %219 = vector.shape_cast %218 : vector<1x16x128xbf16> to vector<16x128xbf16>
    %220 = vector.shape_cast %216 : vector<16x128xbf16> to vector<1x16x128xbf16>
    tpu.vector_store %arg5[%c0_73, %217, %c0_74], %220 {strides = array<i32>} : memref<1x128x128xbf16, #tpu.memory_space<vmem>>, vector<1x16x128xbf16>,
    %c5_i32 = arith.constant 5 : i32
    %c0_i32_75 = arith.constant 0 : i32
    %221 = arith.cmpi eq, %arg0, %c0_i32_75 : i32
    %c7_i32_76 = arith.constant 7 : i32
    %222 = arith.subi %c7_i32_76, %c5_i32 : i32
    %223 = arith.select %221, %c5_i32, %222 : i32
    %c16_i32_77 = arith.constant 16 : i32
    %224 = arith.muli %223, %c16_i32_77 : i32
    %225 = tpu.assume_multiple %224, 16 : i32
    %226 = arith.index_cast %225 : i32 to index
    %c0_78 = arith.constant 0 : index
    %227 = vector.load %arg6[%226, %c0_78] : memref<128x512xf32, #tpu.memory_space<vmem>>, vector<16x512xf32>
    %228 = arith.truncf %215 : vector<16x128xf32> to vector<16x128xbf16>
    %c0_79 = arith.constant 0 : index
    %c0_80 = arith.constant 0 : index
    %c0_81 = arith.constant 0 : index
    %229 = vector.load %arg3[%c0_79, %c0_80, %c0_81] : memref<1x128x512xbf16, #tpu.memory_space<vmem>>, vector<1x128x512xbf16>
    %230 = vector.shape_cast %229 : vector<1x128x512xbf16> to vector<128x512xbf16>
    %cst_82 = arith.constant dense<0.000000e+00> : vector<16x512xf32>
    %231 = tpu.matmul %228, %230, %cst_82 {dimension_numbers = #tpu.dot_dimension_numbers<[1], [0], [0], [1], [0, 0, 1, 1], [], []>} : vector<16x128xbf16>, vector<128x512xbf16>, vector<16x512xf32> -> vector<16x512xf32>
    %232 = arith.addf %227, %231 : vector<16x512xf32>
    %233 = vector.extract_strided_slice %232 {offsets = [0, 0], sizes = [16, 128], strides = [1, 1]} : vector<16x512xf32> to vector<16x128xf32>
    %234 = arith.negf %233 : vector<16x128xf32>
    %235 = math.exp %234 : vector<16x128xf32>
    %cst_83 = arith.constant 1.000000e+00 : f32
    %236 = vector.broadcast %cst_83 : f32 to vector<16x128xf32>
    %237 = arith.addf %236, %235 : vector<16x128xf32>
    %238 = arith.divf %236, %237 : vector<16x128xf32>
    %239 = vector.extract_strided_slice %232 {offsets = [0, 128], sizes = [16, 128], strides = [1, 1]} : vector<16x512xf32> to vector<16x128xf32>
    %240 = arith.negf %239 : vector<16x128xf32>
    %241 = math.exp %240 : vector<16x128xf32>
    %cst_84 = arith.constant 1.000000e+00 : f32
    %242 = vector.broadcast %cst_84 : f32 to vector<16x128xf32>
    %243 = arith.addf %242, %241 : vector<16x128xf32>
    %244 = arith.divf %242, %243 : vector<16x128xf32>
    %245 = vector.extract_strided_slice %232 {offsets = [0, 256], sizes = [16, 128], strides = [1, 1]} : vector<16x512xf32> to vector<16x128xf32>
    %246 = math.tanh %245 : vector<16x128xf32>
    %247 = vector.extract_strided_slice %232 {offsets = [0, 384], sizes = [16, 128], strides = [1, 1]} : vector<16x512xf32> to vector<16x128xf32>
    %248 = arith.negf %247 : vector<16x128xf32>
    %249 = math.exp %248 : vector<16x128xf32>
    %cst_85 = arith.constant 1.000000e+00 : f32
    %250 = vector.broadcast %cst_85 : f32 to vector<16x128xf32>
    %251 = arith.addf %250, %249 : vector<16x128xf32>
    %252 = arith.divf %250, %251 : vector<16x128xf32>
    %253 = arith.mulf %244, %213 : vector<16x128xf32>
    %254 = arith.mulf %238, %246 : vector<16x128xf32>
    %255 = arith.addf %253, %254 : vector<16x128xf32>
    %256 = math.tanh %255 : vector<16x128xf32>
    %257 = arith.mulf %252, %256 : vector<16x128xf32>
    %258 = arith.truncf %257 : vector<16x128xf32> to vector<16x128xbf16>
    %c0_86 = arith.constant 0 : index
    %259 = arith.index_cast %225 : i32 to index
    %c0_87 = arith.constant 0 : index
    %260 = vector.load %arg5[%c0_86, %259, %c0_87] : memref<1x128x128xbf16, #tpu.memory_space<vmem>>, vector<1x16x128xbf16>
    %261 = vector.shape_cast %260 : vector<1x16x128xbf16> to vector<16x128xbf16>
    %262 = vector.shape_cast %258 : vector<16x128xbf16> to vector<1x16x128xbf16>
    tpu.vector_store %arg5[%c0_86, %259, %c0_87], %262 {strides = array<i32>} : memref<1x128x128xbf16, #tpu.memory_space<vmem>>, vector<1x16x128xbf16>,
    %c6_i32 = arith.constant 6 : i32
    %c0_i32_88 = arith.constant 0 : i32
    %263 = arith.cmpi eq, %arg0, %c0_i32_88 : i32
    %c7_i32_89 = arith.constant 7 : i32
    %264 = arith.subi %c7_i32_89, %c6_i32 : i32
    %265 = arith.select %263, %c6_i32, %264 : i32
    %c16_i32_90 = arith.constant 16 : i32
    %266 = arith.muli %265, %c16_i32_90 : i32
    %267 = tpu.assume_multiple %266, 16 : i32
    %268 = arith.index_cast %267 : i32 to index
    %c0_91 = arith.constant 0 : index
    %269 = vector.load %arg6[%268, %c0_91] : memref<128x512xf32, #tpu.memory_space<vmem>>, vector<16x512xf32>
    %270 = arith.truncf %257 : vector<16x128xf32> to vector<16x128xbf16>
    %c0_92 = arith.constant 0 : index
    %c0_93 = arith.constant 0 : index
    %c0_94 = arith.constant 0 : index
    %271 = vector.load %arg3[%c0_92, %c0_93, %c0_94] : memref<1x128x512xbf16, #tpu.memory_space<vmem>>, vector<1x128x512xbf16>
    %272 = vector.shape_cast %271 : vector<1x128x512xbf16> to vector<128x512xbf16>
    %cst_95 = arith.constant dense<0.000000e+00> : vector<16x512xf32>
    %273 = tpu.matmul %270, %272, %cst_95 {dimension_numbers = #tpu.dot_dimension_numbers<[1], [0], [0], [1], [0, 0, 1, 1], [], []>} : vector<16x128xbf16>, vector<128x512xbf16>, vector<16x512xf32> -> vector<16x512xf32>
    %274 = arith.addf %269, %273 : vector<16x512xf32>
    %275 = vector.extract_strided_slice %274 {offsets = [0, 0], sizes = [16, 128], strides = [1, 1]} : vector<16x512xf32> to vector<16x128xf32>
    %276 = arith.negf %275 : vector<16x128xf32>
    %277 = math.exp %276 : vector<16x128xf32>
    %cst_96 = arith.constant 1.000000e+00 : f32
    %278 = vector.broadcast %cst_96 : f32 to vector<16x128xf32>
    %279 = arith.addf %278, %277 : vector<16x128xf32>
    %280 = arith.divf %278, %279 : vector<16x128xf32>
    %281 = vector.extract_strided_slice %274 {offsets = [0, 128], sizes = [16, 128], strides = [1, 1]} : vector<16x512xf32> to vector<16x128xf32>
    %282 = arith.negf %281 : vector<16x128xf32>
    %283 = math.exp %282 : vector<16x128xf32>
    %cst_97 = arith.constant 1.000000e+00 : f32
    %284 = vector.broadcast %cst_97 : f32 to vector<16x128xf32>
    %285 = arith.addf %284, %283 : vector<16x128xf32>
    %286 = arith.divf %284, %285 : vector<16x128xf32>
    %287 = vector.extract_strided_slice %274 {offsets = [0, 256], sizes = [16, 128], strides = [1, 1]} : vector<16x512xf32> to vector<16x128xf32>
    %288 = math.tanh %287 : vector<16x128xf32>
    %289 = vector.extract_strided_slice %274 {offsets = [0, 384], sizes = [16, 128], strides = [1, 1]} : vector<16x512xf32> to vector<16x128xf32>
    %290 = arith.negf %289 : vector<16x128xf32>
    %291 = math.exp %290 : vector<16x128xf32>
    %cst_98 = arith.constant 1.000000e+00 : f32
    %292 = vector.broadcast %cst_98 : f32 to vector<16x128xf32>
    %293 = arith.addf %292, %291 : vector<16x128xf32>
    %294 = arith.divf %292, %293 : vector<16x128xf32>
    %295 = arith.mulf %286, %255 : vector<16x128xf32>
    %296 = arith.mulf %280, %288 : vector<16x128xf32>
    %297 = arith.addf %295, %296 : vector<16x128xf32>
    %298 = math.tanh %297 : vector<16x128xf32>
    %299 = arith.mulf %294, %298 : vector<16x128xf32>
    %300 = arith.truncf %299 : vector<16x128xf32> to vector<16x128xbf16>
    %c0_99 = arith.constant 0 : index
    %301 = arith.index_cast %267 : i32 to index
    %c0_100 = arith.constant 0 : index
    %302 = vector.load %arg5[%c0_99, %301, %c0_100] : memref<1x128x128xbf16, #tpu.memory_space<vmem>>, vector<1x16x128xbf16>
    %303 = vector.shape_cast %302 : vector<1x16x128xbf16> to vector<16x128xbf16>
    %304 = vector.shape_cast %300 : vector<16x128xbf16> to vector<1x16x128xbf16>
    tpu.vector_store %arg5[%c0_99, %301, %c0_100], %304 {strides = array<i32>} : memref<1x128x128xbf16, #tpu.memory_space<vmem>>, vector<1x16x128xbf16>,
    %c7_i32_101 = arith.constant 7 : i32
    %c0_i32_102 = arith.constant 0 : i32
    %305 = arith.cmpi eq, %arg0, %c0_i32_102 : i32
    %c7_i32_103 = arith.constant 7 : i32
    %306 = arith.subi %c7_i32_103, %c7_i32_101 : i32
    %307 = arith.select %305, %c7_i32_101, %306 : i32
    %c16_i32_104 = arith.constant 16 : i32
    %308 = arith.muli %307, %c16_i32_104 : i32
    %309 = tpu.assume_multiple %308, 16 : i32
    %310 = arith.index_cast %309 : i32 to index
    %c0_105 = arith.constant 0 : index
    %311 = vector.load %arg6[%310, %c0_105] : memref<128x512xf32, #tpu.memory_space<vmem>>, vector<16x512xf32>
    %312 = arith.truncf %299 : vector<16x128xf32> to vector<16x128xbf16>
    %c0_106 = arith.constant 0 : index
    %c0_107 = arith.constant 0 : index
    %c0_108 = arith.constant 0 : index
    %313 = vector.load %arg3[%c0_106, %c0_107, %c0_108] : memref<1x128x512xbf16, #tpu.memory_space<vmem>>, vector<1x128x512xbf16>
    %314 = vector.shape_cast %313 : vector<1x128x512xbf16> to vector<128x512xbf16>
    %cst_109 = arith.constant dense<0.000000e+00> : vector<16x512xf32>
    %315 = tpu.matmul %312, %314, %cst_109 {dimension_numbers = #tpu.dot_dimension_numbers<[1], [0], [0], [1], [0, 0, 1, 1], [], []>} : vector<16x128xbf16>, vector<128x512xbf16>, vector<16x512xf32> -> vector<16x512xf32>
    %316 = arith.addf %311, %315 : vector<16x512xf32>
    %317 = vector.extract_strided_slice %316 {offsets = [0, 0], sizes = [16, 128], strides = [1, 1]} : vector<16x512xf32> to vector<16x128xf32>
    %318 = arith.negf %317 : vector<16x128xf32>
    %319 = math.exp %318 : vector<16x128xf32>
    %cst_110 = arith.constant 1.000000e+00 : f32
    %320 = vector.broadcast %cst_110 : f32 to vector<16x128xf32>
    %321 = arith.addf %320, %319 : vector<16x128xf32>
    %322 = arith.divf %320, %321 : vector<16x128xf32>
    %323 = vector.extract_strided_slice %316 {offsets = [0, 128], sizes = [16, 128], strides = [1, 1]} : vector<16x512xf32> to vector<16x128xf32>
    %324 = arith.negf %323 : vector<16x128xf32>
    %325 = math.exp %324 : vector<16x128xf32>
    %cst_111 = arith.constant 1.000000e+00 : f32
    %326 = vector.broadcast %cst_111 : f32 to vector<16x128xf32>
    %327 = arith.addf %326, %325 : vector<16x128xf32>
    %328 = arith.divf %326, %327 : vector<16x128xf32>
    %329 = vector.extract_strided_slice %316 {offsets = [0, 256], sizes = [16, 128], strides = [1, 1]} : vector<16x512xf32> to vector<16x128xf32>
    %330 = math.tanh %329 : vector<16x128xf32>
    %331 = vector.extract_strided_slice %316 {offsets = [0, 384], sizes = [16, 128], strides = [1, 1]} : vector<16x512xf32> to vector<16x128xf32>
    %332 = arith.negf %331 : vector<16x128xf32>
    %333 = math.exp %332 : vector<16x128xf32>
    %cst_112 = arith.constant 1.000000e+00 : f32
    %334 = vector.broadcast %cst_112 : f32 to vector<16x128xf32>
    %335 = arith.addf %334, %333 : vector<16x128xf32>
    %336 = arith.divf %334, %335 : vector<16x128xf32>
    %337 = arith.mulf %328, %297 : vector<16x128xf32>
    %338 = arith.mulf %322, %330 : vector<16x128xf32>
    %339 = arith.addf %337, %338 : vector<16x128xf32>
    %340 = math.tanh %339 : vector<16x128xf32>
    %341 = arith.mulf %336, %340 : vector<16x128xf32>
    %342 = arith.truncf %341 : vector<16x128xf32> to vector<16x128xbf16>
    %c0_113 = arith.constant 0 : index
    %343 = arith.index_cast %309 : i32 to index
    %c0_114 = arith.constant 0 : index
    %344 = vector.load %arg5[%c0_113, %343, %c0_114] : memref<1x128x128xbf16, #tpu.memory_space<vmem>>, vector<1x16x128xbf16>
    %345 = vector.shape_cast %344 : vector<1x16x128xbf16> to vector<16x128xbf16>
    %346 = vector.shape_cast %342 : vector<16x128xbf16> to vector<1x16x128xbf16>
    tpu.vector_store %arg5[%c0_113, %343, %c0_114], %346 {strides = array<i32>} : memref<1x128x128xbf16, #tpu.memory_space<vmem>>, vector<1x16x128xbf16>,
    %c8_i32 = arith.constant 8 : i32
    return
  }
  func.func @transform_0(%arg0: i32) -> (i32, i32, i32) {
    %c0_i32 = arith.constant 0 : i32
    %c0_i32_0 = arith.constant 0 : i32
    %c0_i32_1 = arith.constant 0 : i32
    %c0_i32_2 = arith.constant 0 : i32
    return %c0_i32, %c0_i32_0, %c0_i32_1 : i32, i32, i32
  }
  func.func @transform_1(%arg0: i32) -> (i32, i32, i32, i32) {
    %c0_i32 = arith.constant 0 : i32
    %c0_i32_0 = arith.constant 0 : i32
    %c0_i32_1 = arith.constant 0 : i32
    %c0_i32_2 = arith.constant 0 : i32
    return %arg0, %c0_i32, %c0_i32_0, %c0_i32_1 : i32, i32, i32, i32
  }
  func.func @transform_2(%arg0: i32) -> (i32, i32, i32) {
    %c0_i32 = arith.constant 0 : i32
    %c0_i32_0 = arith.constant 0 : i32
    %c0_i32_1 = arith.constant 0 : i32
    return %arg0, %c0_i32, %c0_i32_0 : i32, i32, i32
  }
  func.func @transform_3(%arg0: i32) -> (i32, i32, i32) {
    %c0_i32 = arith.constant 0 : i32
    %c0_i32_0 = arith.constant 0 : i32
    %c0_i32_1 = arith.constant 0 : i32
    return %arg0, %c0_i32, %c0_i32_0 : i32, i32, i32
  }
  func.func @transform_4(%arg0: i32) -> (i32, i32, i32) {
    %c0_i32 = arith.constant 0 : i32
    %c0_i32_0 = arith.constant 0 : i32
    %c0_i32_1 = arith.constant 0 : i32
    return %arg0, %c0_i32, %c0_i32_0 : i32, i32, i32
  }
}

</mosaic_0001>

<bundles_post_ra>
// kernel: sentence_classifier_forward.3
= control target key start
LH: loop header
LB: loop body
LE: loop exit
PB: predicated region body
PF: predicated region fallthrough
CT: control target
= control target key end

     0   :  { %s5532_s15 = smov 0   ;;  %s6454_s0 = inlined_call_operand.vmem [shape: bf16[2,128,128], index: 0, kind: input, shape index: {}]   ;;  %s6455_s1 = inlined_call_operand.vmem [shape: bf16[2,2,128,512], index: 1, kind: input, shape index: {}]   ;;  %s6456_s2 = inlined_call_operand.vmem [shape: bf16[2,128,512], index: 2, kind: input, shape index: {}]   ;;  %s6457_s3 = inlined_call_operand.vmem [shape: f32[2,1,512], index: 3, kind: input, shape index: {}]   ;;  %s6458_s4 = inlined_call_operand.vmem [shape: bf16[2,128,128], index: 4, kind: output, shape index: {}]  }
   0x1 LB: > { %s5538_s16 = sadd.s32 4294967295, %s5504_s15   ;;  %p4356_p0 = scmp.ge.s32.totalorder %s5504_s15, 1  ;;  %s5504_s15 = sphi %s5532_s15, %s14_s15  }
   0x2   : > { %p181_p1 = scmp.lt.s32.totalorder %s5504_s15, 3 }
   0x4   : > { %p182_p2 = pnand %p4356_p0, %p181_p1 }
   0x5   : > { %p216_p3 = scmp.lt.s32.totalorder (!%p182_p2), %s5538_s16, 1  ;;  %v5506_v0 = vmov (!%p182_p2), 0   ;;  %v5034_v35 = vld [vmem:[%s6454_s0 + $0x40] sm:$0xff] (!%p182_p2)   ;;  %v5038_v43 = vld [vmem:[%s6454_s0 + $0x48] sm:$0xff] (!%p182_p2)   ;;  %v5045_v52 = vld [vmem:[%s6454_s0 + $0x50] sm:$0xff] (!%p182_p2)   ;;  %p1352_p4 = scmp.eq.s32.totalorder (!%p182_p2), %s5538_s16, 0 }
   0x6   : > { %185 = sbr.rel (%p182_p2) target bundleno = 2287 (0x8ef), region = 36  ;;  %574 = vmatprep.mubr.bf16.mxu0 (!%p182_p2), %v5506_v0  ;;  %687 = vmatprep.mubr.bf16.mxu1 (!%p182_p2), %v5506_v0  ;;  %v5052_v61 = vld [vmem:[%s6454_s0 + $0x58] sm:$0xff] (!%p182_p2)  }
   0xd   : > { %s5546_s17 = scalar_select %p216_p3, %s5538_s16, 1 }
   0xe   : > { %s1353_s14 = scalar_select %p1352_p4, 0, 7 }
   0xf   : > { %s4846_s18 = sshll.u32 %s5546_s17, 9  ;;  %s4847_s26 = sshll.u32 %s5546_s17, 8 }
  0x10   : > { %s5552_s21 = scalar_lea.vmem %s6455_s1, %s4846_s18  ;;  %s5615_s29 = scalar_lea.vmem %s6456_s2, %s4847_s26 }
  0x11   : > { %v4986_v1 = vld [vmem:[%s5552_s21 + $0x104] ss:$16 sps:$4 sm:$0xff]   ;;  %v4988_v2 = vld [vmem:[%s5552_s21 + $0x10c] ss:$16 sps:$4 sm:$0xff]   ;;  %v4990_v3 = vld [vmem:[%s5552_s21 + $0x100] ss:$16 sps:$4 sm:$0xff]  }
  0x12   : > { %542 = vmatprep.subr.bf16.mxu0 %v4986_v1  ;;  %v4991_v4 = vld [vmem:[%s5552_s21 + $0x108] ss:$16 sps:$4 sm:$0xff]   ;;  %655 = vmatprep.subr.bf16.mxu1 %v4988_v2  ;;  %v4992_v5 = vld [vmem:[%s5552_s21 + $0x124] ss:$16 sps:$4 sm:$0xff]   ;;  %v4994_v6 = vld [vmem:[%s5552_s21 + $0x12c] ss:$16 sps:$4 sm:$0xff]  }
  0x13   : > { %543 = vmatpush1.bf16.msra.mxu0 %v4990_v3  ;;  %656 = vmatpush1.bf16.msra.mxu1 %v4991_v4  ;;  %v4996_v7 = vld [vmem:[%s5552_s21 + $0x120] ss:$16 sps:$4 sm:$0xff]   ;;  %v4997_v8 = vld [vmem:[%s5552_s21 + $0x128] ss:$16 sps:$4 sm:$0xff]   ;;  %v4998_v9 = vld [vmem:[%s5552_s21 + $0x144] ss:$16 sps:$4 sm:$0xff]  }
  0x14   : > { %544 = vmatprep.subr.bf16.mxu0 %v4992_v5  ;;  %657 = vmatprep.subr.bf16.mxu1 %v4994_v6  ;;  %v5000_v10 = vld [vmem:[%s5552_s21 + $0x14c] ss:$16 sps:$4 sm:$0xff]   ;;  %v5002_v11 = vld [vmem:[%s5552_s21 + $0x140] ss:$16 sps:$4 sm:$0xff]   ;;  %v5003_v12 = vld [vmem:[%s5552_s21 + $0x148] ss:$16 sps:$4 sm:$0xff]  }
  0x15   : > { %v5004_v13 = vld [vmem:[%s5552_s21 + $0x164] ss:$16 sps:$4 sm:$0xff]   ;;  %v5006_v14 = vld [vmem:[%s5552_s21 + $0x16c] ss:$16 sps:$4 sm:$0xff]   ;;  %v5008_v15 = vld [vmem:[%s5552_s21 + $0x160] ss:$16 sps:$4 sm:$0xff]  }
  0x16   : > { %v5009_v16 = vld [vmem:[%s5552_s21 + $0x168] ss:$16 sps:$4 sm:$0xff]   ;;  %v5010_v17 = vld [vmem:[%s5552_s21 + $0x184] ss:$16 sps:$4 sm:$0xff]   ;;  %v5012_v18 = vld [vmem:[%s5552_s21 + $0x18c] ss:$16 sps:$4 sm:$0xff]  }
  0x17   : > { %545 = vmatpush1.bf16.msra.mxu0 %v4996_v7  ;;  %658 = vmatpush1.bf16.msra.mxu1 %v4997_v8  ;;  %v5014_v19 = vld [vmem:[%s5552_s21 + $0x180] ss:$16 sps:$4 sm:$0xff]   ;;  %v5015_v20 = vld [vmem:[%s5552_s21 + $0x188] ss:$16 sps:$4 sm:$0xff]   ;;  %v5016_v21 = vld [vmem:[%s5552_s21 + $0x1a4] ss:$16 sps:$4 sm:$0xff]  }
  0x18   : > { %546 = vmatprep.subr.bf16.mxu0 %v4998_v9  ;;  %659 = vmatprep.subr.bf16.mxu1 %v5000_v10  ;;  %v5018_v22 = vld [vmem:[%s5552_s21 + $0x1ac] ss:$16 sps:$4 sm:$0xff]   ;;  %v5020_v23 = vld [vmem:[%s5552_s21 + $0x1a0] ss:$16 sps:$4 sm:$0xff]   ;;  %v5021_v24 = vld [vmem:[%s5552_s21 + $0x1a8] ss:$16 sps:$4 sm:$0xff]  }
  0x19   : > { %v5022_v25 = vld [vmem:[%s5552_s21 + $0x1c4] ss:$16 sps:$4 sm:$0xff]   ;;  %v5024_v26 = vld [vmem:[%s5552_s21 + $0x1cc] ss:$16 sps:$4 sm:$0xff]   ;;  %v5026_v27 = vld [vmem:[%s5552_s21 + $0x1c0] ss:$16 sps:$4 sm:$0xff]  }
  0x1a   : > { %v5027_v28 = vld [vmem:[%s5552_s21 + $0x1c8] ss:$16 sps:$4 sm:$0xff]   ;;  %v5028_v29 = vld [vmem:[%s5552_s21 + $0x1e4] ss:$16 sps:$4 sm:$0xff]   ;;  %v5030_v30 = vld [vmem:[%s5552_s21 + $0x1ec] ss:$16 sps:$4 sm:$0xff]  }
  0x1b   : > { %547 = vmatpush1.bf16.msra.mxu0 %v5002_v11  ;;  %660 = vmatpush1.bf16.msra.mxu1 %v5003_v12  ;;  %v5032_v31 = vld [vmem:[%s5552_s21 + $0x1e0] ss:$16 sps:$4 sm:$0xff]   ;;  %v5033_v32 = vld [vmem:[%s5552_s21 + $0x1e8] ss:$16 sps:$4 sm:$0xff]   ;;  %v5037_v33 = vld [vmem:[%s5552_s21 + $0x4] ss:$16 sps:$4 sm:$0xff]  }
  0x1c   : > { %548 = vmatprep.subr.bf16.mxu0 %v5004_v13  ;;  %661 = vmatprep.subr.bf16.mxu1 %v5006_v14  ;;  %v5044_v34 = vld [vmem:[%s5552_s21 + $0xc] ss:$16 sps:$4 sm:$0xff]   ;;  %v5035_v36 = vld [vmem:[%s5552_s21] ss:$16 sps:$4 sm:$0xff]   ;;  %v5041_v37 = vld [vmem:[%s5552_s21 + $0x24] ss:$16 sps:$4 sm:$0xff]  }
  0x1d   : > { %v5042_v38 = vld [vmem:[%s5552_s21 + $0x8] ss:$16 sps:$4 sm:$0xff]   ;;  %v5051_v39 = vld [vmem:[%s5552_s21 + $0x2c] ss:$16 sps:$4 sm:$0xff]   ;;  %v5039_v40 = vld [vmem:[%s5552_s21 + $0x20] ss:$16 sps:$4 sm:$0xff]  }
  0x1e   : > { %v5048_v41 = vld [vmem:[%s5552_s21 + $0x44] ss:$16 sps:$4 sm:$0xff]   ;;  %v5049_v42 = vld [vmem:[%s5552_s21 + $0x28] ss:$16 sps:$4 sm:$0xff]   ;;  %v5046_v44 = vld [vmem:[%s5552_s21 + $0x40] ss:$16 sps:$4 sm:$0xff]  }
  0x1f   : > { %549 = vmatpush1.bf16.msra.mxu0 %v5008_v15  ;;  %662 = vmatpush1.bf16.msra.mxu1 %v5009_v16  ;;  %v5055_v45 = vld [vmem:[%s5552_s21 + $0x64] ss:$16 sps:$4 sm:$0xff]   ;;  %v5058_v46 = vld [vmem:[%s5552_s21 + $0x4c] ss:$16 sps:$4 sm:$0xff]   ;;  %v5056_v47 = vld [vmem:[%s5552_s21 + $0x48] ss:$16 sps:$4 sm:$0xff]  }
  0x20   : > { %550 = vmatprep.subr.bf16.mxu0 %v5010_v17  ;;  %663 = vmatprep.subr.bf16.mxu1 %v5012_v18  ;;  %v5065_v48 = vld [vmem:[%s5552_s21 + $0x6c] ss:$16 sps:$4 sm:$0xff]   ;;  %v5053_v49 = vld [vmem:[%s5552_s21 + $0x60] ss:$16 sps:$4 sm:$0xff]   ;;  %v5062_v50 = vld [vmem:[%s5552_s21 + $0x84] ss:$16 sps:$4 sm:$0xff]  }
  0x21   : > { %v5063_v51 = vld [vmem:[%s5552_s21 + $0x68] ss:$16 sps:$4 sm:$0xff]   ;;  %v5060_v53 = vld [vmem:[%s5552_s21 + $0x80] ss:$16 sps:$4 sm:$0xff]   ;;  %v5069_v54 = vld [vmem:[%s5552_s21 + $0xa4] ss:$16 sps:$4 sm:$0xff]  }
  0x22   : > { %v5072_v55 = vld [vmem:[%s5552_s21 + $0x8c] ss:$16 sps:$4 sm:$0xff]   ;;  %v5070_v56 = vld [vmem:[%s5552_s21 + $0x88] ss:$16 sps:$4 sm:$0xff]   ;;  %v5067_v58 = vld [vmem:[%s5552_s21 + $0xa0] ss:$16 sps:$4 sm:$0xff]  }
  0x23   : > { %551 = vmatpush1.bf16.msra.mxu0 %v5014_v19  ;;  %664 = vmatpush1.bf16.msra.mxu1 %v5015_v20  ;;  %v5079_v57 = vld [vmem:[%s5552_s21 + $0xac] ss:$16 sps:$4 sm:$0xff]   ;;  %v5076_v59 = vld [vmem:[%s5552_s21 + $0xc4] ss:$16 sps:$4 sm:$0xff]   ;;  %v5077_v60 = vld [vmem:[%s5552_s21 + $0xa8] ss:$16 sps:$4 sm:$0xff]  }
  0x24   : > { %552 = vmatprep.subr.bf16.mxu0 %v5016_v21  ;;  %665 = vmatprep.subr.bf16.mxu1 %v5018_v22  ;;  %v5074_v62 = vld [vmem:[%s5552_s21 + $0xc0] ss:$16 sps:$4 sm:$0xff]   ;;  %v5083_v63 = vld [vmem:[%s5552_s21 + $0xe4] ss:$16 sps:$4 sm:$0xff]   ;;  %v5086_v1 = vld [vmem:[%s5552_s21 + $0xcc] ss:$16 sps:$4 sm:$0xff]  }
  0x25   : > { %v5084_v2 = vld [vmem:[%s5552_s21 + $0xc8] ss:$16 sps:$4 sm:$0xff]   ;;  %v5089_v3 = vld [vmem:[%s5552_s21 + $0xec] ss:$16 sps:$4 sm:$0xff]   ;;  %v5081_v4 = vld [vmem:[%s5552_s21 + $0xe0] ss:$16 sps:$4 sm:$0xff]  }
  0x26   : > { %v5087_v5 = vld [vmem:[%s5552_s21 + $0xe8] ss:$16 sps:$4 sm:$0xff]   ;;  %v5645_v6 = vld [vmem:[%s5615_s29 + $0x4] ss:$16 sps:$4 sm:$0xff]   ;;  %v5651_v8 = vld [vmem:[%s5615_s29 + $0xc] ss:$16 sps:$4 sm:$0xff]  }
  0x27   : > { %553 = vmatpush1.bf16.msra.mxu0 %v5020_v23  ;;  %666 = vmatpush1.bf16.msra.mxu1 %v5021_v24  ;;  %v5059_v7 = vld [vmem:[%s6454_s0 + $0x60] sm:$0xff]   ;;  %v5066_v9 = vld [vmem:[%s6454_s0 + $0x68] sm:$0xff]   ;;  %v5073_v10 = vld [vmem:[%s6454_s0 + $0x70] sm:$0xff]   ;;  %s4361_s10 = sshll.u32 %s5546_s17, 2  ;;  %s4492_s18 = sshll.u32 %s1353_s14, 4 }
  0x28   : > { %554 = vmatprep.subr.bf16.mxu0 %v5022_v25  ;;  %667 = vmatprep.subr.bf16.mxu1 %v5024_v26  ;;  %v5080_v11 = vld [vmem:[%s6454_s0 + $0x78] sm:$0xff]   ;;  %v5090_v12 = vld [vmem:[%s6454_s0] sm:$0xff]   ;;  %v5094_v20 = vld [vmem:[%s6454_s0 + $0x8] sm:$0xff]   ;;  %s229_s13 = scalar_lea.vmem %s6457_s3, %s4361_s10  ;;  %s5933_s19 = sshra.s32 %s4492_s18, 3 }
  0x29   : > { %v5676_v13 = vld [vmem:[%s5615_s29] ss:$16 sps:$4 sm:$0xff]   ;;  %v5679_v14 = vld [vmem:[%s5615_s29 + $0x24] ss:$16 sps:$4 sm:$0xff]   ;;  %v5682_v15 = vld [vmem:[%s5615_s29 + $0x8] ss:$16 sps:$4 sm:$0xff]  }
  0x2a   : > { %v5685_v16 = vld [vmem:[%s5615_s29 + $0x2c] ss:$16 sps:$4 sm:$0xff]   ;;  %v5690_v17 = vld [vmem:[%s5615_s29 + $0x20] ss:$16 sps:$4 sm:$0xff]   ;;  %v5695_v18 = vld [vmem:[%s5615_s29 + $0x44] ss:$16 sps:$4 sm:$0xff]  }
  0x2b   : > { %555 = vmatpush1.bf16.msra.mxu0 %v5026_v27  ;;  %668 = vmatpush1.bf16.msra.mxu1 %v5027_v28  ;;  %v5699_v19 = vld [vmem:[%s5615_s29 + $0x28] ss:$16 sps:$4 sm:$0xff]   ;;  %v5707_v21 = vld [vmem:[%s5615_s29 + $0x40] ss:$16 sps:$4 sm:$0xff]   ;;  %v5711_v22 = vld [vmem:[%s5615_s29 + $0x4c] ss:$16 sps:$4 sm:$0xff]  }
  0x2c   : > { %556 = vmatprep.subr.bf16.mxu0 %v5028_v29  ;;  %669 = vmatprep.subr.bf16.mxu1 %v5030_v30  ;;  %v5714_v23 = vld [vmem:[%s5615_s29 + $0x64] ss:$16 sps:$4 sm:$0xff]   ;;  %v5718_v24 = vld [vmem:[%s5615_s29 + $0x48] ss:$16 sps:$4 sm:$0xff]   ;;  %v5721_v25 = vld [vmem:[%s5615_s29 + $0x6c] ss:$16 sps:$4 sm:$0xff]  }
  0x2d   : > { %v5727_v26 = vld [vmem:[%s5615_s29 + $0x60] ss:$16 sps:$4 sm:$0xff]   ;;  %v5732_v27 = vld [vmem:[%s5615_s29 + $0x84] ss:$16 sps:$4 sm:$0xff]   ;;  %v5736_v28 = vld [vmem:[%s5615_s29 + $0x68] ss:$16 sps:$4 sm:$0xff]  }
  0x2e   : > { %v5098_v29 = vld [vmem:[%s6454_s0 + $0x10] sm:$0xff]   ;;  %s4849_s20 = sshll.u32 %s5933_s19, 5  ;;  %s4848_s22 = sshll.u32 %s5546_s17, 6 }
  0x2f   : > { %557 = vmatpush1.bf16.msra.mxu0 %v5032_v31  ;;  %670 = vmatpush1.bf16.msra.mxu1 %v5033_v32  ;;  %v5744_v30 = vld [vmem:[%s5615_s29 + $0x80] ss:$16 sps:$4 sm:$0xff]   ;;  %v5747_v31 = vld [vmem:[%s5615_s29 + $0x8c] ss:$16 sps:$4 sm:$0xff]   ;;  %v5751_v32 = vld [vmem:[%s5615_s29 + $0xa4] ss:$16 sps:$4 sm:$0xff]   ;;  %s5952_s25 = scalar_lea.vmem %s6458_s4, %s4848_s22 }
  0x30   : > { %976 = vmatprep.subr.bf16.mxu0 %v5037_v33  ;;  %1089 = vmatprep.subr.bf16.mxu1 %v5044_v34  ;;  %v5755_v33 = vld [vmem:[%s5615_s29 + $0x88] ss:$16 sps:$4 sm:$0xff]   ;;  %v5758_v34 = vld [vmem:[%s5615_s29 + $0xac] ss:$16 sps:$4 sm:$0xff]   ;;  %s1359_s21 = scalar_lea.vmem [#allocation2], %s4849_s20  ;;  %s4535_s26 = sshll.u32 %s5933_s19, 2 }
  0x31   : > { %s1711_s27 = scalar_lea.vmem %s5952_s25, %s4535_s26 }
  0x32   : > { %575 = vmatmul.mubr.bf16.vlgmr.msra.gmra.mrb[0].mxu0 %v5034_v35  ;;  %688 = vmatmul.mubr.bf16.vlgmr.msra.gmra.mrb[0].mxu1 %v5034_v35  ;;  %v5764_v35 = vld [vmem:[%s5615_s29 + $0xa0] ss:$16 sps:$4 sm:$0xff]   ;;  %s1714_s17 = scalar_select %p1352_p4, 1, 6 }
  0x33   : > { %977 = vmatpush1.bf16.msra.mxu0 %v5035_v36  ;;  %584 = vmatprep.mubr.bf16.mxu0 %v5506_v0  ;;  %v5769_v36 = vld [vmem:[%s5615_s29 + $0xc4] ss:$16 sps:$4 sm:$0xff]   ;;  %s2075_s9 = scalar_select %p1352_p4, 2, 5 }
  0x34   : > { %697 = vmatprep.mubr.bf16.mxu1 %v5506_v0  ;;  %978 = vmatprep.subr.bf16.mxu0 %v5041_v37  ;;  %v5773_v37 = vld [vmem:[%s5615_s29 + $0xa8] ss:$16 sps:$4 sm:$0xff]   ;;  %s4536_s28 = sshll.u32 %s1714_s17, 4 }
  0x35   : > { %1090 = vmatpush1.bf16.msra.mxu1 %v5042_v38  ;;  %v5105_v38 = vld [vmem:[%s6454_s0 + $0x18] sm:$0xff]   ;;  %s6090_s30 = sshra.s32 %s4536_s28, 3  ;;  %s4580_s10 = sshll.u32 %s2075_s9, 4 }
  0x36   : > { %1091 = vmatprep.subr.bf16.mxu1 %v5051_v39  ;;  %v5781_v39 = vld [vmem:[%s5615_s29 + $0xc0] ss:$16 sps:$4 sm:$0xff]   ;;  %s4852_s5 = sshll.u32 %s6090_s30, 5  ;;  %s4579_s7 = sshll.u32 %s6090_s30, 2 }
  0x37   : > { %979 = vmatpush1.bf16.msra.mxu0 %v5039_v40  ;;  %v5784_v40 = vld [vmem:[%s5615_s29 + $0xcc] ss:$16 sps:$4 sm:$0xff]   ;;  %s1720_s6 = scalar_lea.vmem [#allocation2], %s4852_s5  ;;  %s2072_s8 = scalar_lea.vmem %s5952_s25, %s4579_s7 }
  0x38   : > { %980 = vmatprep.subr.bf16.mxu0 %v5048_v41  ;;  %v5789_v41 = vld [vmem:[%s5615_s29 + $0xe4] ss:$16 sps:$4 sm:$0xff]   ;;  %s6139_s11 = sshra.s32 %s4580_s10, 3 }
  0x39   : > { %1092 = vmatpush1.bf16.msra.mxu1 %v5049_v42  ;;  %v5792_v42 = vld [vmem:[%s5615_s29 + $0xc8] ss:$16 sps:$4 sm:$0xff]   ;;  %s4855_s12 = sshll.u32 %s6139_s11, 5  ;;  %s4623_s14 = sshll.u32 %s6139_s11, 2 }
  0x3a   : > { %585 = vmatmul.mubr.bf16.gmra.mrb[4].mxu0 %v5038_v43  ;;  %698 = vmatmul.mubr.bf16.gmra.mrb[4].mxu1 %v5038_v43  ;;  %v5795_v43 = vld [vmem:[%s5615_s29 + $0xec] ss:$16 sps:$4 sm:$0xff]   ;;  %s2433_s18 = scalar_lea.vmem %s5952_s25, %s4623_s14 }
  0x3b   : > { %594 = vmatprep.mubr.bf16.mxu0 %v5506_v0  ;;  %707 = vmatprep.mubr.bf16.mxu1 %v5506_v0  ;;  %s2436_s19 = scalar_select %p1352_p4, 3, 4 }
  0x3c   : > { %981 = vmatpush1.bf16.msra.mxu0 %v5046_v44  ;;  %1093 = vmatprep.subr.bf16.mxu1 %v5058_v46  ;;  %v5137_v44 = vld [vmem:[%s5615_s29 + $0xe0] ss:$16 sps:$4 sm:$0xff]   ;;  %s3519_s14 = scalar_select %p1352_p4, 6, 1 }
  0x3d   : > { %982 = vmatprep.subr.bf16.mxu0 %v5055_v45  ;;  %1094 = vmatpush1.bf16.msra.mxu1 %v5056_v47  ;;  %v5143_v45 = vld [vmem:[%s5615_s29 + $0xe8] ss:$16 sps:$4 sm:$0xff]   ;;  %v5112_v46 = vld [vmem:[%s6454_s0 + $0x20] sm:$0xff]   ;;  %s4624_s20 = sshll.u32 %s2436_s19, 4 }
  0x3e   : > { %1095 = vmatprep.subr.bf16.mxu1 %v5065_v48  ;;  %v5119_v47 = vld [vmem:[%s6454_s0 + $0x28] sm:$0xff]   ;;  %v5126_v48 = vld [vmem:[%s6454_s0 + $0x30] sm:$0xff]  }
  0x40   : > { %983 = vmatpush1.bf16.msra.mxu0 %v5053_v49  ;;  %v5136_v49 = vld [vmem:[%s6454_s0 + $0x38] sm:$0xff]  }
  0x41   : > { %984 = vmatprep.subr.bf16.mxu0 %v5062_v50  ;;  %1096 = vmatpush1.bf16.msra.mxu1 %v5063_v51  ;;  %v1204_v50 = vlaneseq }
  0x42   : > { %595 = vmatmul.mubr.bf16.gmra.mrb[8].mxu0 %v5045_v52  ;;  %708 = vmatmul.mubr.bf16.gmra.mrb[8].mxu1 %v5045_v52 }
  0x43   : > { %604 = vmatprep.mubr.bf16.mxu0 %v5506_v0  ;;  %717 = vmatprep.mubr.bf16.mxu1 %v5506_v0  ;;  %v1205_v51 = vshrl.u32 %v1204_v50, 7 }
  0x44   : > { %985 = vmatpush1.bf16.msra.mxu0 %v5060_v53  ;;  %1097 = vmatprep.subr.bf16.mxu1 %v5072_v55 }
  0x45   : > { %986 = vmatprep.subr.bf16.mxu0 %v5069_v54  ;;  %1098 = vmatpush1.bf16.msra.mxu1 %v5070_v56  ;;  %v1206_v52 = vsub.s32 0, %v1205_v51  ;;  %v1214_v53 = vsub.s32 2, %v1205_v51  ;;  %v1202_v54 = vld [vmem:[%s229_s13] sm:$0xf]  ;;  %v1210_v55 = vsub.s32 1, %v1205_v51  ;;  %v1218_v56 = vsub.s32 3, %v1205_v51 }
  0x46   : > { %1099 = vmatprep.subr.bf16.mxu1 %v5079_v57  ;;  %s2081_s13 = scalar_lea.vmem [#allocation2], %s4855_s12 }
  0x47   : > { %v5864_v57 = vrot.slane %v1202_v54, %v1206_v52 }
  0x48   : > { %987 = vmatpush1.bf16.msra.mxu0 %v5067_v58  ;;  %v5866_v58 = vrot.slane %v1202_v54, %v1214_v53 }
  0x49   : > { %988 = vmatprep.subr.bf16.mxu0 %v5076_v59  ;;  %1100 = vmatpush1.bf16.msra.mxu1 %v5077_v60  ;;  %v5868_v59 = vrot.slane %v1202_v54, %v1210_v55  ;;  %v5870_v60 = vrot.slane %v1202_v54, %v1218_v56 }
  0x4a   : > { %605 = vmatmul.mubr.bf16.gmra.mrb[12].mxu0 %v5052_v61  ;;  %718 = vmatmul.mubr.bf16.gmra.mrb[12].mxu1 %v5052_v61 }
  0x4b   : > { %614 = vmatprep.mubr.bf16.mxu0 %v5506_v0  ;;  %727 = vmatprep.mubr.bf16.mxu1 %v5506_v0 }
  0x4c   : > { %989 = vmatpush1.bf16.msra.mxu0 %v5074_v62  ;;  %1101 = vmatprep.subr.bf16.mxu1 %v5086_v1 }
  0x4d   : > { %990 = vmatprep.subr.bf16.mxu0 %v5083_v63  ;;  %1102 = vmatpush1.bf16.msra.mxu1 %v5084_v2 }
  0x4e   : > { %1103 = vmatprep.subr.bf16.mxu1 %v5089_v3 }
  0x50   : > { %991 = vmatpush1.bf16.msra.mxu0 %v5081_v4 }
  0x51   : > { %1104 = vmatpush1.bf16.msra.mxu1 %v5087_v5  ;;  %1560 = vmatprep.subr.bf16.mxu0 %v5645_v6 }
  0x52   : > { %615 = vmatmul.mubr.bf16.gmra.mrb[16].mxu0 %v5059_v7  ;;  %728 = vmatmul.mubr.bf16.gmra.mrb[16].mxu1 %v5059_v7 }
  0x53   : > { %624 = vmatprep.mubr.bf16.mxu0 %v5506_v0  ;;  %737 = vmatprep.mubr.bf16.mxu1 %v5506_v0 }
  0x54   : > { %1603 = vmatprep.subr.bf16.mxu1 %v5651_v8 }
  0x5a   : > { %625 = vmatmul.mubr.bf16.gmra.mrb[20].mxu0 %v5066_v9  ;;  %738 = vmatmul.mubr.bf16.gmra.mrb[20].mxu1 %v5066_v9 }
  0x5b   : > { %634 = vmatprep.mubr.bf16.mxu0 %v5506_v0  ;;  %747 = vmatprep.mubr.bf16.mxu1 %v5506_v0 }
  0x62   : > { %635 = vmatmul.mubr.bf16.gmra.mrb[24].mxu0 %v5073_v10  ;;  %748 = vmatmul.mubr.bf16.gmra.mrb[24].mxu1 %v5073_v10 }
  0x63   : > { %644 = vmatprep.mubr.bf16.mxu0 %v5506_v0  ;;  %757 = vmatprep.mubr.bf16.mxu1 %v5506_v0 }
  0x6a   : > { %645 = vmatmul.mubr.bf16.gmra.mrb[28].mxu0 %v5080_v11  ;;  %758 = vmatmul.mubr.bf16.gmra.mrb[28].mxu1 %v5080_v11 }
  0x6b   : > { %1008 = vmatprep.mubr.bf16.mxu0 %v5506_v0  ;;  %1121 = vmatprep.mubr.bf16.mxu1 %v5506_v0 }
  0x72   : > { %1009 = vmatmul.mubr.bf16.vlgmr.msra.gmra.mrb[0].mxu0 %v5090_v12  ;;  %1122 = vmatmul.mubr.bf16.vlgmr.msra.gmra.mrb[0].mxu1 %v5090_v12 }
  0x73   : > { %1561 = vmatpush1.bf16.msra.mxu0 %v5676_v13  ;;  %1018 = vmatprep.mubr.bf16.mxu0 %v5506_v0 }
  0x74   : > { %1131 = vmatprep.mubr.bf16.mxu1 %v5506_v0  ;;  %1562 = vmatprep.subr.bf16.mxu0 %v5679_v14 }
  0x75   : > { %1604 = vmatpush1.bf16.msra.mxu1 %v5682_v15 }
  0x76   : > { %1605 = vmatprep.subr.bf16.mxu1 %v5685_v16 }
  0x77   : > { %1563 = vmatpush1.bf16.msra.mxu0 %v5690_v17 }
  0x78   : > { %1564 = vmatprep.subr.bf16.mxu0 %v5695_v18 }
  0x79   : > { %1606 = vmatpush1.bf16.msra.mxu1 %v5699_v19 }
  0x7a   : > { %1019 = vmatmul.mubr.bf16.gmra.mrb[4].mxu0 %v5094_v20  ;;  %1132 = vmatmul.mubr.bf16.gmra.mrb[4].mxu1 %v5094_v20 }
  0x7b   : > { %1028 = vmatprep.mubr.bf16.mxu0 %v5506_v0  ;;  %1141 = vmatprep.mubr.bf16.mxu1 %v5506_v0 }
  0x7c   : > { %1565 = vmatpush1.bf16.msra.mxu0 %v5707_v21  ;;  %1607 = vmatprep.subr.bf16.mxu1 %v5711_v22 }
  0x7d   : > { %1566 = vmatprep.subr.bf16.mxu0 %v5714_v23  ;;  %1608 = vmatpush1.bf16.msra.mxu1 %v5718_v24 }
  0x7e   : > { %1609 = vmatprep.subr.bf16.mxu1 %v5721_v25 }
  0x80   : > { %1567 = vmatpush1.bf16.msra.mxu0 %v5727_v26 }
  0x81   : > { %1568 = vmatprep.subr.bf16.mxu0 %v5732_v27  ;;  %1610 = vmatpush1.bf16.msra.mxu1 %v5736_v28 }
  0x82   : > { %1029 = vmatmul.mubr.bf16.gmra.mrb[8].mxu0 %v5098_v29  ;;  %1142 = vmatmul.mubr.bf16.gmra.mrb[8].mxu1 %v5098_v29 }
  0x83   : > { %1038 = vmatprep.mubr.bf16.mxu0 %v5506_v0  ;;  %1151 = vmatprep.mubr.bf16.mxu1 %v5506_v0 }
  0x84   : > { %1569 = vmatpush1.bf16.msra.mxu0 %v5744_v30  ;;  %1611 = vmatprep.subr.bf16.mxu1 %v5747_v31 }
  0x85   : > { %1570 = vmatprep.subr.bf16.mxu0 %v5751_v32  ;;  %1612 = vmatpush1.bf16.msra.mxu1 %v5755_v33 }
  0x86   : > { %1613 = vmatprep.subr.bf16.mxu1 %v5758_v34 }
  0x88   : > { %1571 = vmatpush1.bf16.msra.mxu0 %v5764_v35 }
  0x89   : > { %1572 = vmatprep.subr.bf16.mxu0 %v5769_v36  ;;  %1614 = vmatpush1.bf16.msra.mxu1 %v5773_v37 }
  0x8a   : > { %1039 = vmatmul.mubr.bf16.gmra.mrb[12].mxu0 %v5105_v38  ;;  %1152 = vmatmul.mubr.bf16.gmra.mrb[12].mxu1 %v5105_v38 }
  0x8b   : > { %1048 = vmatprep.mubr.bf16.mxu0 %v5506_v0  ;;  %1161 = vmatprep.mubr.bf16.mxu1 %v5506_v0 }
  0x8c   : > { %1573 = vmatpush1.bf16.msra.mxu0 %v5781_v39  ;;  %1615 = vmatprep.subr.bf16.mxu1 %v5784_v40 }
  0x8d   : > { %1574 = vmatprep.subr.bf16.mxu0 %v5789_v41  ;;  %1616 = vmatpush1.bf16.msra.mxu1 %v5792_v42 }
  0x8e   : > { %1617 = vmatprep.subr.bf16.mxu1 %v5795_v43 }
  0x90   : > { %1575 = vmatpush1.bf16.msra.mxu0 %v5137_v44 }
  0x91   : > { %1618 = vmatpush1.bf16.msra.mxu1 %v5143_v45  ;;  %1921 = vmatprep.subr.bf16.mxu0 %v5645_v6 }
  0x92   : > { %1049 = vmatmul.mubr.bf16.gmra.mrb[16].mxu0 %v5112_v46  ;;  %1162 = vmatmul.mubr.bf16.gmra.mrb[16].mxu1 %v5112_v46 }
  0x93   : > { %1058 = vmatprep.mubr.bf16.mxu0 %v5506_v0  ;;  %1171 = vmatprep.mubr.bf16.mxu1 %v5506_v0 }
  0x94   : > { %1964 = vmatprep.subr.bf16.mxu1 %v5651_v8 }
  0x9a   : > { %1059 = vmatmul.mubr.bf16.gmra.mrb[20].mxu0 %v5119_v47  ;;  %1172 = vmatmul.mubr.bf16.gmra.mrb[20].mxu1 %v5119_v47 }
  0x9b   : > { %1068 = vmatprep.mubr.bf16.mxu0 %v5506_v0  ;;  %1181 = vmatprep.mubr.bf16.mxu1 %v5506_v0 }
  0xa2   : > { %1069 = vmatmul.mubr.bf16.gmra.mrb[24].mxu0 %v5126_v48  ;;  %1182 = vmatmul.mubr.bf16.gmra.mrb[24].mxu1 %v5126_v48 }
  0xa3   : > { %1078 = vmatprep.mubr.bf16.mxu0 %v5506_v0  ;;  %1191 = vmatprep.mubr.bf16.mxu1 %v5506_v0 }
  0xaa   : > { %1079 = vmatmul.mubr.bf16.gmra.mrb[28].mxu0 %v5136_v49  ;;  %1192 = vmatmul.mubr.bf16.gmra.mrb[28].mxu1 %v5136_v49 }
  0xab   : > { %1592 = vmatprep.mubr.bf16.mxu0 %v5506_v0  ;;  %1635 = vmatprep.mubr.bf16.mxu1 %v5506_v0 }
  0xb2   : > { %1593 = vmatmul.mubr.bf16.vlgmr.msra.gmra.mrb[32].mxu0 %v5506_v0  ;;  %1636 = vmatmul.mubr.bf16.vlgmr.msra.gmra.mrb[32].mxu1 %v5506_v0 }
  0xb3   : > { %1922 = vmatpush1.bf16.msra.mxu0 %v5676_v13  ;;  %1965 = vmatpush1.bf16.msra.mxu1 %v5682_v15 }
  0xb4   : > { %1923 = vmatprep.subr.bf16.mxu0 %v5679_v14  ;;  %1966 = vmatprep.subr.bf16.mxu1 %v5685_v16 }
  0xb5   : > { %1953 = vmatprep.mubr.bf16.mxu0 %v5506_v0  ;;  %1996 = vmatprep.mubr.bf16.mxu1 %v5506_v0 }
  0xb7   : > { %1924 = vmatpush1.bf16.msra.mxu0 %v5690_v17  ;;  %1967 = vmatpush1.bf16.msra.mxu1 %v5699_v19 }
  0xb8   : > { %1925 = vmatprep.subr.bf16.mxu0 %v5695_v18  ;;  %1968 = vmatprep.subr.bf16.mxu1 %v5711_v22 }
  0xbb   : > { %1926 = vmatpush1.bf16.msra.mxu0 %v5707_v21  ;;  %1969 = vmatpush1.bf16.msra.mxu1 %v5718_v24 }
  0xbc   : > { %1927 = vmatprep.subr.bf16.mxu0 %v5714_v23  ;;  %1970 = vmatprep.subr.bf16.mxu1 %v5721_v25 }
  0xbf   : > { %1928 = vmatpush1.bf16.msra.mxu0 %v5727_v26  ;;  %1971 = vmatpush1.bf16.msra.mxu1 %v5736_v28 }
  0xc0   : > { %1929 = vmatprep.subr.bf16.mxu0 %v5732_v27  ;;  %1972 = vmatprep.subr.bf16.mxu1 %v5747_v31 }
  0xc3   : > { %1930 = vmatpush1.bf16.msra.mxu0 %v5744_v30  ;;  %1973 = vmatpush1.bf16.msra.mxu1 %v5755_v33 }
  0xc4   : > { %1931 = vmatprep.subr.bf16.mxu0 %v5751_v32  ;;  %1974 = vmatprep.subr.bf16.mxu1 %v5758_v34 }
  0xc7   : > { %1932 = vmatpush1.bf16.msra.mxu0 %v5764_v35  ;;  %1975 = vmatpush1.bf16.msra.mxu1 %v5773_v37 }
  0xc8   : > { %1933 = vmatprep.subr.bf16.mxu0 %v5769_v36  ;;  %1976 = vmatprep.subr.bf16.mxu1 %v5784_v40 }
  0xcb   : > { %1934 = vmatpush1.bf16.msra.mxu0 %v5781_v39  ;;  %1977 = vmatpush1.bf16.msra.mxu1 %v5792_v42 }
  0xcc   : > { %1935 = vmatprep.subr.bf16.mxu0 %v5789_v41  ;;  %1978 = vmatprep.subr.bf16.mxu1 %v5795_v43 }
  0xcf   : > { %1936 = vmatpush1.bf16.msra.mxu0 %v5137_v44  ;;  %1979 = vmatpush1.bf16.msra.mxu1 %v5143_v45 }
 0x145   : > { %v1010_v61 = vpop.f32.mrb[0].mxu0  ;;  %v1123_v62 = vpop.f32.mrb[0].mxu1 }
 0x146   : > { %v1224_v63 = vadd.f32 %v5864_v57, %v1010_v61  ;;  %v1226_v1 = vadd.f32 %v5866_v58, %v1123_v62  ;;  %v1012_v2 = vpop.f32.mrb[1].mxu0  ;;  %v1125_v3 = vpop.f32.mrb[1].mxu1 }
 0x147   : > { %v1225_v4 = vadd.f32 %v5868_v59, %v1012_v2  ;;  %v1227_v5 = vadd.f32 %v5870_v60, %v1125_v3  ;;  %v1014_v6 = vpop.f32.mrb[2].mxu0  ;;  %v1127_v7 = vpop.f32.mrb[2].mxu1 }
 0x148   : > { %1288 = vst [vmem:[#allocation2] sm:$0xff] %v1224_v63  ;;  %1290 = vst [vmem:[#allocation2 + $0x10] sm:$0xff] %v1226_v1  ;;  %v1228_v8 = vadd.f32 %v5864_v57, %v1014_v6  ;;  %v1230_v9 = vadd.f32 %v5866_v58, %v1127_v7  ;;  %v1016_v10 = vpop.f32.mrb[3].mxu0  ;;  %v1129_v11 = vpop.f32.mrb[3].mxu1 }
 0x149   : > { %1289 = vst [vmem:[#allocation2 + $0x8] sm:$0xff] %v1225_v4  ;;  %1291 = vst [vmem:[#allocation2 + $0x18] sm:$0xff] %v1227_v5  ;;  %v1229_v12 = vadd.f32 %v5868_v59, %v1016_v10  ;;  %v1231_v13 = vadd.f32 %v5870_v60, %v1129_v11 }
 0x14a   : > { %1292 = vst [vmem:[#allocation2 + $0x20] sm:$0xff] %v1228_v8  ;;  %1294 = vst [vmem:[#allocation2 + $0x30] sm:$0xff] %v1230_v9 }
 0x14b   : > { %1293 = vst [vmem:[#allocation2 + $0x28] sm:$0xff] %v1229_v12  ;;  %1295 = vst [vmem:[#allocation2 + $0x38] sm:$0xff] %v1231_v13 }
 0x14d   : > { %v1020_v14 = vpop.f32.mrb[4].mxu0  ;;  %v1133_v15 = vpop.f32.mrb[4].mxu1 }
 0x14e   : > { %v1232_v16 = vadd.f32 %v5864_v57, %v1020_v14  ;;  %v1234_v17 = vadd.f32 %v5866_v58, %v1133_v15  ;;  %v1022_v18 = vpop.f32.mrb[5].mxu0  ;;  %v1135_v19 = vpop.f32.mrb[5].mxu1 }
 0x14f   : > { %v1233_v20 = vadd.f32 %v5868_v59, %v1022_v18  ;;  %v1235_v21 = vadd.f32 %v5870_v60, %v1135_v19  ;;  %v1024_v22 = vpop.f32.mrb[6].mxu0  ;;  %v1137_v23 = vpop.f32.mrb[6].mxu1 }
 0x150   : > { %1296 = vst [vmem:[#allocation2 + $0x40] sm:$0xff] %v1232_v16  ;;  %1298 = vst [vmem:[#allocation2 + $0x50] sm:$0xff] %v1234_v17  ;;  %v1236_v24 = vadd.f32 %v5864_v57, %v1024_v22  ;;  %v1238_v25 = vadd.f32 %v5866_v58, %v1137_v23  ;;  %v1026_v26 = vpop.f32.mrb[7].mxu0  ;;  %v1139_v27 = vpop.f32.mrb[7].mxu1 }
 0x151   : > { %1297 = vst [vmem:[#allocation2 + $0x48] sm:$0xff] %v1233_v20  ;;  %1299 = vst [vmem:[#allocation2 + $0x58] sm:$0xff] %v1235_v21  ;;  %v1237_v28 = vadd.f32 %v5868_v59, %v1026_v26  ;;  %v1239_v29 = vadd.f32 %v5870_v60, %v1139_v27 }
 0x152   : > { %1300 = vst [vmem:[#allocation2 + $0x60] sm:$0xff] %v1236_v24  ;;  %1302 = vst [vmem:[#allocation2 + $0x70] sm:$0xff] %v1238_v25 }
 0x153   : > { %1301 = vst [vmem:[#allocation2 + $0x68] sm:$0xff] %v1237_v28  ;;  %1303 = vst [vmem:[#allocation2 + $0x78] sm:$0xff] %v1239_v29 }
 0x155   : > { %v1030_v30 = vpop.f32.mrb[8].mxu0  ;;  %v1143_v31 = vpop.f32.mrb[8].mxu1 }
 0x156   : > { %v1240_v32 = vadd.f32 %v5864_v57, %v1030_v30  ;;  %v1242_v33 = vadd.f32 %v5866_v58, %v1143_v31  ;;  %v1032_v34 = vpop.f32.mrb[9].mxu0  ;;  %v1145_v35 = vpop.f32.mrb[9].mxu1 }
 0x157   : > { %v1241_v36 = vadd.f32 %v5868_v59, %v1032_v34  ;;  %v1243_v37 = vadd.f32 %v5870_v60, %v1145_v35  ;;  %v1034_v38 = vpop.f32.mrb[10].mxu0  ;;  %v1147_v39 = vpop.f32.mrb[10].mxu1 }
 0x158   : > { %1304 = vst [vmem:[#allocation2 + $0x80] sm:$0xff] %v1240_v32  ;;  %1306 = vst [vmem:[#allocation2 + $0x90] sm:$0xff] %v1242_v33  ;;  %v1244_v40 = vadd.f32 %v5864_v57, %v1034_v38  ;;  %v1246_v41 = vadd.f32 %v5866_v58, %v1147_v39  ;;  %v1036_v42 = vpop.f32.mrb[11].mxu0  ;;  %v1149_v43 = vpop.f32.mrb[11].mxu1 }
 0x159   : > { %1305 = vst [vmem:[#allocation2 + $0x88] sm:$0xff] %v1241_v36  ;;  %1307 = vst [vmem:[#allocation2 + $0x98] sm:$0xff] %v1243_v37  ;;  %v1245_v44 = vadd.f32 %v5868_v59, %v1036_v42  ;;  %v1247_v45 = vadd.f32 %v5870_v60, %v1149_v43 }
 0x15a   : > { %1308 = vst [vmem:[#allocation2 + $0xa0] sm:$0xff] %v1244_v40  ;;  %1310 = vst [vmem:[#allocation2 + $0xb0] sm:$0xff] %v1246_v41 }
 0x15b   : > { %1309 = vst [vmem:[#allocation2 + $0xa8] sm:$0xff] %v1245_v44  ;;  %1311 = vst [vmem:[#allocation2 + $0xb8] sm:$0xff] %v1247_v45 }
 0x15d   : > { %v1040_v46 = vpop.f32.mrb[12].mxu0  ;;  %v1153_v47 = vpop.f32.mrb[12].mxu1 }
 0x15e   : > { %v1248_v48 = vadd.f32 %v5864_v57, %v1040_v46  ;;  %v1250_v49 = vadd.f32 %v5866_v58, %v1153_v47  ;;  %v1042_v50 = vpop.f32.mrb[13].mxu0  ;;  %v1155_v51 = vpop.f32.mrb[13].mxu1 }
 0x15f   : > { %v1249_v52 = vadd.f32 %v5868_v59, %v1042_v50  ;;  %v1251_v53 = vadd.f32 %v5870_v60, %v1155_v51  ;;  %v1044_v54 = vpop.f32.mrb[14].mxu0  ;;  %v1157_v55 = vpop.f32.mrb[14].mxu1 }
 0x160   : > { %1312 = vst [vmem:[#allocation2 + $0xc0] sm:$0xff] %v1248_v48  ;;  %1314 = vst [vmem:[#allocation2 + $0xd0] sm:$0xff] %v1250_v49  ;;  %v1252_v56 = vadd.f32 %v5864_v57, %v1044_v54  ;;  %v1254_v61 = vadd.f32 %v5866_v58, %v1157_v55  ;;  %v1046_v62 = vpop.f32.mrb[15].mxu0  ;;  %v1159_v63 = vpop.f32.mrb[15].mxu1 }
 0x161   : > { %1313 = vst [vmem:[#allocation2 + $0xc8] sm:$0xff] %v1249_v52  ;;  %1315 = vst [vmem:[#allocation2 + $0xd8] sm:$0xff] %v1251_v53  ;;  %v1253_v1 = vadd.f32 %v5868_v59, %v1046_v62  ;;  %v1255_v2 = vadd.f32 %v5870_v60, %v1159_v63 }
 0x162   : > { %1316 = vst [vmem:[#allocation2 + $0xe0] sm:$0xff] %v1252_v56  ;;  %1318 = vst [vmem:[#allocation2 + $0xf0] sm:$0xff] %v1254_v61 }
 0x163   : > { %1317 = vst [vmem:[#allocation2 + $0xe8] sm:$0xff] %v1253_v1  ;;  %1319 = vst [vmem:[#allocation2 + $0xf8] sm:$0xff] %v1255_v2 }
 0x165   : > { %v1050_v3 = vpop.f32.mrb[16].mxu0  ;;  %v1163_v4 = vpop.f32.mrb[16].mxu1 }
 0x166   : > { %v1256_v5 = vadd.f32 %v5864_v57, %v1050_v3  ;;  %v1258_v6 = vadd.f32 %v5866_v58, %v1163_v4  ;;  %v1052_v7 = vpop.f32.mrb[17].mxu0  ;;  %v1165_v8 = vpop.f32.mrb[17].mxu1 }
 0x167   : > { %v1257_v9 = vadd.f32 %v5868_v59, %v1052_v7  ;;  %v1259_v10 = vadd.f32 %v5870_v60, %v1165_v8  ;;  %v1054_v11 = vpop.f32.mrb[18].mxu0  ;;  %v1167_v12 = vpop.f32.mrb[18].mxu1 }
 0x168   : > { %1320 = vst [vmem:[#allocation2 + $0x100] sm:$0xff] %v1256_v5  ;;  %1322 = vst [vmem:[#allocation2 + $0x110] sm:$0xff] %v1258_v6  ;;  %v1260_v13 = vadd.f32 %v5864_v57, %v1054_v11  ;;  %v1262_v14 = vadd.f32 %v5866_v58, %v1167_v12  ;;  %v1056_v15 = vpop.f32.mrb[19].mxu0  ;;  %v1169_v16 = vpop.f32.mrb[19].mxu1 }
 0x169   : > { %1321 = vst [vmem:[#allocation2 + $0x108] sm:$0xff] %v1257_v9  ;;  %1323 = vst [vmem:[#allocation2 + $0x118] sm:$0xff] %v1259_v10  ;;  %v1261_v17 = vadd.f32 %v5868_v59, %v1056_v15  ;;  %v1263_v18 = vadd.f32 %v5870_v60, %v1169_v16 }
 0x16a   : > { %1324 = vst [vmem:[#allocation2 + $0x120] sm:$0xff] %v1260_v13  ;;  %1326 = vst [vmem:[#allocation2 + $0x130] sm:$0xff] %v1262_v14 }
 0x16b   : > { %1325 = vst [vmem:[#allocation2 + $0x128] sm:$0xff] %v1261_v17  ;;  %1327 = vst [vmem:[#allocation2 + $0x138] sm:$0xff] %v1263_v18 }
 0x16d   : > { %v1060_v19 = vpop.f32.mrb[20].mxu0  ;;  %v1173_v20 = vpop.f32.mrb[20].mxu1 }
 0x16e   : > { %v1264_v21 = vadd.f32 %v5864_v57, %v1060_v19  ;;  %v1266_v22 = vadd.f32 %v5866_v58, %v1173_v20  ;;  %v1062_v23 = vpop.f32.mrb[21].mxu0  ;;  %v1175_v24 = vpop.f32.mrb[21].mxu1 }
 0x16f   : > { %v1265_v25 = vadd.f32 %v5868_v59, %v1062_v23  ;;  %v1267_v26 = vadd.f32 %v5870_v60, %v1175_v24  ;;  %v1064_v27 = vpop.f32.mrb[22].mxu0  ;;  %v1177_v28 = vpop.f32.mrb[22].mxu1 }
 0x170   : > { %1328 = vst [vmem:[#allocation2 + $0x140] sm:$0xff] %v1264_v21  ;;  %1330 = vst [vmem:[#allocation2 + $0x150] sm:$0xff] %v1266_v22  ;;  %v1268_v29 = vadd.f32 %v5864_v57, %v1064_v27  ;;  %v1270_v30 = vadd.f32 %v5866_v58, %v1177_v28  ;;  %v1066_v31 = vpop.f32.mrb[23].mxu0  ;;  %v1179_v32 = vpop.f32.mrb[23].mxu1 }
 0x171   : > { %1329 = vst [vmem:[#allocation2 + $0x148] sm:$0xff] %v1265_v25  ;;  %1331 = vst [vmem:[#allocation2 + $0x158] sm:$0xff] %v1267_v26  ;;  %v1269_v33 = vadd.f32 %v5868_v59, %v1066_v31  ;;  %v1271_v34 = vadd.f32 %v5870_v60, %v1179_v32 }
 0x172   : > { %1332 = vst [vmem:[#allocation2 + $0x160] sm:$0xff] %v1268_v29  ;;  %1334 = vst [vmem:[#allocation2 + $0x170] sm:$0xff] %v1270_v30 }
 0x173   : > { %1333 = vst [vmem:[#allocation2 + $0x168] sm:$0xff] %v1269_v33  ;;  %1335 = vst [vmem:[#allocation2 + $0x178] sm:$0xff] %v1271_v34 }
 0x175   : > { %v1070_v35 = vpop.f32.mrb[24].mxu0  ;;  %v1183_v36 = vpop.f32.mrb[24].mxu1 }
 0x176   : > { %v1272_v37 = vadd.f32 %v5864_v57, %v1070_v35  ;;  %v1274_v38 = vadd.f32 %v5866_v58, %v1183_v36  ;;  %v1072_v39 = vpop.f32.mrb[25].mxu0  ;;  %v1185_v40 = vpop.f32.mrb[25].mxu1 }
 0x177   : > { %v1273_v41 = vadd.f32 %v5868_v59, %v1072_v39  ;;  %v1275_v42 = vadd.f32 %v5870_v60, %v1185_v40  ;;  %v1074_v43 = vpop.f32.mrb[26].mxu0  ;;  %v1187_v44 = vpop.f32.mrb[26].mxu1 }
 0x178   : > { %1336 = vst [vmem:[#allocation2 + $0x180] sm:$0xff] %v1272_v37  ;;  %1338 = vst [vmem:[#allocation2 + $0x190] sm:$0xff] %v1274_v38  ;;  %v1276_v45 = vadd.f32 %v5864_v57, %v1074_v43  ;;  %v1278_v46 = vadd.f32 %v5866_v58, %v1187_v44  ;;  %v1076_v47 = vpop.f32.mrb[27].mxu0  ;;  %v1189_v48 = vpop.f32.mrb[27].mxu1 }
 0x179   : > { %1337 = vst [vmem:[#allocation2 + $0x188] sm:$0xff] %v1273_v41  ;;  %1339 = vst [vmem:[#allocation2 + $0x198] sm:$0xff] %v1275_v42  ;;  %v1277_v49 = vadd.f32 %v5868_v59, %v1076_v47  ;;  %v1279_v50 = vadd.f32 %v5870_v60, %v1189_v48 }
 0x17a   : > { %1340 = vst [vmem:[#allocation2 + $0x1a0] sm:$0xff] %v1276_v45  ;;  %1342 = vst [vmem:[#allocation2 + $0x1b0] sm:$0xff] %v1278_v46 }
 0x17b   : > { %1341 = vst [vmem:[#allocation2 + $0x1a8] sm:$0xff] %v1277_v49  ;;  %1343 = vst [vmem:[#allocation2 + $0x1b8] sm:$0xff] %v1279_v50 }
 0x17d   : > { %v1080_v51 = vpop.f32.mrb[28].mxu0  ;;  %v1193_v52 = vpop.f32.mrb[28].mxu1 }
 0x17e   : > { %v1280_v53 = vadd.f32 %v5864_v57, %v1080_v51  ;;  %v1282_v54 = vadd.f32 %v5866_v58, %v1193_v52  ;;  %v1082_v55 = vpop.f32.mrb[29].mxu0  ;;  %v1195_v56 = vpop.f32.mrb[29].mxu1 }
 0x17f   : > { %v1281_v61 = vadd.f32 %v5868_v59, %v1082_v55  ;;  %v1283_v62 = vadd.f32 %v5870_v60, %v1195_v56  ;;  %v1084_v63 = vpop.f32.mrb[30].mxu0  ;;  %v1197_v1 = vpop.f32.mrb[30].mxu1 }
 0x180   : > { %1344 = vst [vmem:[#allocation2 + $0x1c0] sm:$0xff] %v1280_v53  ;;  %1346 = vst [vmem:[#allocation2 + $0x1d0] sm:$0xff] %v1282_v54  ;;  %v1284_v2 = vadd.f32 %v5864_v57, %v1084_v63  ;;  %v1286_v3 = vadd.f32 %v5866_v58, %v1197_v1  ;;  %v1086_v4 = vpop.f32.mrb[31].mxu0  ;;  %v1199_v5 = vpop.f32.mrb[31].mxu1 }
 0x181   : > { %1345 = vst [vmem:[#allocation2 + $0x1c8] sm:$0xff] %v1281_v61  ;;  %1347 = vst [vmem:[#allocation2 + $0x1d8] sm:$0xff] %v1283_v62  ;;  %v1285_v6 = vadd.f32 %v5868_v59, %v1086_v4  ;;  %v1287_v7 = vadd.f32 %v5870_v60, %v1199_v5 }
 0x182   : > { %1348 = vst [vmem:[#allocation2 + $0x1e0] sm:$0xff] %v1284_v2  ;;  %1350 = vst [vmem:[#allocation2 + $0x1f0] sm:$0xff] %v1286_v3 }
 0x183   : > { %1349 = vst [vmem:[#allocation2 + $0x1e8] sm:$0xff] %v1285_v6  ;;  %1351 = vst [vmem:[#allocation2 + $0x1f8] sm:$0xff] %v1287_v7  ;;  %v5959_v6 = vld [vmem:[%s5615_s29 + $0x4] ss:$16 sps:$4 sm:$0xff]   ;;  %v5962_v7 = vld [vmem:[%s5615_s29 + $0xc] ss:$16 sps:$4 sm:$0xff]  }
 0x184   : > { %2282 = vmatprep.subr.bf16.mxu0 %v5959_v6  ;;  %2325 = vmatprep.subr.bf16.mxu1 %v5962_v7 }
 0x185   : > { %v1594_v8 = vpop.f32.mrb[32].mxu0  ;;  %v1637_v9 = vpop.f32.mrb[32].mxu1 }
 0x186   : > { %v1596_v10 = vpop.f32.mrb[33].mxu0  ;;  %v1639_v11 = vpop.f32.mrb[33].mxu1 }
 0x187   : > { %v1598_v58 = vpop.f32.mrb[34].mxu0  ;;  %v1641_v12 = vpop.f32.mrb[34].mxu1 }
 0x188   : > { %v1600_v15 = vpop.f32.mrb[35].mxu0  ;;  %v1643_v16 = vpop.f32.mrb[35].mxu1 }
 0x18a   : > { %v1360_v57 = vld [vmem:[%s1359_s21] sm:$0xff]  ;;  %v1361_v14 = vld [vmem:[%s1359_s21 + $0x8] sm:$0xff]  ;;  %v1363_v22 = vld [vmem:[%s1359_s21 + $0x18] sm:$0xff] }
 0x18b   : > { %v1646_v13 = vadd.f32 %v1594_v8, %v1360_v57  ;;  %v1647_v59 = vadd.f32 %v1596_v10, %v1361_v14  ;;  %v1364_v17 = vld [vmem:[%s1359_s21 + $0x20] sm:$0xff]  ;;  %v1365_v19 = vld [vmem:[%s1359_s21 + $0x28] sm:$0xff]  ;;  %v1367_v25 = vld [vmem:[%s1359_s21 + $0x38] sm:$0xff]  ;;  %v1649_v27 = vadd.f32 %v1639_v11, %v1363_v22 }
 0x18c   : > { %v1650_v18 = vadd.f32 %v1598_v58, %v1364_v17  ;;  %v1651_v21 = vadd.f32 %v1600_v15, %v1365_v19  ;;  %v1362_v26 = vld [vmem:[%s1359_s21 + $0x10] sm:$0xff]  ;;  %v1653_v29 = vadd.f32 %v1643_v16, %v1367_v25  ;;  %v5978_v11 = vld [vmem:[%s5615_s29 + $0x2c] ss:$16 sps:$4 sm:$0xff]   ;;  %v5984_v58 = vld [vmem:[%s5615_s29 + $0x28] ss:$16 sps:$4 sm:$0xff]  }
 0x18d   : > { %v4527_v60 = vmul.f32 -1.442695, %v1646_v13  ;;  %v4529_v20 = vmul.f32 -1.442695, %v1647_v59  ;;  %v1366_v28 = vld [vmem:[%s1359_s21 + $0x30] sm:$0xff]  ;;  %v1648_v30 = vadd.f32 %v1637_v9, %v1362_v26  ;;  %s6188_s21 = sshra.s32 %s4624_s20, 3 }
 0x18e   : > { %v4528_v23 = vmul.f32 -1.442695, %v1650_v18  ;;  %v4530_v24 = vmul.f32 -1.442695, %v1651_v21  ;;  %v4531_v31 = vmul.f32 -1.442695, %v1649_v27  ;;  %v1652_v32 = vadd.f32 %v1641_v12, %v1366_v28 }
 0x18f   : > { %5242 = vpow2.f32 %v4527_v60  ;;  %v4532_v33 = vmul.f32 -1.442695, %v1653_v29  ;;  %v5965_v8 = vld [vmem:[%s5615_s29] ss:$16 sps:$4 sm:$0xff]   ;;  %v5968_v9 = vld [vmem:[%s5615_s29 + $0x8] ss:$16 sps:$4 sm:$0xff]  }
 0x190   : > { %5244 = vpow2.f32 %v4529_v20  ;;  %v5975_v10 = vld [vmem:[%s5615_s29 + $0x24] ss:$16 sps:$4 sm:$0xff]   ;;  %v5981_v57 = vld [vmem:[%s5615_s29 + $0x20] ss:$16 sps:$4 sm:$0xff]   ;;  %v5994_v13 = vld [vmem:[%s5615_s29 + $0x4c] ss:$16 sps:$4 sm:$0xff]  }
 0x191   : > { %5246 = vpow2.f32 %v4528_v23  ;;  %v5991_v12 = vld [vmem:[%s5615_s29 + $0x44] ss:$16 sps:$4 sm:$0xff]   ;;  %v5997_v14 = vld [vmem:[%s5615_s29 + $0x40] ss:$16 sps:$4 sm:$0xff]   ;;  %v6000_v15 = vld [vmem:[%s5615_s29 + $0x48] ss:$16 sps:$4 sm:$0xff]  }
 0x192   : > { %5248 = vpow2.f32 %v4530_v24  ;;  %v6007_v16 = vld [vmem:[%s5615_s29 + $0x64] ss:$16 sps:$4 sm:$0xff]   ;;  %v6010_v59 = vld [vmem:[%s5615_s29 + $0x6c] ss:$16 sps:$4 sm:$0xff]   ;;  %v6013_v17 = vld [vmem:[%s5615_s29 + $0x60] ss:$16 sps:$4 sm:$0xff]  }
 0x193   : > { %5250 = vtanh.f32 %v1648_v30  ;;  %v6016_v60 = vld [vmem:[%s5615_s29 + $0x68] ss:$16 sps:$4 sm:$0xff]   ;;  %v6023_v18 = vld [vmem:[%s5615_s29 + $0x80] ss:$16 sps:$4 sm:$0xff]   ;;  %v6026_v19 = vld [vmem:[%s5615_s29 + $0x84] ss:$16 sps:$4 sm:$0xff]  }
 0x194   : > { %5252 = vpow2.f32 %v4531_v31  ;;  %v6029_v20 = vld [vmem:[%s5615_s29 + $0x88] ss:$16 sps:$4 sm:$0xff]   ;;  %v6032_v21 = vld [vmem:[%s5615_s29 + $0x8c] ss:$16 sps:$4 sm:$0xff]   ;;  %v6035_v22 = vld [vmem:[%s5615_s29 + $0xa4] ss:$16 sps:$4 sm:$0xff]  }
 0x195   : > { %5254 = vtanh.f32 %v1652_v32  ;;  %v6039_v23 = vld [vmem:[%s5615_s29 + $0xac] ss:$16 sps:$4 sm:$0xff]   ;;  %v6044_v24 = vld [vmem:[%s5615_s29 + $0xa0] ss:$16 sps:$4 sm:$0xff]   ;;  %v6049_v25 = vld [vmem:[%s5615_s29 + $0xa8] ss:$16 sps:$4 sm:$0xff]  }
 0x196   : > { %5256 = vpow2.f32 %v4532_v33  ;;  %v6052_v26 = vld [vmem:[%s5615_s29 + $0xc4] ss:$16 sps:$4 sm:$0xff]   ;;  %v6056_v27 = vld [vmem:[%s5615_s29 + $0xcc] ss:$16 sps:$4 sm:$0xff]   ;;  %v6060_v28 = vld [vmem:[%s5615_s29 + $0xc0] ss:$16 sps:$4 sm:$0xff]  }
 0x197   : > { %v6065_v29 = vld [vmem:[%s5615_s29 + $0xc8] ss:$16 sps:$4 sm:$0xff]   ;;  %v6068_v30 = vld [vmem:[%s5615_s29 + $0xe4] ss:$16 sps:$4 sm:$0xff]   ;;  %v6072_v31 = vld [vmem:[%s5615_s29 + $0xec] ss:$16 sps:$4 sm:$0xff]  }
 0x198   : > { %v6076_v32 = vld [vmem:[%s5615_s29 + $0xe0] ss:$16 sps:$4 sm:$0xff]   ;;  %v6081_v33 = vld [vmem:[%s5615_s29 + $0xe8] ss:$16 sps:$4 sm:$0xff]   ;;  %s4858_s22 = sshll.u32 %s6188_s21, 5  ;;  %s4667_s24 = sshll.u32 %s6188_s21, 2 }
 0x199   : > { %v5243_v34 = vpop.eup %5242  ;;  %s2442_s23 = scalar_lea.vmem [#allocation2], %s4858_s22  ;;  %s2794_s26 = scalar_lea.vmem %s5952_s25, %s4667_s24 }
 0x19a   : > { %v5245_v35 = vpop.eup %5244  ;;  %v1660_v36 = vadd.f32 1.0, %v5243_v34  ;;  %v1721_v34 = vld [vmem:[%s1720_s6] sm:$0xff]  ;;  %s3880_s24 = scalar_select %p1352_p4, 7, 0 }
 0x19b   : > { %v5247_v37 = vpop.eup %5246  ;;  %v1672_v38 = vadd.f32 1.0, %v5245_v35 }
 0x19c   : > { %v5249_v39 = vpop.eup %5248  ;;  %5258 = vrcp.f32 %v1660_v36  ;;  %v1661_v40 = vadd.f32 1.0, %v5247_v37  ;;  %v1723_v36 = vld [vmem:[%s1720_s6 + $0x10] sm:$0xff] }
 0x19d   : > { %5260 = vrcp.f32 %v1672_v38  ;;  %v1673_v41 = vadd.f32 1.0, %v5249_v39  ;;  %v5251_v42 = vpop.eup %5250 }
 0x19e   : > { %5262 = vrcp.f32 %v1661_v40  ;;  %v5253_v43 = vpop.eup %5252  ;;  %v1722_v40 = vld [vmem:[%s1720_s6 + $0x8] sm:$0xff] }
 0x19f   : > { %5264 = vrcp.f32 %v1673_v41  ;;  %v5255_v44 = vpop.eup %5254  ;;  %v1686_v49 = vadd.f32 1.0, %v5253_v43 }
 0x1a0   : > { %v5257_v45 = vpop.eup %5256 }
 0x1a1   : > { %v1687_v54 = vadd.f32 1.0, %v5257_v45  ;;  %5266 = vrcp.f32 %v1686_v49 }
 0x1a6   : > { %v5259_v46 = vpop.eup %5258 }
 0x1a7   : > { %v5261_v47 = vpop.eup %5260  ;;  %v1694_v48 = vmul.f32 %v5259_v46, %v5251_v42  ;;  %v1724_v42 = vld [vmem:[%s1720_s6 + $0x18] sm:$0xff]  ;;  %v1725_v46 = vld [vmem:[%s1720_s6 + $0x20] sm:$0xff] }
 0x1a8   : > { %v5263_v50 = vpop.eup %5262  ;;  %v1692_v51 = vmul.f32 0.0, %v5261_v47 }
 0x1a9   : > { %v5265_v52 = vpop.eup %5264  ;;  %v1695_v53 = vmul.f32 %v5263_v50, %v5255_v44 }
 0x1aa   : > { %v5942_v55 = vadd.f32 %v1694_v48, %v1692_v51  ;;  %v1693_v56 = vmul.f32 0.0, %v5265_v52  ;;  %v1727_v48 = vld [vmem:[%s1720_s6 + $0x30] sm:$0xff] }
 0x1ab   : > { %v5267_v62 = vpop.eup %5266 }
 0x1ac   : > { %5268 = vtanh.f32 %v5942_v55  ;;  %v5945_v61 = vadd.f32 %v1695_v53, %v1693_v56  ;;  %v1726_v53 = vld [vmem:[%s1720_s6 + $0x28] sm:$0xff]  ;;  %v1728_v56 = vld [vmem:[%s1720_s6 + $0x38] sm:$0xff] }
 0x1ad   : > { %5270 = vrcp.f32 %v1687_v54 }
 0x1ae   : > { %5272 = vtanh.f32 %v5945_v61 }
 0x1b6   : > { %v5269_v63 = vpop.eup %5268 }
 0x1b7   : > { %v5271_v1 = vpop.eup %5270  ;;  %v1700_v3 = vmul.f32 %v5269_v63, %v5267_v62 }
 0x1b8   : > { %v5273_v2 = vpop.eup %5272 }
 0x1b9   : > { %v1701_v4 = vmul.f32 %v5273_v2, %v5271_v1 }
 0x1bb   : > { %v1702_v5 = vpack.c.bf16 %v1701_v4, %v1700_v3 }
 0x1bd   : > { %4877 = vst [vmem:[%s1711_s27] sm:$0xff] %v1702_v5   ;;  %1954 = vmatmul.mubr.bf16.vlgmr.msra.gmra.mrb[36].mxu0 %v1702_v5  ;;  %1997 = vmatmul.mubr.bf16.vlgmr.msra.gmra.mrb[36].mxu1 %v1702_v5  ;;  %s2797_s27 = scalar_select %p1352_p4, 4, 3 }
 0x1be   : > { %2314 = vmatprep.mubr.bf16.mxu0 %v5506_v0  ;;  %2357 = vmatprep.mubr.bf16.mxu1 %v5506_v0 }
 0x1bf   : > { %2283 = vmatpush1.bf16.msra.mxu0 %v5965_v8  ;;  %2326 = vmatpush1.bf16.msra.mxu1 %v5968_v9  ;;  %s4668_s17 = sshll.u32 %s2797_s27, 4 }
 0x1c0   : > { %2284 = vmatprep.subr.bf16.mxu0 %v5975_v10  ;;  %2327 = vmatprep.subr.bf16.mxu1 %v5978_v11  ;;  %s6235_s28 = sshra.s32 %s4668_s17, 3 }
 0x1c1   : > { %s4861_s30 = sshll.u32 %s6235_s28, 5  ;;  %s4711_s6 = sshll.u32 %s6235_s28, 2 }
 0x1c2   : > { %s2803_s5 = scalar_lea.vmem [#allocation2], %s4861_s30  ;;  %s3155_s7 = scalar_lea.vmem %s5952_s25, %s4711_s6 }
 0x1c3   : > { %2285 = vmatpush1.bf16.msra.mxu0 %v5981_v57  ;;  %2328 = vmatpush1.bf16.msra.mxu1 %v5984_v58 }
 0x1c4   : > { %2286 = vmatprep.subr.bf16.mxu0 %v5991_v12  ;;  %2329 = vmatprep.subr.bf16.mxu1 %v5994_v13 }
 0x1c7   : > { %2287 = vmatpush1.bf16.msra.mxu0 %v5997_v14  ;;  %2330 = vmatpush1.bf16.msra.mxu1 %v6000_v15 }
 0x1c8   : > { %2288 = vmatprep.subr.bf16.mxu0 %v6007_v16  ;;  %2331 = vmatprep.subr.bf16.mxu1 %v6010_v59 }
 0x1cb   : > { %2289 = vmatpush1.bf16.msra.mxu0 %v6013_v17  ;;  %2332 = vmatpush1.bf16.msra.mxu1 %v6016_v60 }
 0x1cc   : > { %2290 = vmatprep.subr.bf16.mxu0 %v6026_v19  ;;  %2333 = vmatprep.subr.bf16.mxu1 %v6032_v21 }
 0x1cf   : > { %2291 = vmatpush1.bf16.msra.mxu0 %v6023_v18  ;;  %2334 = vmatpush1.bf16.msra.mxu1 %v6029_v20 }
 0x1d0   : > { %2292 = vmatprep.subr.bf16.mxu0 %v6035_v22  ;;  %2335 = vmatprep.subr.bf16.mxu1 %v6039_v23 }
 0x1d3   : > { %2293 = vmatpush1.bf16.msra.mxu0 %v6044_v24  ;;  %2336 = vmatpush1.bf16.msra.mxu1 %v6049_v25 }
 0x1d4   : > { %2294 = vmatprep.subr.bf16.mxu0 %v6052_v26  ;;  %2337 = vmatprep.subr.bf16.mxu1 %v6056_v27 }
 0x1d7   : > { %2295 = vmatpush1.bf16.msra.mxu0 %v6060_v28  ;;  %2338 = vmatpush1.bf16.msra.mxu1 %v6065_v29 }
 0x1d8   : > { %2296 = vmatprep.subr.bf16.mxu0 %v6068_v30  ;;  %2339 = vmatprep.subr.bf16.mxu1 %v6072_v31 }
 0x1db   : > { %2297 = vmatpush1.bf16.msra.mxu0 %v6076_v32  ;;  %2340 = vmatpush1.bf16.msra.mxu1 %v6081_v33 }
 0x1dc   : > { %2643 = vmatprep.subr.bf16.mxu0 %v5959_v6  ;;  %2686 = vmatprep.subr.bf16.mxu1 %v5962_v7 }
 0x290   : > { %v1955_v35 = vpop.f32.mrb[36].mxu0  ;;  %v1998_v37 = vpop.f32.mrb[36].mxu1 }
 0x291   : > { %v2007_v38 = vadd.f32 %v1955_v35, %v1721_v34  ;;  %v2009_v39 = vadd.f32 %v1998_v37, %v1723_v36  ;;  %v1957_v41 = vpop.f32.mrb[37].mxu0  ;;  %v2000_v43 = vpop.f32.mrb[37].mxu1 }
 0x292   : > { %v2008_v44 = vadd.f32 %v1957_v41, %v1722_v40  ;;  %v2010_v45 = vadd.f32 %v2000_v43, %v1724_v42  ;;  %v1959_v47 = vpop.f32.mrb[38].mxu0  ;;  %v2002_v49 = vpop.f32.mrb[38].mxu1 }
 0x293   : > { %v4571_v50 = vmul.f32 -1.442695, %v2007_v38  ;;  %v2011_v51 = vadd.f32 %v1959_v47, %v1725_v46  ;;  %v2013_v52 = vadd.f32 %v2002_v49, %v1727_v48  ;;  %v1961_v54 = vpop.f32.mrb[39].mxu0  ;;  %v2004_v62 = vpop.f32.mrb[39].mxu1 }
 0x294   : > { %v4573_v63 = vmul.f32 -1.442695, %v2008_v44  ;;  %v2012_v1 = vadd.f32 %v1961_v54, %v1726_v53  ;;  %v2014_v2 = vadd.f32 %v2004_v62, %v1728_v56  ;;  %v4575_v5 = vmul.f32 -1.442695, %v2010_v45 }
 0x295   : > { %5274 = vpow2.f32 %v4571_v50  ;;  %v4572_v3 = vmul.f32 -1.442695, %v2011_v51 }
 0x296   : > { %5276 = vpow2.f32 %v4573_v63  ;;  %v4574_v4 = vmul.f32 -1.442695, %v2012_v1  ;;  %v4576_v37 = vmul.f32 -1.442695, %v2014_v2 }
 0x297   : > { %5278 = vpow2.f32 %v4572_v3 }
 0x298   : > { %5280 = vpow2.f32 %v4574_v4 }
 0x299   : > { %5282 = vtanh.f32 %v2009_v39 }
 0x29a   : > { %5284 = vpow2.f32 %v4575_v5 }
 0x29b   : > { %5286 = vtanh.f32 %v2013_v52 }
 0x29f   : > { %v5275_v34 = vpop.eup %5274 }
 0x2a0   : > { %v5277_v35 = vpop.eup %5276  ;;  %v2021_v36 = vadd.f32 1.0, %v5275_v34 }
 0x2a1   : > { %v2033_v38 = vadd.f32 1.0, %v5277_v35  ;;  %v5279_v40 = vpop.eup %5278 }
 0x2a2   : > { %5288 = vrcp.f32 %v2021_v36  ;;  %v2022_v41 = vadd.f32 1.0, %v5279_v40  ;;  %v5281_v42 = vpop.eup %5280 }
 0x2a3   : > { %5290 = vrcp.f32 %v2033_v38  ;;  %v2034_v43 = vadd.f32 1.0, %v5281_v42  ;;  %v5283_v44 = vpop.eup %5282  ;;  %v2083_v42 = vld [vmem:[%s2081_s13 + $0x8] sm:$0xff] }
 0x2a4   : > { %5292 = vpow2.f32 %v4576_v37  ;;  %v5285_v46 = vpop.eup %5284  ;;  %v2084_v37 = vld [vmem:[%s2081_s13 + $0x10] sm:$0xff] }
 0x2a5   : > { %5294 = vrcp.f32 %v2022_v41  ;;  %v5287_v45 = vpop.eup %5286  ;;  %v2047_v52 = vadd.f32 1.0, %v5285_v46 }
 0x2a6   : > { %5296 = vrcp.f32 %v2034_v43 }
 0x2a7   : > { %5298 = vrcp.f32 %v2047_v52 }
 0x2ac   : > { %v5289_v47 = vpop.eup %5288 }
 0x2ad   : > { %v5291_v39 = vpop.eup %5290  ;;  %v2055_v48 = vmul.f32 %v5289_v47, %v5283_v44  ;;  %v2085_v44 = vld [vmem:[%s2081_s13 + $0x18] sm:$0xff] }
 0x2ae   : > { %v5293_v49 = vpop.eup %5292  ;;  %v2053_v50 = vmul.f32 %v5291_v39, %v5942_v55  ;;  %v2086_v39 = vld [vmem:[%s2081_s13 + $0x20] sm:$0xff] }
 0x2af   : > { %v5295_v51 = vpop.eup %5294  ;;  %v2048_v62 = vadd.f32 1.0, %v5293_v49  ;;  %v2088_v49 = vld [vmem:[%s2081_s13 + $0x30] sm:$0xff] }
 0x2b0   : > { %v6094_v53 = vadd.f32 %v2055_v48, %v2053_v50  ;;  %v2056_v54 = vmul.f32 %v5295_v51, %v5287_v45  ;;  %v5297_v56 = vpop.eup %5296 }
 0x2b1   : > { %v2054_v63 = vmul.f32 %v5297_v56, %v5945_v61  ;;  %v5299_v55 = vpop.eup %5298  ;;  %v2082_v61 = vld [vmem:[%s2081_s13] sm:$0xff]  ;;  %v2087_v56 = vld [vmem:[%s2081_s13 + $0x28] sm:$0xff] }
 0x2b2   : > { %5300 = vtanh.f32 %v6094_v53 }
 0x2b3   : > { %v6098_v1 = vadd.f32 %v2056_v54, %v2054_v63  ;;  %5302 = vrcp.f32 %v2048_v62  ;;  %v2089_v63 = vld [vmem:[%s2081_s13 + $0x38] sm:$0xff] }
 0x2b5   : > { %5304 = vtanh.f32 %v6098_v1 }
 0x2bc   : > { %v5301_v2 = vpop.eup %5300 }
 0x2bd   : > { %v5303_v3 = vpop.eup %5302  ;;  %v2061_v5 = vmul.f32 %v5301_v2, %v5299_v55 }
 0x2bf   : > { %v5305_v4 = vpop.eup %5304 }
 0x2c0   : > { %v2062_v34 = vmul.f32 %v5305_v4, %v5303_v3 }
 0x2c2   : > { %v2063_v35 = vpack.c.bf16 %v2062_v34, %v2061_v5 }
 0x2c4   : > { %4882 = vst [vmem:[%s2072_s8] sm:$0xff] %v2063_v35   ;;  %2315 = vmatmul.mubr.bf16.vlgmr.msra.gmra.mrb[40].mxu0 %v2063_v35  ;;  %2358 = vmatmul.mubr.bf16.vlgmr.msra.gmra.mrb[40].mxu1 %v2063_v35  ;;  %s3158_s8 = scalar_select %p1352_p4, 5, 2 }
 0x2c5   : > { %2644 = vmatpush1.bf16.msra.mxu0 %v5965_v8  ;;  %2687 = vmatpush1.bf16.msra.mxu1 %v5968_v9 }
 0x2c6   : > { %2645 = vmatprep.subr.bf16.mxu0 %v5975_v10  ;;  %2688 = vmatprep.subr.bf16.mxu1 %v5978_v11  ;;  %s4712_s9 = sshll.u32 %s3158_s8, 4 }
 0x2c7   : > { %2675 = vmatprep.mubr.bf16.mxu0 %v5506_v0  ;;  %2718 = vmatprep.mubr.bf16.mxu1 %v5506_v0  ;;  %s6382_s10 = sshra.s32 %s4712_s9, 3 }
 0x2c8   : > { %s4755_s12 = sshll.u32 %s6382_s10, 2 }
 0x2c9   : > { %2646 = vmatpush1.bf16.msra.mxu0 %v5981_v57  ;;  %2689 = vmatpush1.bf16.msra.mxu1 %v5984_v58  ;;  %s3516_s13 = scalar_lea.vmem %s5952_s25, %s4755_s12 }
 0x2ca   : > { %2647 = vmatprep.subr.bf16.mxu0 %v5991_v12  ;;  %2690 = vmatprep.subr.bf16.mxu1 %v5994_v13 }
 0x2cd   : > { %2648 = vmatpush1.bf16.msra.mxu0 %v5997_v14  ;;  %2691 = vmatpush1.bf16.msra.mxu1 %v6000_v15 }
 0x2ce   : > { %2649 = vmatprep.subr.bf16.mxu0 %v6007_v16  ;;  %2692 = vmatprep.subr.bf16.mxu1 %v6010_v59 }
 0x2d1   : > { %2650 = vmatpush1.bf16.msra.mxu0 %v6013_v17  ;;  %2693 = vmatpush1.bf16.msra.mxu1 %v6016_v60 }
 0x2d2   : > { %2651 = vmatprep.subr.bf16.mxu0 %v6026_v19  ;;  %2694 = vmatprep.subr.bf16.mxu1 %v6032_v21 }
 0x2d5   : > { %2652 = vmatpush1.bf16.msra.mxu0 %v6023_v18  ;;  %2695 = vmatpush1.bf16.msra.mxu1 %v6029_v20 }
 0x2d6   : > { %2653 = vmatprep.subr.bf16.mxu0 %v6035_v22  ;;  %2696 = vmatprep.subr.bf16.mxu1 %v6039_v23 }
 0x2d9   : > { %2654 = vmatpush1.bf16.msra.mxu0 %v6044_v24  ;;  %2697 = vmatpush1.bf16.msra.mxu1 %v6049_v25 }
 0x2da   : > { %2655 = vmatprep.subr.bf16.mxu0 %v6052_v26  ;;  %2698 = vmatprep.subr.bf16.mxu1 %v6056_v27 }
 0x2dd   : > { %2656 = vmatpush1.bf16.msra.mxu0 %v6060_v28  ;;  %2699 = vmatpush1.bf16.msra.mxu1 %v6065_v29 }
 0x2de   : > { %2657 = vmatprep.subr.bf16.mxu0 %v6068_v30  ;;  %2700 = vmatprep.subr.bf16.mxu1 %v6072_v31 }
 0x2e1   : > { %2658 = vmatpush1.bf16.msra.mxu0 %v6076_v32  ;;  %2701 = vmatpush1.bf16.msra.mxu1 %v6081_v33 }
 0x2e2   : > { %3004 = vmatprep.subr.bf16.mxu0 %v5959_v6  ;;  %3047 = vmatprep.subr.bf16.mxu1 %v5962_v7 }
 0x397   : > { %v2316_v36 = vpop.f32.mrb[40].mxu0  ;;  %v2359_v38 = vpop.f32.mrb[40].mxu1 }
 0x398   : > { %v2368_v40 = vadd.f32 %v2316_v36, %v2082_v61  ;;  %v2370_v41 = vadd.f32 %v2359_v38, %v2084_v37  ;;  %v2318_v43 = vpop.f32.mrb[41].mxu0  ;;  %v2361_v46 = vpop.f32.mrb[41].mxu1 }
 0x399   : > { %v2369_v45 = vadd.f32 %v2318_v43, %v2083_v42  ;;  %v2371_v47 = vadd.f32 %v2361_v46, %v2085_v44  ;;  %v2320_v48 = vpop.f32.mrb[42].mxu0  ;;  %v2363_v50 = vpop.f32.mrb[42].mxu1 }
 0x39a   : > { %v4615_v51 = vmul.f32 -1.442695, %v2368_v40  ;;  %v2372_v52 = vadd.f32 %v2320_v48, %v2086_v39  ;;  %v2374_v54 = vadd.f32 %v2363_v50, %v2088_v49  ;;  %v2322_v62 = vpop.f32.mrb[43].mxu0  ;;  %v2365_v55 = vpop.f32.mrb[43].mxu1 }
 0x39b   : > { %v4617_v2 = vmul.f32 -1.442695, %v2369_v45  ;;  %v2373_v3 = vadd.f32 %v2322_v62, %v2087_v56  ;;  %v2375_v4 = vadd.f32 %v2365_v55, %v2089_v63  ;;  %v4619_v35 = vmul.f32 -1.442695, %v2371_v47 }
 0x39c   : > { %5306 = vpow2.f32 %v4615_v51  ;;  %v4616_v5 = vmul.f32 -1.442695, %v2372_v52 }
 0x39d   : > { %5308 = vpow2.f32 %v4617_v2  ;;  %v4618_v34 = vmul.f32 -1.442695, %v2373_v3  ;;  %v4620_v38 = vmul.f32 -1.442695, %v2375_v4 }
 0x39e   : > { %5310 = vpow2.f32 %v4616_v5 }
 0x39f   : > { %5312 = vpow2.f32 %v4618_v34 }
 0x3a0   : > { %5314 = vtanh.f32 %v2370_v41 }
 0x3a1   : > { %5316 = vpow2.f32 %v4619_v35 }
 0x3a2   : > { %5318 = vtanh.f32 %v2374_v54 }
 0x3a6   : > { %v5307_v61 = vpop.eup %5306 }
 0x3a7   : > { %v5309_v36 = vpop.eup %5308  ;;  %v2382_v37 = vadd.f32 1.0, %v5307_v61 }
 0x3a8   : > { %v2394_v40 = vadd.f32 1.0, %v5309_v36  ;;  %v5311_v42 = vpop.eup %5310 }
 0x3a9   : > { %5320 = vrcp.f32 %v2382_v37  ;;  %v2383_v43 = vadd.f32 1.0, %v5311_v42  ;;  %v5313_v44 = vpop.eup %5312 }
 0x3aa   : > { %5322 = vrcp.f32 %v2394_v40  ;;  %v2395_v46 = vadd.f32 1.0, %v5313_v44  ;;  %v5315_v45 = vpop.eup %5314  ;;  %v2444_v44 = vld [vmem:[%s2442_s23 + $0x8] sm:$0xff] }
 0x3ab   : > { %5324 = vpow2.f32 %v4620_v38  ;;  %v5317_v39 = vpop.eup %5316  ;;  %v2445_v38 = vld [vmem:[%s2442_s23 + $0x10] sm:$0xff] }
 0x3ac   : > { %5326 = vrcp.f32 %v2383_v43  ;;  %v5319_v47 = vpop.eup %5318  ;;  %v2408_v54 = vadd.f32 1.0, %v5317_v39 }
 0x3ad   : > { %5328 = vrcp.f32 %v2395_v46 }
 0x3ae   : > { %5330 = vrcp.f32 %v2408_v54  ;;  %v2448_v54 = vld [vmem:[%s2442_s23 + $0x28] sm:$0xff] }
 0x3b3   : > { %v5321_v48 = vpop.eup %5320 }
 0x3b4   : > { %v5323_v41 = vpop.eup %5322  ;;  %v2416_v49 = vmul.f32 %v5321_v48, %v5315_v45  ;;  %v2446_v45 = vld [vmem:[%s2442_s23 + $0x18] sm:$0xff] }
 0x3b5   : > { %v5325_v50 = vpop.eup %5324  ;;  %v2414_v51 = vmul.f32 %v5323_v41, %v6094_v53  ;;  %v2449_v41 = vld [vmem:[%s2442_s23 + $0x30] sm:$0xff] }
 0x3b6   : > { %v5327_v52 = vpop.eup %5326  ;;  %v2409_v55 = vadd.f32 1.0, %v5325_v50 }
 0x3b7   : > { %v6143_v56 = vadd.f32 %v2416_v49, %v2414_v51  ;;  %v2417_v62 = vmul.f32 %v5327_v52, %v5319_v47  ;;  %v5329_v63 = vpop.eup %5328  ;;  %v2447_v47 = vld [vmem:[%s2442_s23 + $0x20] sm:$0xff] }
 0x3b8   : > { %v2415_v2 = vmul.f32 %v5329_v63, %v6098_v1  ;;  %v5331_v53 = vpop.eup %5330  ;;  %v2443_v1 = vld [vmem:[%s2442_s23] sm:$0xff]  ;;  %v2450_v63 = vld [vmem:[%s2442_s23 + $0x38] sm:$0xff] }
 0x3b9   : > { %5332 = vtanh.f32 %v6143_v56 }
 0x3ba   : > { %v6147_v3 = vadd.f32 %v2417_v62, %v2415_v2  ;;  %5334 = vrcp.f32 %v2409_v55 }
 0x3bc   : > { %5336 = vtanh.f32 %v6147_v3 }
 0x3c3   : > { %v5333_v4 = vpop.eup %5332 }
 0x3c4   : > { %v5335_v5 = vpop.eup %5334  ;;  %v2422_v35 = vmul.f32 %v5333_v4, %v5331_v53 }
 0x3c6   : > { %v5337_v34 = vpop.eup %5336 }
 0x3c7   : > { %v2423_v61 = vmul.f32 %v5337_v34, %v5335_v5 }
 0x3c9   : > { %v2424_v36 = vpack.c.bf16 %v2423_v61, %v2422_v35 }
 0x3cb   : > { %4887 = vst [vmem:[%s2433_s18] sm:$0xff] %v2424_v36   ;;  %2676 = vmatmul.mubr.bf16.vlgmr.msra.gmra.mrb[44].mxu0 %v2424_v36  ;;  %2719 = vmatmul.mubr.bf16.vlgmr.msra.gmra.mrb[44].mxu1 %v2424_v36  ;;  %s4756_s18 = sshll.u32 %s3519_s14, 4 }
 0x3cc   : > { %3005 = vmatpush1.bf16.msra.mxu0 %v5965_v8  ;;  %3048 = vmatpush1.bf16.msra.mxu1 %v5968_v9  ;;  %s6429_s19 = sshra.s32 %s4756_s18, 3 }
 0x3cd   : > { %3006 = vmatprep.subr.bf16.mxu0 %v5975_v10  ;;  %3049 = vmatprep.subr.bf16.mxu1 %v5978_v11  ;;  %s4867_s20 = sshll.u32 %s6429_s19, 5  ;;  %s4799_s22 = sshll.u32 %s6429_s19, 2 }
 0x3ce   : > { %3036 = vmatprep.mubr.bf16.mxu0 %v5506_v0  ;;  %3079 = vmatprep.mubr.bf16.mxu1 %v5506_v0  ;;  %s3525_s21 = scalar_lea.vmem [#allocation2], %s4867_s20  ;;  %s3877_s23 = scalar_lea.vmem %s5952_s25, %s4799_s22 }
 0x3d0   : > { %3007 = vmatpush1.bf16.msra.mxu0 %v5981_v57  ;;  %3050 = vmatpush1.bf16.msra.mxu1 %v5984_v58 }
 0x3d1   : > { %3008 = vmatprep.subr.bf16.mxu0 %v5991_v12  ;;  %3051 = vmatprep.subr.bf16.mxu1 %v5994_v13 }
 0x3d4   : > { %3009 = vmatpush1.bf16.msra.mxu0 %v5997_v14  ;;  %3052 = vmatpush1.bf16.msra.mxu1 %v6000_v15 }
 0x3d5   : > { %3010 = vmatprep.subr.bf16.mxu0 %v6007_v16  ;;  %3053 = vmatprep.subr.bf16.mxu1 %v6010_v59 }
 0x3d8   : > { %3011 = vmatpush1.bf16.msra.mxu0 %v6013_v17  ;;  %3054 = vmatpush1.bf16.msra.mxu1 %v6016_v60 }
 0x3d9   : > { %3012 = vmatprep.subr.bf16.mxu0 %v6026_v19  ;;  %3055 = vmatprep.subr.bf16.mxu1 %v6032_v21 }
 0x3dc   : > { %3013 = vmatpush1.bf16.msra.mxu0 %v6023_v18  ;;  %3056 = vmatpush1.bf16.msra.mxu1 %v6029_v20 }
 0x3dd   : > { %3014 = vmatprep.subr.bf16.mxu0 %v6035_v22  ;;  %3057 = vmatprep.subr.bf16.mxu1 %v6039_v23 }
 0x3e0   : > { %3015 = vmatpush1.bf16.msra.mxu0 %v6044_v24  ;;  %3058 = vmatpush1.bf16.msra.mxu1 %v6049_v25 }
 0x3e1   : > { %3016 = vmatprep.subr.bf16.mxu0 %v6052_v26  ;;  %3059 = vmatprep.subr.bf16.mxu1 %v6056_v27 }
 0x3e4   : > { %3017 = vmatpush1.bf16.msra.mxu0 %v6060_v28  ;;  %3060 = vmatpush1.bf16.msra.mxu1 %v6065_v29 }
 0x3e5   : > { %3018 = vmatprep.subr.bf16.mxu0 %v6068_v30  ;;  %3061 = vmatprep.subr.bf16.mxu1 %v6072_v31 }
 0x3e8   : > { %3019 = vmatpush1.bf16.msra.mxu0 %v6076_v32  ;;  %3062 = vmatpush1.bf16.msra.mxu1 %v6081_v33 }
 0x3e9   : > { %3365 = vmatprep.subr.bf16.mxu0 %v5959_v6  ;;  %3408 = vmatprep.subr.bf16.mxu1 %v5962_v7 }
 0x49e   : > { %v2677_v37 = vpop.f32.mrb[44].mxu0  ;;  %v2720_v40 = vpop.f32.mrb[44].mxu1 }
 0x49f   : > { %v2729_v42 = vadd.f32 %v2677_v37, %v2443_v1  ;;  %v2731_v43 = vadd.f32 %v2720_v40, %v2445_v38  ;;  %v2679_v46 = vpop.f32.mrb[45].mxu0  ;;  %v2722_v6 = vpop.f32.mrb[45].mxu1 }
 0x4a0   : > { %v2730_v39 = vadd.f32 %v2679_v46, %v2444_v44  ;;  %v2732_v7 = vadd.f32 %v2722_v6, %v2446_v45  ;;  %v2681_v48 = vpop.f32.mrb[46].mxu0  ;;  %v2724_v49 = vpop.f32.mrb[46].mxu1 }
 0x4a1   : > { %v4659_v50 = vmul.f32 -1.442695, %v2729_v42  ;;  %v2733_v51 = vadd.f32 %v2681_v48, %v2447_v47  ;;  %v2735_v52 = vadd.f32 %v2724_v49, %v2449_v41  ;;  %v2683_v62 = vpop.f32.mrb[47].mxu0  ;;  %v2726_v55 = vpop.f32.mrb[47].mxu1 }
 0x4a2   : > { %v4661_v2 = vmul.f32 -1.442695, %v2730_v39  ;;  %v2734_v53 = vadd.f32 %v2683_v62, %v2448_v54  ;;  %v2736_v4 = vadd.f32 %v2726_v55, %v2450_v63  ;;  %v4663_v35 = vmul.f32 -1.442695, %v2732_v7 }
 0x4a3   : > { %5338 = vpow2.f32 %v4659_v50  ;;  %v4660_v5 = vmul.f32 -1.442695, %v2733_v51 }
 0x4a4   : > { %5340 = vpow2.f32 %v4661_v2  ;;  %v4662_v34 = vmul.f32 -1.442695, %v2734_v53  ;;  %v4664_v37 = vmul.f32 -1.442695, %v2736_v4 }
 0x4a5   : > { %5342 = vpow2.f32 %v4660_v5 }
 0x4a6   : > { %5344 = vpow2.f32 %v4662_v34 }
 0x4a7   : > { %5346 = vtanh.f32 %v2731_v43 }
 0x4a8   : > { %5348 = vpow2.f32 %v4663_v35 }
 0x4a9   : > { %5350 = vtanh.f32 %v2735_v52 }
 0x4ad   : > { %v5339_v61 = vpop.eup %5338 }
 0x4ae   : > { %v5341_v36 = vpop.eup %5340  ;;  %v2743_v1 = vadd.f32 1.0, %v5339_v61 }
 0x4af   : > { %v2755_v38 = vadd.f32 1.0, %v5341_v36  ;;  %v5343_v40 = vpop.eup %5342 }
 0x4b0   : > { %5352 = vrcp.f32 %v2743_v1  ;;  %v2744_v42 = vadd.f32 1.0, %v5343_v40  ;;  %v5345_v44 = vpop.eup %5344 }
 0x4b1   : > { %5354 = vrcp.f32 %v2755_v38  ;;  %v2756_v46 = vadd.f32 1.0, %v5345_v44  ;;  %v5347_v45 = vpop.eup %5346 }
 0x4b2   : > { %5356 = vpow2.f32 %v4664_v37  ;;  %v5349_v6 = vpop.eup %5348 }
 0x4b3   : > { %5358 = vrcp.f32 %v2744_v42  ;;  %v5351_v39 = vpop.eup %5350  ;;  %v2769_v50 = vadd.f32 1.0, %v5349_v6 }
 0x4b4   : > { %5360 = vrcp.f32 %v2756_v46 }
 0x4b5   : > { %5362 = vrcp.f32 %v2769_v50 }
 0x4ba   : > { %v5353_v7 = vpop.eup %5352 }
 0x4bb   : > { %v5355_v43 = vpop.eup %5354  ;;  %v2777_v47 = vmul.f32 %v5353_v7, %v5347_v45 }
 0x4bc   : > { %v5357_v48 = vpop.eup %5356  ;;  %v2775_v41 = vmul.f32 %v5355_v43, %v6143_v56 }
 0x4bd   : > { %v5359_v49 = vpop.eup %5358  ;;  %v2770_v62 = vadd.f32 1.0, %v5357_v48 }
 0x4be   : > { %v6192_v51 = vadd.f32 %v2777_v47, %v2775_v41  ;;  %v2778_v52 = vmul.f32 %v5359_v49, %v5351_v39  ;;  %v5361_v54 = vpop.eup %5360 }
 0x4bf   : > { %v2776_v63 = vmul.f32 %v5361_v54, %v6147_v3  ;;  %v5363_v56 = vpop.eup %5362 }
 0x4c0   : > { %5364 = vtanh.f32 %v6192_v51 }
 0x4c1   : > { %v6196_v55 = vadd.f32 %v2778_v52, %v2776_v63  ;;  %5366 = vrcp.f32 %v2770_v62 }
 0x4c3   : > { %5368 = vtanh.f32 %v6196_v55 }
 0x4ca   : > { %v5365_v2 = vpop.eup %5364 }
 0x4cb   : > { %v5367_v53 = vpop.eup %5366  ;;  %v2783_v5 = vmul.f32 %v5365_v2, %v5363_v56 }
 0x4cd   : > { %v5369_v4 = vpop.eup %5368 }
 0x4ce   : > { %v2784_v34 = vmul.f32 %v5369_v4, %v5367_v53 }
 0x4d0   : > { %v2785_v35 = vpack.c.bf16 %v2784_v34, %v2783_v5  ;;  %v6251_v34 = vld [vmem:[%s5615_s29 + $0x4] ss:$16 sps:$4 sm:$0xff]  }
 0x4d2   : > { %4892 = vst [vmem:[%s2794_s26] sm:$0xff] %v2785_v35   ;;  %3037 = vmatmul.mubr.bf16.vlgmr.msra.gmra.mrb[48].mxu0 %v2785_v35  ;;  %3080 = vmatmul.mubr.bf16.vlgmr.msra.gmra.mrb[48].mxu1 %v2785_v35  ;;  %v6254_v35 = vld [vmem:[%s5615_s29 + $0xc] ss:$16 sps:$4 sm:$0xff]   ;;  %s4800_s26 = sshll.u32 %s3880_s24, 4 }
 0x4d3   : > { %3366 = vmatpush1.bf16.msra.mxu0 %v5965_v8  ;;  %3409 = vmatpush1.bf16.msra.mxu1 %v5968_v9  ;;  %v2804_v8 = vld [vmem:[%s2803_s5] sm:$0xff]  ;;  %s6444_s27 = sshra.s32 %s4800_s26, 3 }
 0x4d4   : > { %3367 = vmatprep.subr.bf16.mxu0 %v5975_v10  ;;  %3410 = vmatprep.subr.bf16.mxu1 %v5978_v11  ;;  %v2806_v10 = vld [vmem:[%s2803_s5 + $0x10] sm:$0xff]  ;;  %s4870_s17 = sshll.u32 %s6444_s27, 5  ;;  %s4843_s16 = sshll.u32 %s6444_s27, 2 }
 0x4d5   : > { %3397 = vmatprep.mubr.bf16.mxu0 %v5506_v0  ;;  %3440 = vmatprep.mubr.bf16.mxu1 %v5506_v0  ;;  %s3886_s28 = scalar_lea.vmem [#allocation2], %s4870_s17  ;;  %s4238_s30 = scalar_lea.vmem %s5952_s25, %s4843_s16 }
 0x4d7   : > { %3368 = vmatpush1.bf16.msra.mxu0 %v5981_v57  ;;  %3411 = vmatpush1.bf16.msra.mxu1 %v5984_v58 }
 0x4d8   : > { %3369 = vmatprep.subr.bf16.mxu0 %v5991_v12  ;;  %3412 = vmatprep.subr.bf16.mxu1 %v5994_v13  ;;  %v2805_v12 = vld [vmem:[%s2803_s5 + $0x8] sm:$0xff] }
 0x4db   : > { %3370 = vmatpush1.bf16.msra.mxu0 %v5997_v14  ;;  %3413 = vmatpush1.bf16.msra.mxu1 %v6000_v15  ;;  %v2807_v14 = vld [vmem:[%s2803_s5 + $0x18] sm:$0xff] }
 0x4dc   : > { %3371 = vmatprep.subr.bf16.mxu0 %v6007_v16  ;;  %3414 = vmatprep.subr.bf16.mxu1 %v6010_v59 }
 0x4df   : > { %3372 = vmatpush1.bf16.msra.mxu0 %v6013_v17  ;;  %3415 = vmatpush1.bf16.msra.mxu1 %v6016_v60  ;;  %v2808_v17 = vld [vmem:[%s2803_s5 + $0x20] sm:$0xff] }
 0x4e0   : > { %3373 = vmatprep.subr.bf16.mxu0 %v6026_v19  ;;  %3416 = vmatprep.subr.bf16.mxu1 %v6032_v21 }
 0x4e3   : > { %3374 = vmatpush1.bf16.msra.mxu0 %v6023_v18  ;;  %3417 = vmatpush1.bf16.msra.mxu1 %v6029_v20  ;;  %v2810_v18 = vld [vmem:[%s2803_s5 + $0x30] sm:$0xff] }
 0x4e4   : > { %3375 = vmatprep.subr.bf16.mxu0 %v6035_v22  ;;  %3418 = vmatprep.subr.bf16.mxu1 %v6039_v23  ;;  %v2809_v23 = vld [vmem:[%s2803_s5 + $0x28] sm:$0xff] }
 0x4e7   : > { %3376 = vmatpush1.bf16.msra.mxu0 %v6044_v24  ;;  %3419 = vmatpush1.bf16.msra.mxu1 %v6049_v25  ;;  %v2811_v25 = vld [vmem:[%s2803_s5 + $0x38] sm:$0xff] }
 0x4e8   : > { %3377 = vmatprep.subr.bf16.mxu0 %v6052_v26  ;;  %3420 = vmatprep.subr.bf16.mxu1 %v6056_v27 }
 0x4eb   : > { %3378 = vmatpush1.bf16.msra.mxu0 %v6060_v28  ;;  %3421 = vmatpush1.bf16.msra.mxu1 %v6065_v29 }
 0x4ec   : > { %3379 = vmatprep.subr.bf16.mxu0 %v6068_v30  ;;  %3422 = vmatprep.subr.bf16.mxu1 %v6072_v31 }
 0x4ef   : > { %3380 = vmatpush1.bf16.msra.mxu0 %v6076_v32  ;;  %3423 = vmatpush1.bf16.msra.mxu1 %v6081_v33 }
 0x4f0   : > { %3726 = vmatprep.subr.bf16.mxu0 %v6251_v34  ;;  %3769 = vmatprep.subr.bf16.mxu1 %v6254_v35 }
 0x5a5   : > { %v3038_v9 = vpop.f32.mrb[48].mxu0  ;;  %v3081_v11 = vpop.f32.mrb[48].mxu1 }
 0x5a6   : > { %v3090_v57 = vadd.f32 %v3038_v9, %v2804_v8  ;;  %v3092_v58 = vadd.f32 %v3081_v11, %v2806_v10  ;;  %v3040_v13 = vpop.f32.mrb[49].mxu0  ;;  %v3083_v15 = vpop.f32.mrb[49].mxu1  ;;  %v6257_v8 = vld [vmem:[%s5615_s29] ss:$16 sps:$4 sm:$0xff]   ;;  %v6260_v9 = vld [vmem:[%s5615_s29 + $0x8] ss:$16 sps:$4 sm:$0xff]  }
 0x5a7   : > { %v3091_v16 = vadd.f32 %v3040_v13, %v2805_v12  ;;  %v3093_v59 = vadd.f32 %v3083_v15, %v2807_v14  ;;  %v3042_v60 = vpop.f32.mrb[50].mxu0  ;;  %v3085_v19 = vpop.f32.mrb[50].mxu1  ;;  %v6267_v10 = vld [vmem:[%s5615_s29 + $0x24] ss:$16 sps:$4 sm:$0xff]   ;;  %v6270_v11 = vld [vmem:[%s5615_s29 + $0x2c] ss:$16 sps:$4 sm:$0xff]  }
 0x5a8   : > { %v4703_v20 = vmul.f32 -1.442695, %v3090_v57  ;;  %v3094_v21 = vadd.f32 %v3042_v60, %v2808_v17  ;;  %v3096_v22 = vadd.f32 %v3085_v19, %v2810_v18  ;;  %v3044_v24 = vpop.f32.mrb[51].mxu0  ;;  %v3087_v26 = vpop.f32.mrb[51].mxu1  ;;  %v6273_v57 = vld [vmem:[%s5615_s29 + $0x20] ss:$16 sps:$4 sm:$0xff]  }
 0x5a9   : > { %v4705_v27 = vmul.f32 -1.442695, %v3091_v16  ;;  %v3095_v28 = vadd.f32 %v3044_v24, %v2809_v23  ;;  %v3097_v29 = vadd.f32 %v3087_v26, %v2811_v25  ;;  %v4707_v32 = vmul.f32 -1.442695, %v3093_v59  ;;  %v6283_v12 = vld [vmem:[%s5615_s29 + $0x44] ss:$16 sps:$4 sm:$0xff]  }
 0x5aa   : > { %5370 = vpow2.f32 %v4703_v20  ;;  %v4704_v30 = vmul.f32 -1.442695, %v3094_v21  ;;  %v6286_v13 = vld [vmem:[%s5615_s29 + $0x4c] ss:$16 sps:$4 sm:$0xff]   ;;  %v6289_v14 = vld [vmem:[%s5615_s29 + $0x40] ss:$16 sps:$4 sm:$0xff]  }
 0x5ab   : > { %5372 = vpow2.f32 %v4705_v27  ;;  %v4706_v31 = vmul.f32 -1.442695, %v3095_v28  ;;  %v4708_v36 = vmul.f32 -1.442695, %v3097_v29  ;;  %v6292_v15 = vld [vmem:[%s5615_s29 + $0x48] ss:$16 sps:$4 sm:$0xff]  }
 0x5ac   : > { %5374 = vpow2.f32 %v4704_v30  ;;  %v6299_v16 = vld [vmem:[%s5615_s29 + $0x64] ss:$16 sps:$4 sm:$0xff]   ;;  %v6302_v59 = vld [vmem:[%s5615_s29 + $0x6c] ss:$16 sps:$4 sm:$0xff]   ;;  %v6305_v17 = vld [vmem:[%s5615_s29 + $0x60] ss:$16 sps:$4 sm:$0xff]  }
 0x5ad   : > { %5376 = vpow2.f32 %v4706_v31  ;;  %v6308_v60 = vld [vmem:[%s5615_s29 + $0x68] ss:$16 sps:$4 sm:$0xff]   ;;  %v6315_v18 = vld [vmem:[%s5615_s29 + $0x84] ss:$16 sps:$4 sm:$0xff]   ;;  %v6318_v19 = vld [vmem:[%s5615_s29 + $0x8c] ss:$16 sps:$4 sm:$0xff]  }
 0x5ae   : > { %5378 = vtanh.f32 %v3092_v58  ;;  %v6276_v58 = vld [vmem:[%s5615_s29 + $0x28] ss:$16 sps:$4 sm:$0xff]   ;;  %v6321_v20 = vld [vmem:[%s5615_s29 + $0x80] ss:$16 sps:$4 sm:$0xff]   ;;  %v6332_v23 = vld [vmem:[%s5615_s29 + $0xac] ss:$16 sps:$4 sm:$0xff]  }
 0x5af   : > { %5380 = vpow2.f32 %v4707_v32  ;;  %v6324_v21 = vld [vmem:[%s5615_s29 + $0x88] ss:$16 sps:$4 sm:$0xff]   ;;  %v6337_v24 = vld [vmem:[%s5615_s29 + $0xa0] ss:$16 sps:$4 sm:$0xff]   ;;  %v6345_v26 = vld [vmem:[%s5615_s29 + $0xc4] ss:$16 sps:$4 sm:$0xff]  }
 0x5b0   : > { %5382 = vtanh.f32 %v3096_v22  ;;  %v6329_v22 = vld [vmem:[%s5615_s29 + $0xa4] ss:$16 sps:$4 sm:$0xff]   ;;  %v6340_v25 = vld [vmem:[%s5615_s29 + $0xa8] ss:$16 sps:$4 sm:$0xff]   ;;  %v6348_v27 = vld [vmem:[%s5615_s29 + $0xcc] ss:$16 sps:$4 sm:$0xff]  }
 0x5b1   : > { %v6353_v28 = vld [vmem:[%s5615_s29 + $0xc0] ss:$16 sps:$4 sm:$0xff]   ;;  %v6356_v29 = vld [vmem:[%s5615_s29 + $0xc8] ss:$16 sps:$4 sm:$0xff]   ;;  %v6361_v30 = vld [vmem:[%s5615_s29 + $0xe4] ss:$16 sps:$4 sm:$0xff]  }
 0x5b2   : > { %v6364_v31 = vld [vmem:[%s5615_s29 + $0xec] ss:$16 sps:$4 sm:$0xff]   ;;  %v6369_v32 = vld [vmem:[%s5615_s29 + $0xe0] ss:$16 sps:$4 sm:$0xff]  }
 0x5b4   : > { %v5371_v33 = vpop.eup %5370 }
 0x5b5   : > { %v5373_v3 = vpop.eup %5372  ;;  %v3104_v61 = vadd.f32 1.0, %v5371_v33  ;;  %v6372_v33 = vld [vmem:[%s5615_s29 + $0xe8] ss:$16 sps:$4 sm:$0xff]   ;;  %s4864_s29 = sshll.u32 %s6382_s10, 5 }
 0x5b6   : > { %v3116_v1 = vadd.f32 1.0, %v5373_v3  ;;  %v5375_v37 = vpop.eup %5374  ;;  %s3164_s11 = scalar_lea.vmem [#allocation2], %s4864_s29 }
 0x5b7   : > { %5384 = vrcp.f32 %v3104_v61  ;;  %v3105_v38 = vadd.f32 1.0, %v5375_v37  ;;  %v5377_v40 = vpop.eup %5376  ;;  %v3165_v3 = vld [vmem:[%s3164_s11] sm:$0xff] }
 0x5b8   : > { %5386 = vrcp.f32 %v3116_v1  ;;  %v3117_v42 = vadd.f32 1.0, %v5377_v40  ;;  %v5379_v44 = vpop.eup %5378  ;;  %v3166_v40 = vld [vmem:[%s3164_s11 + $0x8] sm:$0xff] }
 0x5b9   : > { %5388 = vpow2.f32 %v4708_v36  ;;  %v5381_v46 = vpop.eup %5380  ;;  %v3167_v36 = vld [vmem:[%s3164_s11 + $0x10] sm:$0xff] }
 0x5ba   : > { %5390 = vrcp.f32 %v3105_v38  ;;  %v5383_v45 = vpop.eup %5382  ;;  %v3130_v41 = vadd.f32 1.0, %v5381_v46 }
 0x5bb   : > { %5392 = vrcp.f32 %v3117_v42 }
 0x5bc   : > { %5394 = vrcp.f32 %v3130_v41 }
 0x5c1   : > { %v5385_v6 = vpop.eup %5384 }
 0x5c2   : > { %v5387_v39 = vpop.eup %5386  ;;  %v3138_v7 = vmul.f32 %v5385_v6, %v5379_v44  ;;  %v3168_v44 = vld [vmem:[%s3164_s11 + $0x18] sm:$0xff] }
 0x5c3   : > { %v5389_v43 = vpop.eup %5388  ;;  %v3136_v47 = vmul.f32 %v5387_v39, %v6192_v51  ;;  %v3169_v39 = vld [vmem:[%s3164_s11 + $0x20] sm:$0xff] }
 0x5c4   : > { %v5391_v48 = vpop.eup %5390  ;;  %v3131_v54 = vadd.f32 1.0, %v5389_v43  ;;  %v3171_v43 = vld [vmem:[%s3164_s11 + $0x30] sm:$0xff] }
 0x5c5   : > { %v6239_v49 = vadd.f32 %v3138_v7, %v3136_v47  ;;  %v3139_v50 = vmul.f32 %v5391_v48, %v5383_v45  ;;  %v5393_v52 = vpop.eup %5392 }
 0x5c6   : > { %v3137_v62 = vmul.f32 %v5393_v52, %v6196_v55  ;;  %v5395_v51 = vpop.eup %5394  ;;  %v3170_v52 = vld [vmem:[%s3164_s11 + $0x28] sm:$0xff] }
 0x5c7   : > { %5396 = vtanh.f32 %v6239_v49 }
 0x5c8   : > { %v6243_v63 = vadd.f32 %v3139_v50, %v3137_v62  ;;  %5398 = vrcp.f32 %v3131_v54  ;;  %v3172_v62 = vld [vmem:[%s3164_s11 + $0x38] sm:$0xff] }
 0x5ca   : > { %5400 = vtanh.f32 %v6243_v63 }
 0x5d1   : > { %v5397_v56 = vpop.eup %5396 }
 0x5d2   : > { %v5399_v2 = vpop.eup %5398  ;;  %v3144_v4 = vmul.f32 %v5397_v56, %v5395_v51 }
 0x5d4   : > { %v5401_v53 = vpop.eup %5400 }
 0x5d5   : > { %v3145_v5 = vmul.f32 %v5401_v53, %v5399_v2 }
 0x5d7   : > { %v3146_v55 = vpack.c.bf16 %v3145_v5, %v3144_v4 }
 0x5d9   : > { %4897 = vst [vmem:[%s3155_s7] sm:$0xff] %v3146_v55   ;;  %3398 = vmatmul.mubr.bf16.vlgmr.msra.gmra.mrb[52].mxu0 %v3146_v55  ;;  %3441 = vmatmul.mubr.bf16.vlgmr.msra.gmra.mrb[52].mxu1 %v3146_v55 }
 0x5da   : > { %3758 = vmatprep.mubr.bf16.mxu0 %v5506_v0  ;;  %3801 = vmatprep.mubr.bf16.mxu1 %v5506_v0 }
 0x5db   : > { %3727 = vmatpush1.bf16.msra.mxu0 %v6257_v8  ;;  %3770 = vmatpush1.bf16.msra.mxu1 %v6260_v9 }
 0x5dc   : > { %3728 = vmatprep.subr.bf16.mxu0 %v6267_v10  ;;  %3771 = vmatprep.subr.bf16.mxu1 %v6270_v11 }
 0x5df   : > { %3729 = vmatpush1.bf16.msra.mxu0 %v6273_v57  ;;  %3772 = vmatpush1.bf16.msra.mxu1 %v6276_v58 }
 0x5e0   : > { %3730 = vmatprep.subr.bf16.mxu0 %v6283_v12  ;;  %3773 = vmatprep.subr.bf16.mxu1 %v6286_v13 }
 0x5e3   : > { %3731 = vmatpush1.bf16.msra.mxu0 %v6289_v14  ;;  %3774 = vmatpush1.bf16.msra.mxu1 %v6292_v15 }
 0x5e4   : > { %3732 = vmatprep.subr.bf16.mxu0 %v6299_v16  ;;  %3775 = vmatprep.subr.bf16.mxu1 %v6302_v59 }
 0x5e7   : > { %3733 = vmatpush1.bf16.msra.mxu0 %v6305_v17  ;;  %3776 = vmatpush1.bf16.msra.mxu1 %v6308_v60 }
 0x5e8   : > { %3734 = vmatprep.subr.bf16.mxu0 %v6315_v18  ;;  %3777 = vmatprep.subr.bf16.mxu1 %v6318_v19 }
 0x5eb   : > { %3735 = vmatpush1.bf16.msra.mxu0 %v6321_v20  ;;  %3778 = vmatpush1.bf16.msra.mxu1 %v6324_v21 }
 0x5ec   : > { %3736 = vmatprep.subr.bf16.mxu0 %v6329_v22  ;;  %3779 = vmatprep.subr.bf16.mxu1 %v6332_v23 }
 0x5ef   : > { %3737 = vmatpush1.bf16.msra.mxu0 %v6337_v24  ;;  %3780 = vmatpush1.bf16.msra.mxu1 %v6340_v25 }
 0x5f0   : > { %3738 = vmatprep.subr.bf16.mxu0 %v6345_v26  ;;  %3781 = vmatprep.subr.bf16.mxu1 %v6348_v27 }
 0x5f3   : > { %3739 = vmatpush1.bf16.msra.mxu0 %v6353_v28  ;;  %3782 = vmatpush1.bf16.msra.mxu1 %v6356_v29 }
 0x5f4   : > { %3740 = vmatprep.subr.bf16.mxu0 %v6361_v30  ;;  %3783 = vmatprep.subr.bf16.mxu1 %v6364_v31 }
 0x5f7   : > { %3741 = vmatpush1.bf16.msra.mxu0 %v6369_v32  ;;  %3784 = vmatpush1.bf16.msra.mxu1 %v6372_v33 }
 0x5f8   : > { %4087 = vmatprep.subr.bf16.mxu0 %v6251_v34  ;;  %4130 = vmatprep.subr.bf16.mxu1 %v6254_v35 }
 0x6ac   : > { %v3399_v61 = vpop.f32.mrb[52].mxu0  ;;  %v3442_v1 = vpop.f32.mrb[52].mxu1 }
 0x6ad   : > { %v3451_v37 = vadd.f32 %v3399_v61, %v3165_v3  ;;  %v3453_v38 = vadd.f32 %v3442_v1, %v3167_v36  ;;  %v3401_v42 = vpop.f32.mrb[53].mxu0  ;;  %v3444_v46 = vpop.f32.mrb[53].mxu1 }
 0x6ae   : > { %v3452_v45 = vadd.f32 %v3401_v42, %v3166_v40  ;;  %v3454_v6 = vadd.f32 %v3444_v46, %v3168_v44  ;;  %v3403_v7 = vpop.f32.mrb[54].mxu0  ;;  %v3446_v47 = vpop.f32.mrb[54].mxu1 }
 0x6af   : > { %v4747_v48 = vmul.f32 -1.442695, %v3451_v37  ;;  %v3455_v41 = vadd.f32 %v3403_v7, %v3169_v39  ;;  %v3457_v50 = vadd.f32 %v3446_v47, %v3171_v43  ;;  %v3405_v54 = vpop.f32.mrb[55].mxu0  ;;  %v3448_v51 = vpop.f32.mrb[55].mxu1 }
 0x6b0   : > { %v4749_v56 = vmul.f32 -1.442695, %v3452_v45  ;;  %v3456_v2 = vadd.f32 %v3405_v54, %v3170_v52  ;;  %v3458_v53 = vadd.f32 %v3448_v51, %v3172_v62  ;;  %v4751_v55 = vmul.f32 -1.442695, %v3454_v6 }
 0x6b1   : > { %5402 = vpow2.f32 %v4747_v48  ;;  %v4748_v4 = vmul.f32 -1.442695, %v3455_v41 }
 0x6b2   : > { %5404 = vpow2.f32 %v4749_v56  ;;  %v4750_v5 = vmul.f32 -1.442695, %v3456_v2  ;;  %v4752_v61 = vmul.f32 -1.442695, %v3458_v53 }
 0x6b3   : > { %5406 = vpow2.f32 %v4748_v4 }
 0x6b4   : > { %5408 = vpow2.f32 %v4750_v5 }
 0x6b5   : > { %5410 = vtanh.f32 %v3453_v38 }
 0x6b6   : > { %5412 = vpow2.f32 %v4751_v55 }
 0x6b7   : > { %5414 = vtanh.f32 %v3457_v50 }
 0x6bb   : > { %v5403_v34 = vpop.eup %5402 }
 0x6bc   : > { %v5405_v35 = vpop.eup %5404  ;;  %v3465_v3 = vadd.f32 1.0, %v5403_v34 }
 0x6bd   : > { %v3477_v36 = vadd.f32 1.0, %v5405_v35  ;;  %v5407_v1 = vpop.eup %5406 }
 0x6be   : > { %5416 = vrcp.f32 %v3465_v3  ;;  %v3466_v37 = vadd.f32 1.0, %v5407_v1  ;;  %v5409_v40 = vpop.eup %5408 }
 0x6bf   : > { %5418 = vrcp.f32 %v3477_v36  ;;  %v3478_v42 = vadd.f32 1.0, %v5409_v40  ;;  %v5411_v44 = vpop.eup %5410 }
 0x6c0   : > { %5420 = vpow2.f32 %v4752_v61  ;;  %v5413_v46 = vpop.eup %5412 }
 0x6c1   : > { %5422 = vrcp.f32 %v3466_v37  ;;  %v5415_v45 = vpop.eup %5414  ;;  %v3491_v48 = vadd.f32 1.0, %v5413_v46 }
 0x6c2   : > { %5424 = vrcp.f32 %v3478_v42 }
 0x6c3   : > { %5426 = vrcp.f32 %v3491_v48 }
 0x6c8   : > { %v5417_v6 = vpop.eup %5416 }
 0x6c9   : > { %v5419_v38 = vpop.eup %5418  ;;  %v3499_v39 = vmul.f32 %v5417_v6, %v5411_v44 }
 0x6ca   : > { %v5421_v7 = vpop.eup %5420  ;;  %v3497_v43 = vmul.f32 %v5419_v38, %v6239_v49 }
 0x6cb   : > { %v5423_v47 = vpop.eup %5422  ;;  %v3492_v54 = vadd.f32 1.0, %v5421_v7 }
 0x6cc   : > { %v6386_v41 = vadd.f32 %v3499_v39, %v3497_v43  ;;  %v3500_v50 = vmul.f32 %v5423_v47, %v5415_v45  ;;  %v5425_v52 = vpop.eup %5424 }
 0x6cd   : > { %v3498_v62 = vmul.f32 %v5425_v52, %v6243_v63  ;;  %v5427_v49 = vpop.eup %5426 }
 0x6ce   : > { %5428 = vtanh.f32 %v6386_v41 }
 0x6cf   : > { %v6390_v51 = vadd.f32 %v3500_v50, %v3498_v62  ;;  %5430 = vrcp.f32 %v3492_v54 }
 0x6d1   : > { %5432 = vtanh.f32 %v6390_v51 }
 0x6d8   : > { %v5429_v56 = vpop.eup %5428 }
 0x6d9   : > { %v5431_v2 = vpop.eup %5430  ;;  %v3505_v4 = vmul.f32 %v5429_v56, %v5427_v49 }
 0x6db   : > { %v5433_v53 = vpop.eup %5432 }
 0x6dc   : > { %v3506_v5 = vmul.f32 %v5433_v53, %v5431_v2 }
 0x6de   : > { %v3507_v55 = vpack.c.bf16 %v3506_v5, %v3505_v4 }
 0x6e0   : > { %4902 = vst [vmem:[%s3516_s13] sm:$0xff] %v3507_v55   ;;  %3759 = vmatmul.mubr.bf16.vlgmr.msra.gmra.mrb[56].mxu0 %v3507_v55  ;;  %3802 = vmatmul.mubr.bf16.vlgmr.msra.gmra.mrb[56].mxu1 %v3507_v55  ;;  %v3889_v55 = vld [vmem:[%s3886_s28 + $0x10] sm:$0xff] }
 0x6e1   : > { %4088 = vmatpush1.bf16.msra.mxu0 %v6257_v8  ;;  %4131 = vmatpush1.bf16.msra.mxu1 %v6260_v9  ;;  %v3528_v8 = vld [vmem:[%s3525_s21 + $0x10] sm:$0xff] }
 0x6e2   : > { %4089 = vmatprep.subr.bf16.mxu0 %v6267_v10  ;;  %4132 = vmatprep.subr.bf16.mxu1 %v6270_v11 }
 0x6e3   : > { %4119 = vmatprep.mubr.bf16.mxu0 %v5506_v0  ;;  %4162 = vmatprep.mubr.bf16.mxu1 %v5506_v0  ;;  %v3526_v0 = vld [vmem:[%s3525_s21] sm:$0xff] }
 0x6e5   : > { %4090 = vmatpush1.bf16.msra.mxu0 %v6273_v57  ;;  %4133 = vmatpush1.bf16.msra.mxu1 %v6276_v58  ;;  %v3527_v57 = vld [vmem:[%s3525_s21 + $0x8] sm:$0xff] }
 0x6e6   : > { %4091 = vmatprep.subr.bf16.mxu0 %v6283_v12  ;;  %4134 = vmatprep.subr.bf16.mxu1 %v6286_v13  ;;  %v3529_v12 = vld [vmem:[%s3525_s21 + $0x18] sm:$0xff] }
 0x6e9   : > { %4092 = vmatpush1.bf16.msra.mxu0 %v6289_v14  ;;  %4135 = vmatpush1.bf16.msra.mxu1 %v6292_v15 }
 0x6ea   : > { %4093 = vmatprep.subr.bf16.mxu0 %v6299_v16  ;;  %4136 = vmatprep.subr.bf16.mxu1 %v6302_v59  ;;  %v3530_v16 = vld [vmem:[%s3525_s21 + $0x20] sm:$0xff] }
 0x6ed   : > { %4094 = vmatpush1.bf16.msra.mxu0 %v6305_v17  ;;  %4137 = vmatpush1.bf16.msra.mxu1 %v6308_v60  ;;  %v3532_v17 = vld [vmem:[%s3525_s21 + $0x30] sm:$0xff] }
 0x6ee   : > { %4095 = vmatprep.subr.bf16.mxu0 %v6315_v18  ;;  %4138 = vmatprep.subr.bf16.mxu1 %v6318_v19 }
 0x6f1   : > { %4096 = vmatpush1.bf16.msra.mxu0 %v6321_v20  ;;  %4139 = vmatpush1.bf16.msra.mxu1 %v6324_v21  ;;  %v3531_v21 = vld [vmem:[%s3525_s21 + $0x28] sm:$0xff] }
 0x6f2   : > { %4097 = vmatprep.subr.bf16.mxu0 %v6329_v22  ;;  %4140 = vmatprep.subr.bf16.mxu1 %v6332_v23  ;;  %v3533_v23 = vld [vmem:[%s3525_s21 + $0x38] sm:$0xff] }
 0x6f5   : > { %4098 = vmatpush1.bf16.msra.mxu0 %v6337_v24  ;;  %4141 = vmatpush1.bf16.msra.mxu1 %v6340_v25 }
 0x6f6   : > { %4099 = vmatprep.subr.bf16.mxu0 %v6345_v26  ;;  %4142 = vmatprep.subr.bf16.mxu1 %v6348_v27 }
 0x6f9   : > { %4100 = vmatpush1.bf16.msra.mxu0 %v6353_v28  ;;  %4143 = vmatpush1.bf16.msra.mxu1 %v6356_v29 }
 0x6fa   : > { %4101 = vmatprep.subr.bf16.mxu0 %v6361_v30  ;;  %4144 = vmatprep.subr.bf16.mxu1 %v6364_v31 }
 0x6fd   : > { %4102 = vmatpush1.bf16.msra.mxu0 %v6369_v32  ;;  %4145 = vmatpush1.bf16.msra.mxu1 %v6372_v33 }
 0x7b3   : > { %v3760_v63 = vpop.f32.mrb[56].mxu0  ;;  %v3803_v9 = vpop.f32.mrb[56].mxu1 }
 0x7b4   : > { %v3812_v10 = vadd.f32 %v3760_v63, %v3526_v0  ;;  %v3814_v11 = vadd.f32 %v3803_v9, %v3528_v8  ;;  %v3762_v58 = vpop.f32.mrb[57].mxu0  ;;  %v3805_v13 = vpop.f32.mrb[57].mxu1  ;;  %v3888_v9 = vld [vmem:[%s3886_s28 + $0x8] sm:$0xff] }
 0x7b5   : > { %v3813_v14 = vadd.f32 %v3762_v58, %v3527_v57  ;;  %v3815_v15 = vadd.f32 %v3805_v13, %v3529_v12  ;;  %v3764_v59 = vpop.f32.mrb[58].mxu0  ;;  %v3807_v60 = vpop.f32.mrb[58].mxu1  ;;  %v3891_v13 = vld [vmem:[%s3886_s28 + $0x20] sm:$0xff] }
 0x7b6   : > { %v4791_v18 = vmul.f32 -1.442695, %v3812_v10  ;;  %v3816_v19 = vadd.f32 %v3764_v59, %v3530_v16  ;;  %v3818_v20 = vadd.f32 %v3807_v60, %v3532_v17  ;;  %v3766_v22 = vpop.f32.mrb[59].mxu0  ;;  %v3809_v24 = vpop.f32.mrb[59].mxu1 }
 0x7b7   : > { %v4793_v25 = vmul.f32 -1.442695, %v3813_v14  ;;  %v3817_v26 = vadd.f32 %v3766_v22, %v3531_v21  ;;  %v3819_v27 = vadd.f32 %v3809_v24, %v3533_v23  ;;  %v4795_v30 = vmul.f32 -1.442695, %v3815_v15  ;;  %v3893_v15 = vld [vmem:[%s3886_s28 + $0x30] sm:$0xff] }
 0x7b8   : > { %5434 = vpow2.f32 %v4791_v18  ;;  %v4792_v28 = vmul.f32 -1.442695, %v3816_v19  ;;  %v3892_v18 = vld [vmem:[%s3886_s28 + $0x28] sm:$0xff] }
 0x7b9   : > { %5436 = vpow2.f32 %v4793_v25  ;;  %v4794_v29 = vmul.f32 -1.442695, %v3817_v26  ;;  %v4796_v34 = vmul.f32 -1.442695, %v3819_v27 }
 0x7ba   : > { %5438 = vpow2.f32 %v4792_v28 }
 0x7bb   : > { %5440 = vpow2.f32 %v4794_v29 }
 0x7bc   : > { %5442 = vtanh.f32 %v3814_v11  ;;  %v3890_v11 = vld [vmem:[%s3886_s28 + $0x18] sm:$0xff] }
 0x7bd   : > { %5444 = vpow2.f32 %v4795_v30 }
 0x7be   : > { %5446 = vtanh.f32 %v3818_v20  ;;  %v3894_v20 = vld [vmem:[%s3886_s28 + $0x38] sm:$0xff] }
 0x7c2   : > { %v5435_v31 = vpop.eup %5434 }
 0x7c3   : > { %v5437_v32 = vpop.eup %5436  ;;  %v3826_v33 = vadd.f32 1.0, %v5435_v31 }
 0x7c4   : > { %v3838_v35 = vadd.f32 1.0, %v5437_v32  ;;  %v5439_v3 = vpop.eup %5438 }
 0x7c5   : > { %5448 = vrcp.f32 %v3826_v33  ;;  %v3827_v61 = vadd.f32 1.0, %v5439_v3  ;;  %v5441_v36 = vpop.eup %5440 }
 0x7c6   : > { %5450 = vrcp.f32 %v3838_v35  ;;  %v3839_v1 = vadd.f32 1.0, %v5441_v36  ;;  %v5443_v37 = vpop.eup %5442 }
 0x7c7   : > { %5452 = vpow2.f32 %v4796_v34  ;;  %v5445_v40 = vpop.eup %5444 }
 0x7c8   : > { %5454 = vrcp.f32 %v3827_v61  ;;  %v5447_v42 = vpop.eup %5446  ;;  %v3852_v7 = vadd.f32 1.0, %v5445_v40 }
 0x7c9   : > { %5456 = vrcp.f32 %v3839_v1 }
 0x7ca   : > { %5458 = vrcp.f32 %v3852_v7 }
 0x7cf   : > { %v5449_v44 = vpop.eup %5448 }
 0x7d0   : > { %v5451_v46 = vpop.eup %5450  ;;  %v3860_v45 = vmul.f32 %v5449_v44, %v5443_v37 }
 0x7d1   : > { %v5453_v6 = vpop.eup %5452  ;;  %v3858_v38 = vmul.f32 %v5451_v46, %v6386_v41 }
 0x7d2   : > { %v5455_v39 = vpop.eup %5454  ;;  %v3853_v50 = vadd.f32 1.0, %v5453_v6 }
 0x7d3   : > { %v6433_v43 = vadd.f32 %v3860_v45, %v3858_v38  ;;  %v3861_v47 = vmul.f32 %v5455_v39, %v5447_v42  ;;  %v5457_v48 = vpop.eup %5456 }
 0x7d4   : > { %v3859_v52 = vmul.f32 %v5457_v48, %v6390_v51  ;;  %v5459_v41 = vpop.eup %5458  ;;  %v3887_v51 = vld [vmem:[%s3886_s28] sm:$0xff] }
 0x7d5   : > { %5460 = vtanh.f32 %v6433_v43 }
 0x7d6   : > { %v6437_v54 = vadd.f32 %v3861_v47, %v3859_v52  ;;  %5462 = vrcp.f32 %v3853_v50 }
 0x7d8   : > { %5464 = vtanh.f32 %v6437_v54 }
 0x7df   : > { %v5461_v62 = vpop.eup %5460 }
 0x7e0   : > { %v5463_v49 = vpop.eup %5462  ;;  %v3866_v2 = vmul.f32 %v5461_v62, %v5459_v41 }
 0x7e2   : > { %v5465_v56 = vpop.eup %5464 }
 0x7e3   : > { %v3867_v53 = vmul.f32 %v5465_v56, %v5463_v49 }
 0x7e5   : > { %v3868_v4 = vpack.c.bf16 %v3867_v53, %v3866_v2 }
 0x7e7   : > { %4907 = vst [vmem:[%s3877_s23] sm:$0xff] %v3868_v4   ;;  %4120 = vmatmul.mubr.bf16.vlgmr.msra.gmra.mrb[60].mxu0 %v3868_v4  ;;  %4163 = vmatmul.mubr.bf16.vlgmr.msra.gmra.mrb[60].mxu1 %v3868_v4 }
 0x8ba   : > { %v4121_v5 = vpop.f32.mrb[60].mxu0  ;;  %v4164_v0 = vpop.f32.mrb[60].mxu1 }
 0x8bb   : > { %v4173_v63 = vadd.f32 %v4121_v5, %v3887_v51  ;;  %v4175_v8 = vadd.f32 %v4164_v0, %v3889_v55  ;;  %v4123_v10 = vpop.f32.mrb[61].mxu0  ;;  %v4166_v57 = vpop.f32.mrb[61].mxu1 }
 0x8bc   : > { %v4174_v58 = vadd.f32 %v4123_v10, %v3888_v9  ;;  %v4176_v12 = vadd.f32 %v4166_v57, %v3890_v11  ;;  %v4125_v14 = vpop.f32.mrb[62].mxu0  ;;  %v4168_v16 = vpop.f32.mrb[62].mxu1 }
 0x8bd   : > { %v4835_v59 = vmul.f32 -1.442695, %v4173_v63  ;;  %v4177_v17 = vadd.f32 %v4125_v14, %v3891_v13  ;;  %v4179_v60 = vadd.f32 %v4168_v16, %v3893_v15  ;;  %v4127_v19 = vpop.f32.mrb[63].mxu0  ;;  %v4170_v21 = vpop.f32.mrb[63].mxu1 }
 0x8be   : > { %v4837_v22 = vmul.f32 -1.442695, %v4174_v58  ;;  %v4178_v23 = vadd.f32 %v4127_v19, %v3892_v18  ;;  %v4180_v24 = vadd.f32 %v4170_v21, %v3894_v20  ;;  %v4839_v27 = vmul.f32 -1.442695, %v4176_v12 }
 0x8bf   : > { %5466 = vpow2.f32 %v4835_v59  ;;  %v4836_v25 = vmul.f32 -1.442695, %v4177_v17 }
 0x8c0   : > { %5468 = vpow2.f32 %v4837_v22  ;;  %v4838_v26 = vmul.f32 -1.442695, %v4178_v23  ;;  %v4840_v31 = vmul.f32 -1.442695, %v4180_v24 }
 0x8c1   : > { %5470 = vpow2.f32 %v4836_v25 }
 0x8c2   : > { %5472 = vpow2.f32 %v4838_v26 }
 0x8c3   : > { %5474 = vtanh.f32 %v4175_v8 }
 0x8c4   : > { %5476 = vpow2.f32 %v4839_v27 }
 0x8c5   : > { %5478 = vtanh.f32 %v4179_v60 }
 0x8c9   : > { %v5467_v28 = vpop.eup %5466 }
 0x8ca   : > { %v5469_v29 = vpop.eup %5468  ;;  %v4187_v30 = vadd.f32 1.0, %v5467_v28 }
 0x8cb   : > { %v4199_v32 = vadd.f32 1.0, %v5469_v29  ;;  %v5471_v33 = vpop.eup %5470 }
 0x8cc   : > { %5480 = vrcp.f32 %v4187_v30  ;;  %v4188_v34 = vadd.f32 1.0, %v5471_v33  ;;  %v5473_v35 = vpop.eup %5472 }
 0x8cd   : > { %5482 = vrcp.f32 %v4199_v32  ;;  %v4200_v3 = vadd.f32 1.0, %v5473_v35  ;;  %v5475_v61 = vpop.eup %5474 }
 0x8ce   : > { %5484 = vpow2.f32 %v4840_v31  ;;  %v5477_v36 = vpop.eup %5476 }
 0x8cf   : > { %5486 = vrcp.f32 %v4188_v34  ;;  %v5479_v1 = vpop.eup %5478  ;;  %v4213_v44 = vadd.f32 1.0, %v5477_v36 }
 0x8d0   : > { %5488 = vrcp.f32 %v4200_v3 }
 0x8d1   : > { %5490 = vrcp.f32 %v4213_v44 }
 0x8d6   : > { %v5481_v37 = vpop.eup %5480 }
 0x8d7   : > { %v5483_v40 = vpop.eup %5482  ;;  %v4221_v42 = vmul.f32 %v5481_v37, %v5475_v61 }
 0x8d8   : > { %v5485_v46 = vpop.eup %5484  ;;  %v4219_v45 = vmul.f32 %v5483_v40, %v6433_v43 }
 0x8d9   : > { %v5487_v6 = vpop.eup %5486  ;;  %v4214_v47 = vadd.f32 1.0, %v5485_v46 }
 0x8da   : > { %v4223_v38 = vadd.f32 %v4221_v42, %v4219_v45  ;;  %v4222_v39 = vmul.f32 %v5487_v6, %v5479_v1  ;;  %v5489_v7 = vpop.eup %5488 }
 0x8db   : > { %v4220_v48 = vmul.f32 %v5489_v7, %v6437_v54  ;;  %v5491_v52 = vpop.eup %5490 }
 0x8dc   : > { %5492 = vtanh.f32 %v4223_v38 }
 0x8dd   : > { %v4224_v50 = vadd.f32 %v4222_v39, %v4220_v48  ;;  %5494 = vrcp.f32 %v4214_v47 }
 0x8df   : > { %5496 = vtanh.f32 %v4224_v50 }
 0x8e6   : > { %v5493_v41 = vpop.eup %5492 }
 0x8e7   : > { %v4227_v62 = vmul.f32 %v5493_v41, %v5491_v52  ;;  %v5495_v49 = vpop.eup %5494 }
 0x8e9   : > { %v5497_v43 = vpop.eup %5496 }
 0x8ea   : > { %v4228_v56 = vmul.f32 %v5497_v43, %v5495_v49 }
 0x8ec   : > { %v4911_v2 = vpack.c.bf16 %v4228_v56, %v4227_v62 }
 0x8ee   : > { %4912 = vst [vmem:[%s4238_s30] sm:$0xff] %v4911_v2  }
 0x8ef PF: > { %s14_s15 = sadd.s32 1, %s5504_s15  }
 0x8f0   : > { %p11_p5 = scmp.ge.s32.totalorder %s14_s15, 4  }
 0x8f2   :  { %13 = sbr.rel (!%p11_p5) target bundleno = 1 (0x1), region = 90 }

// kernel: sentence_classifier_forward.2
= control target key start
LH: loop header
LB: loop body
LE: loop exit
PB: predicated region body
PF: predicated region fallthrough
CT: control target
= control target key end

     0   :  { %9 = vsyncpa [#allocation4], 0  ;;  %s6043_s0 = inlined_call_operand.vmem [shape: bf16[1,128,128], index: 0, kind: input, shape index: {}]   ;;  %s6044_s1 = inlined_call_operand.hbm [shape: bf16[2,1,128,512], index: 1, kind: input, shape index: {}]   ;;  %s6045_s2 = inlined_call_operand.hbm [shape: bf16[2,128,512], index: 2, kind: input, shape index: {}]   ;;  %s6046_s3 = inlined_call_operand.vmem [shape: f32[2,1,512], index: 3, kind: input, shape index: {}]   ;;  %s6047_s4 = inlined_call_operand.vmem [shape: bf16[2,128,128], index: 4, kind: output, shape index: {}]  }
   0x1   :  { %11 = vsyncpa [#allocation4 + $0x1], 0 }
   0x2   :  { %12 = vsyncpa [#allocation6], 0 }
   0x3   :  { %14 = vsyncpa [#allocation6 + $0x1], 0  ;;  %s4976_s15 = smov 0   ;;  %s4978_s16 = smov 0  }
   0x4   :  { %s4980_s17 = smov 0   ;;  %s4982_s18 = smov 0  }
   0x5 LB: > { %s4995_s19 = sadd.s32 4294967295, %s4944_s18   ;;  %s4998_s20 = sadd.s32 1, %s4944_s18   ;;  %s4944_s18 = sphi %s4982_s18, %s6066_s18   ;;  %s4940_s17 = sphi %s4980_s17, %s6065_s17   ;;  %s4936_s16 = sphi %s4978_s16, %s6064_s16   ;;  %s4932_s15 = sphi %s4976_s15, %s6063_s15  }
   0x6   : > { %s45_s21 = ssub.s32 %s4944_s18, %s4998_s20  ;;  %s48_s22 = sadd.s32 1, %s4940_s17 }
   0x7   : > { %p46_p0 = scmp.eq.s32.totalorder %s45_s21, 0  ;;  %p55_p1 = scmp.ne.s32.totalorder %s4940_s17, %s4936_s16 }
   0x8   : > { %p56_p2 = scmp.eq.s32.totalorder %s4944_s18, 0  ;;  %p61_p3 = scmp.ne.s32.totalorder %s4936_s16, %s4932_s15 }
   0x9   : > { %s5008_s23 = scalar_select %p46_p0, %s4940_s17, %s48_s22  }
   0xa   : > { %p57_p4 = por %p56_p2, %p55_p1  ;;  %p6048_p5 = scmp.eq.s32.totalorder %s4995_s19, 0 }
   0xb   : > { %p4354_p6 = scmp.lt.s32.totalorder %s4944_s18, 2  ;;  %s5019_s25 = sand.u32 1, %s4940_s17  }
   0xc   : > { %p5014_p7 = por %p6048_p5, %p61_p3  ;;  %s3870_s26 = sshll.u32 %s5019_s25, 8 }
   0xd   : > { %s4276_s27 = sshll.u32 %s4944_s18, 12  ;;  %s170_s5 = scalar_lea.vmem [#allocation3], %s3870_s26 }
   0xe   : > { %s6050_s24 = scalar_select %p5014_p7, 1, 0 }
   0xf   : > { %s5028_s30 = scalar_lea.hbm %s6044_s1, %s4276_s27  ;;  %s177_s6 = sshll.u32 %s170_s5, 4  ;;  %s5032_s6 = int_to_ptr.vmem [resolvable:$true] %s177_s6 }
  0x10   : > { %p5034_p8 = pnand %p4354_p6, %p57_p4  ;;  %s167_s8 = scalar_lea.sflag [#allocation4], %s5019_s25 }
  0x11   : > { %s4846_s9 = scalar_lea.hbm %s5028_s30, 4096  ;;  %s4851_s12 = scalar_lea.hbm %s6044_s1, 8192 }
  0x12   : > { %p4847_p10 = scmp.ne.s32.totalorder %s5028_s30, %s4846_s9  ;;  %p4848_p11 = pneg %p5034_p8 }
  0x13   : > { %p4852_p0 = scmp.lt.u32.totalorder %s5028_s30, %s6044_s1  ;;  %p4853_p1 = scmp.lt.u32.totalorder %s4851_s12, %s4846_s9 }
  0x14   : > { %p4849_p12 = pnand %p4848_p11, %p4847_p10  ;;  %p4855_p3 = scmp.lt.u32.totalorder %s4846_s9, %s5028_s30 }
  0x15   : > { %p4854_p2 = por %p4853_p1, %p4852_p0 }
  0x16   : > { %p4850_p13 = pneg %p4849_p12 }
  0x17   : > { %p4856_p4 = por %p4855_p3, %p4854_p2 }
  0x19   : > { %p4857_p6 = pnand %p4856_p4, %p4850_p13 }
  0x1b   : > { %4860 = shalt.err (!%p4857_p6)
}
  0x1c   : > { %s4861_s15 = scalar_lea.vmem %s5032_s6, 4096  ;;  %s4946_s21 = smov [#allocation3]  }
  0x1d   : > { %p4862_p10 = scmp.ne.s32.totalorder %s5032_s6, %s4861_s15  ;;  %s4866_s22 = sshll.u32 %s4946_s21, 4  ;;  %s4867_s22 = int_to_ptr.vmem [resolvable:$false] %s4866_s22 }
  0x1e   : > { %s4868_s28 = scalar_lea.vmem %s4867_s22, 8192  ;;  %p4869_p9 = scmp.lt.s32.totalorder %s5032_s6, %s4867_s22 }
  0x1f   : > { %p4864_p12 = pnand %p4862_p10, %p4848_p11  ;;  %p4870_p0 = scmp.lt.s32.totalorder %s4868_s28, %s4861_s15 }
  0x21   : > { %p4865_p5 = pneg %p4864_p12  ;;  %p4871_p1 = por %p4870_p0, %p4869_p9 }
  0x23   : > { %p4872_p2 = pnand %p4871_p1, %p4865_p5 }
  0x25   : > { %4875 = shalt.err (!%p4872_p2)
}
  0x26   : > { %s4947_s29 = smov 256   ;;  %s4948_s5 = smov 16  }
  0x27   : > { %4350 = dma.hbm_to_vmem [thread:$0]  (!%p5034_p8), %s5028_s30, 4096, %s5032_s6, %s167_s8, %s4947_s29, %s4947_s29, %s4948_s5  }
  0x28   : > { %p213_p5 = scmp.lt.s32.totalorder %s4944_s18, 3  ;;  %s5076_s11 = scalar_lea.hbm %s6045_s2, %s4276_s27 }
  0x29   : > { %p6052_p9 = scmp.ge.s32.totalorder %s4944_s18, 1  ;;  %s191_s13 = scalar_lea.vmem [#allocation5], %s3870_s26 }
  0x2a   : > { %s198_s14 = sshll.u32 %s191_s13, 4  ;;  %s188_s30 = scalar_lea.sflag [#allocation6], %s5019_s25  ;;  %s5086_s14 = int_to_ptr.vmem [resolvable:$true] %s198_s14 }
  0x2b   : > { %p5080_p13 = pnand %p6052_p9, %p213_p5  ;;  %s4876_s6 = scalar_lea.hbm %s5076_s11, 4096 }
  0x2c   : > { %p4877_p3 = scmp.ne.s32.totalorder %s5076_s11, %s4876_s6  ;;  %s4881_s8 = scalar_lea.hbm %s6045_s2, 8192 }
  0x2d   : > { %p4882_p10 = scmp.lt.u32.totalorder %s5076_s11, %s6045_s2  ;;  %p4883_p12 = scmp.lt.u32.totalorder %s4881_s8, %s4876_s6 }
  0x2e   : > { %p4879_p4 = pnand %p4877_p3, %p4848_p11  ;;  %p4885_p1 = scmp.lt.u32.totalorder %s4876_s6, %s5076_s11 }
  0x2f   : > { %p4884_p0 = por %p4883_p12, %p4882_p10 }
  0x30   : > { %p4880_p6 = pneg %p4879_p4 }
  0x31   : > { %p4886_p2 = por %p4885_p1, %p4884_p0 }
  0x33   : > { %p4887_p5 = pnand %p4886_p2, %p4880_p6 }
  0x35   : > { %4890 = shalt.err (!%p4887_p5)
}
  0x36   : > { %s4891_s26 = scalar_lea.vmem %s5086_s14, 4096  ;;  %s4949_s22 = smov [#allocation5]  }
  0x37   : > { %p4892_p9 = scmp.ne.s32.totalorder %s5086_s14, %s4891_s26  ;;  %s4896_s28 = sshll.u32 %s4949_s22, 4  ;;  %s4897_s28 = int_to_ptr.vmem [resolvable:$false] %s4896_s28 }
  0x38   : > { %s4898_s9 = scalar_lea.vmem %s4897_s28, 8192  ;;  %p4899_p7 = scmp.lt.s32.totalorder %s5086_s14, %s4897_s28 }
  0x39   : > { %p4894_p3 = pnand %p4892_p9, %p4848_p11  ;;  %p4900_p10 = scmp.lt.s32.totalorder %s4898_s9, %s4891_s26 }
  0x3b   : > { %p4895_p4 = pneg %p4894_p3  ;;  %p4901_p12 = por %p4900_p10, %p4899_p7 }
  0x3d   : > { %p4902_p0 = pnand %p4901_p12, %p4895_p4 }
  0x3f   : > { %4905 = shalt.err (!%p4902_p0)
}
  0x40   : > { %4353 = dma.hbm_to_vmem [thread:$0]  (!%p5034_p8), %s5076_s11, 4096, %s5086_s14, %s188_s30, %s4947_s29, %s4947_s29, %s4948_s5  }
  0x41   : > { %217 = sbr.rel (%p5080_p13) target bundleno = 2282 (0x8ea), region = 36  ;;  %s219_s10 = sand.u32 (!%p5080_p13), 1, %s4936_s16  }
  0x42   : > { %s3877_s13 = sshll.u32 (!%p5080_p13), %s219_s10, 8  ;;  %s220_s6 = scalar_lea.sflag (!%p5080_p13), [#allocation4], %s219_s10 }
  0x43   : > { %s5120_s18 = scalar_lea.vmem (!%p5080_p13), [#allocation3], %s3877_s13  ;;  %p6054_p7 = scmp.ne.s32.totalorder (!%p5080_p13), %s6050_s24, 0 }
  0x48   : > { %4923 = dma.done.wait (%p6054_p7), %s220_s6, 4096  }
  0x49   : > { %4925 = vsyncadd (%p6054_p7), %s220_s6, 4294963200  ;;  %s229_s25 = scalar_lea.sflag [#allocation6], %s219_s10  ;;  %s5126_s7 = scalar_lea.vmem [#allocation5], %s3877_s13 }
  0x4a   : > { %4927 = dma.done.wait (%p6054_p7), %s229_s25, 4096  }
  0x4b   : > { %4929 = vsyncadd (%p6054_p7), %s229_s25, 4294963200  ;;  %v4950_v0 = vmov 0   ;;  %v4390_v1 = vld [vmem:[%s5120_s18 + $0x4] ss:$16 sps:$4 sm:$0xff]   ;;  %v4392_v2 = vld [vmem:[%s5120_s18 + $0xc] ss:$16 sps:$4 sm:$0xff]  }
  0x4c   : > { %586 = vmatprep.mubr.bf16.mxu0 %v4950_v0  ;;  %699 = vmatprep.mubr.bf16.mxu1 %v4950_v0  ;;  %v4394_v3 = vld [vmem:[%s5120_s18] ss:$16 sps:$4 sm:$0xff]   ;;  %v4395_v4 = vld [vmem:[%s5120_s18 + $0x8] ss:$16 sps:$4 sm:$0xff]   ;;  %v4396_v5 = vld [vmem:[%s5120_s18 + $0x24] ss:$16 sps:$4 sm:$0xff]  }
  0x4d   : > { %554 = vmatprep.subr.bf16.mxu0 %v4390_v1  ;;  %667 = vmatprep.subr.bf16.mxu1 %v4392_v2  ;;  %v4398_v6 = vld [vmem:[%s5120_s18 + $0x2c] ss:$16 sps:$4 sm:$0xff]   ;;  %v4400_v7 = vld [vmem:[%s5120_s18 + $0x20] ss:$16 sps:$4 sm:$0xff]   ;;  %v4401_v8 = vld [vmem:[%s5120_s18 + $0x28] ss:$16 sps:$4 sm:$0xff]  }
  0x4e   : > { %555 = vmatpush1.bf16.msra.mxu0 %v4394_v3  ;;  %668 = vmatpush1.bf16.msra.mxu1 %v4395_v4  ;;  %v4402_v9 = vld [vmem:[%s5120_s18 + $0x44] ss:$16 sps:$4 sm:$0xff]   ;;  %v4404_v10 = vld [vmem:[%s5120_s18 + $0x4c] ss:$16 sps:$4 sm:$0xff]   ;;  %v4406_v11 = vld [vmem:[%s5120_s18 + $0x40] ss:$16 sps:$4 sm:$0xff]  }
  0x4f   : > { %556 = vmatprep.subr.bf16.mxu0 %v4396_v5  ;;  %669 = vmatprep.subr.bf16.mxu1 %v4398_v6  ;;  %v4407_v12 = vld [vmem:[%s5120_s18 + $0x48] ss:$16 sps:$4 sm:$0xff]   ;;  %v4408_v13 = vld [vmem:[%s5120_s18 + $0x64] ss:$16 sps:$4 sm:$0xff]   ;;  %v4410_v14 = vld [vmem:[%s5120_s18 + $0x6c] ss:$16 sps:$4 sm:$0xff]  }
  0x50   : > { %v4412_v15 = vld [vmem:[%s5120_s18 + $0x60] ss:$16 sps:$4 sm:$0xff]   ;;  %v4413_v16 = vld [vmem:[%s5120_s18 + $0x68] ss:$16 sps:$4 sm:$0xff]   ;;  %v4414_v17 = vld [vmem:[%s5120_s18 + $0x84] ss:$16 sps:$4 sm:$0xff]  }
  0x51   : > { %v4416_v18 = vld [vmem:[%s5120_s18 + $0x8c] ss:$16 sps:$4 sm:$0xff]   ;;  %v4418_v19 = vld [vmem:[%s5120_s18 + $0x80] ss:$16 sps:$4 sm:$0xff]   ;;  %v4419_v20 = vld [vmem:[%s5120_s18 + $0x88] ss:$16 sps:$4 sm:$0xff]  }
  0x52   : > { %557 = vmatpush1.bf16.msra.mxu0 %v4400_v7  ;;  %670 = vmatpush1.bf16.msra.mxu1 %v4401_v8  ;;  %v4420_v21 = vld [vmem:[%s5120_s18 + $0xa4] ss:$16 sps:$4 sm:$0xff]   ;;  %v4422_v22 = vld [vmem:[%s5120_s18 + $0xac] ss:$16 sps:$4 sm:$0xff]   ;;  %v4424_v23 = vld [vmem:[%s5120_s18 + $0xa0] ss:$16 sps:$4 sm:$0xff]  }
  0x53   : > { %558 = vmatprep.subr.bf16.mxu0 %v4402_v9  ;;  %671 = vmatprep.subr.bf16.mxu1 %v4404_v10  ;;  %v4425_v24 = vld [vmem:[%s5120_s18 + $0xa8] ss:$16 sps:$4 sm:$0xff]   ;;  %v4426_v25 = vld [vmem:[%s5120_s18 + $0xc4] ss:$16 sps:$4 sm:$0xff]   ;;  %v4428_v26 = vld [vmem:[%s5120_s18 + $0xcc] ss:$16 sps:$4 sm:$0xff]   ;;  %v326_v10 = vlaneseq }
  0x54   : > { %v4430_v27 = vld [vmem:[%s5120_s18 + $0xc0] ss:$16 sps:$4 sm:$0xff]   ;;  %v4431_v28 = vld [vmem:[%s5120_s18 + $0xc8] ss:$16 sps:$4 sm:$0xff]   ;;  %v4432_v29 = vld [vmem:[%s5120_s18 + $0xe4] ss:$16 sps:$4 sm:$0xff]  }
  0x55   : > { %v4434_v30 = vld [vmem:[%s5120_s18 + $0xec] ss:$16 sps:$4 sm:$0xff]   ;;  %v4436_v31 = vld [vmem:[%s5120_s18 + $0xe0] ss:$16 sps:$4 sm:$0xff]   ;;  %v4437_v32 = vld [vmem:[%s5120_s18 + $0xe8] ss:$16 sps:$4 sm:$0xff]  }
  0x56   : > { %559 = vmatpush1.bf16.msra.mxu0 %v4406_v11  ;;  %672 = vmatpush1.bf16.msra.mxu1 %v4407_v12  ;;  %v5167_v33 = vld [vmem:[%s5126_s7 + $0x4] ss:$16 sps:$4 sm:$0xff]   ;;  %v5170_v34 = vld [vmem:[%s5126_s7 + $0xc] ss:$16 sps:$4 sm:$0xff]   ;;  %v5176_v36 = vld [vmem:[%s5126_s7] ss:$16 sps:$4 sm:$0xff]  }
  0x57   : > { %560 = vmatprep.subr.bf16.mxu0 %v4408_v13  ;;  %673 = vmatprep.subr.bf16.mxu1 %v4410_v14  ;;  %v4438_v35 = vld [vmem:[%s6043_s0] sm:$0xff]   ;;  %v5184_v38 = vld [vmem:[%s5126_s7 + $0x8] ss:$16 sps:$4 sm:$0xff]   ;;  %v5187_v39 = vld [vmem:[%s5126_s7 + $0x2c] ss:$16 sps:$4 sm:$0xff]   ;;  %p266_p8 = scmp.lt.s32.totalorder %s4995_s19, 1 }
  0x58   : > { %v5180_v37 = vld [vmem:[%s5126_s7 + $0x24] ss:$16 sps:$4 sm:$0xff]   ;;  %v5192_v40 = vld [vmem:[%s5126_s7 + $0x20] ss:$16 sps:$4 sm:$0xff]   ;;  %v5201_v42 = vld [vmem:[%s5126_s7 + $0x28] ss:$16 sps:$4 sm:$0xff]  }
  0x59   : > { %v5197_v41 = vld [vmem:[%s5126_s7 + $0x44] ss:$16 sps:$4 sm:$0xff]   ;;  %v4442_v43 = vld [vmem:[%s6043_s0 + $0x8] sm:$0xff]   ;;  %v5209_v44 = vld [vmem:[%s5126_s7 + $0x40] ss:$16 sps:$4 sm:$0xff]   ;;  %s5368_s13 = scalar_select %p266_p8, %s4995_s19, 1 }
  0x5a   : > { %561 = vmatpush1.bf16.msra.mxu0 %v4412_v15  ;;  %674 = vmatpush1.bf16.msra.mxu1 %v4413_v16  ;;  %v5213_v45 = vld [vmem:[%s5126_s7 + $0x4c] ss:$16 sps:$4 sm:$0xff]   ;;  %v5216_v46 = vld [vmem:[%s5126_s7 + $0x64] ss:$16 sps:$4 sm:$0xff]   ;;  %v5220_v47 = vld [vmem:[%s5126_s7 + $0x48] ss:$16 sps:$4 sm:$0xff]  }
  0x5b   : > { %562 = vmatprep.subr.bf16.mxu0 %v4414_v17  ;;  %675 = vmatprep.subr.bf16.mxu1 %v4416_v18  ;;  %v5223_v48 = vld [vmem:[%s5126_s7 + $0x6c] ss:$16 sps:$4 sm:$0xff]   ;;  %v5229_v49 = vld [vmem:[%s5126_s7 + $0x60] ss:$16 sps:$4 sm:$0xff]   ;;  %v5233_v50 = vld [vmem:[%s5126_s7 + $0x84] ss:$16 sps:$4 sm:$0xff]  }
  0x5c   : > { %v5238_v51 = vld [vmem:[%s5126_s7 + $0x68] ss:$16 sps:$4 sm:$0xff]   ;;  %v4446_v52 = vld [vmem:[%s6043_s0 + $0x10] sm:$0xff]   ;;  %v5249_v54 = vld [vmem:[%s5126_s7 + $0x8c] ss:$16 sps:$4 sm:$0xff]   ;;  %s3879_s6 = sshll.u32 %s5368_s13, 2 }
  0x5d   : > { %v5245_v53 = vld [vmem:[%s5126_s7 + $0x80] ss:$16 sps:$4 sm:$0xff]   ;;  %v5253_v55 = vld [vmem:[%s5126_s7 + $0xa4] ss:$16 sps:$4 sm:$0xff]   ;;  %v5257_v56 = vld [vmem:[%s5126_s7 + $0x88] ss:$16 sps:$4 sm:$0xff]   ;;  %s269_s24 = scalar_lea.vmem %s6046_s3, %s3879_s6 }
  0x5e   : > { %563 = vmatpush1.bf16.msra.mxu0 %v4418_v19  ;;  %676 = vmatpush1.bf16.msra.mxu1 %v4419_v20  ;;  %v5260_v57 = vld [vmem:[%s5126_s7 + $0xac] ss:$16 sps:$4 sm:$0xff]   ;;  %v5263_v58 = vld [vmem:[%s5126_s7 + $0xa0] ss:$16 sps:$4 sm:$0xff]   ;;  %v5268_v59 = vld [vmem:[%s5126_s7 + $0xc4] ss:$16 sps:$4 sm:$0xff]  }
  0x5f   : > { %564 = vmatprep.subr.bf16.mxu0 %v4420_v21  ;;  %677 = vmatprep.subr.bf16.mxu1 %v4422_v22  ;;  %v5271_v60 = vld [vmem:[%s5126_s7 + $0xa8] ss:$16 sps:$4 sm:$0xff]   ;;  %v5281_v62 = vld [vmem:[%s5126_s7 + $0xc0] ss:$16 sps:$4 sm:$0xff]   ;;  %v5285_v63 = vld [vmem:[%s5126_s7 + $0xcc] ss:$16 sps:$4 sm:$0xff]  }
  0x60   : > { %v4453_v61 = vld [vmem:[%s6043_s0 + $0x18] sm:$0xff]   ;;  %v5288_v1 = vld [vmem:[%s5126_s7 + $0xe4] ss:$16 sps:$4 sm:$0xff]   ;;  %v5300_v4 = vld [vmem:[%s5126_s7 + $0xe0] ss:$16 sps:$4 sm:$0xff]   ;;  %v327_v11 = vshrl.u32 %v326_v10, 7 }
  0x61   : > { %v5291_v2 = vld [vmem:[%s5126_s7 + $0xc8] ss:$16 sps:$4 sm:$0xff]   ;;  %v5295_v3 = vld [vmem:[%s5126_s7 + $0xec] ss:$16 sps:$4 sm:$0xff]   ;;  %v4460_v6 = vld [vmem:[%s6043_s0 + $0x20] sm:$0xff]   ;;  %p6055_p11 = scmp.eq.s32.totalorder %s4995_s19, 0 }
  0x62   : > { %565 = vmatpush1.bf16.msra.mxu0 %v4424_v23  ;;  %678 = vmatpush1.bf16.msra.mxu1 %v4425_v24  ;;  %v4491_v5 = vld [vmem:[%s5126_s7 + $0xe8] ss:$16 sps:$4 sm:$0xff]   ;;  %v4474_v8 = vld [vmem:[%s6043_s0 + $0x30] sm:$0xff]   ;;  %v328_v12 = vsub.s32 0, %v327_v11  ;;  %v336_v13 = vsub.s32 2, %v327_v11  ;;  %v332_v15 = vsub.s32 1, %v327_v11 }
  0x63   : > { %566 = vmatprep.subr.bf16.mxu0 %v4426_v25  ;;  %679 = vmatprep.subr.bf16.mxu1 %v4428_v26  ;;  %v4467_v7 = vld [vmem:[%s6043_s0 + $0x28] sm:$0xff]   ;;  %v4484_v9 = vld [vmem:[%s6043_s0 + $0x38] sm:$0xff]   ;;  %v324_v14 = vld [vmem:[%s269_s24] sm:$0xf]  ;;  %v340_v16 = vsub.s32 3, %v327_v11  ;;  %s4278_s30 = sshll.u32 %s5368_s13, 6  ;;  %p6056_p13 = pmov %p6055_p11 }
  0x64   : > { %v5374_v17 = vrot.slane %v324_v14, %v328_v12  ;;  %v5376_v18 = vrot.slane %v324_v14, %v336_v13  ;;  %v5378_v19 = vrot.slane %v324_v14, %v332_v15  ;;  %s845_s29 = scalar_select %p6055_p11, 0, 7 }
  0x65   : > { %v5380_v20 = vrot.slane %v324_v14, %v340_v16  ;;  %s5461_s15 = scalar_lea.vmem %s6047_s4, %s4278_s30  ;;  %p6057_p6 = pmov %p6055_p11 }
  0x66   : > { %567 = vmatpush1.bf16.msra.mxu0 %v4430_v27  ;;  %680 = vmatpush1.bf16.msra.mxu1 %v4431_v28  ;;  %s3922_s5 = sshll.u32 %s845_s29, 4 }
  0x67   : > { %568 = vmatprep.subr.bf16.mxu0 %v4432_v29  ;;  %681 = vmatprep.subr.bf16.mxu1 %v4434_v30  ;;  %s5442_s11 = sshra.s32 %s3922_s5, 3  ;;  %p6058_p1 = pmov %p6057_p6 }
  0x68   : > { %s4279_s12 = sshll.u32 %s5442_s11, 5  ;;  %s3965_s21 = sshll.u32 %s5442_s11, 2 }
  0x69   : > { %s851_s14 = scalar_lea.vmem [#allocation2], %s4279_s12  ;;  %s1203_s26 = scalar_lea.vmem %s5461_s15, %s3965_s21 }
  0x6a   : > { %569 = vmatpush1.bf16.msra.mxu0 %v4436_v31  ;;  %682 = vmatpush1.bf16.msra.mxu1 %v4437_v32  ;;  %s1206_s22 = scalar_select %p6056_p13, 1, 6 }
  0x6b   : > { %1052 = vmatprep.subr.bf16.mxu0 %v5167_v33  ;;  %1095 = vmatprep.subr.bf16.mxu1 %v5170_v34  ;;  %s1567_s25 = scalar_select %p6057_p6, 2, 5 }
  0x6c   : > { %s3966_s28 = sshll.u32 %s1206_s22, 4  ;;  %p6059_p2 = pmov %p6058_p1 }
  0x6d   : > { %587 = vmatmul.mubr.bf16.vlgmr.msra.gmra.mrb[0].mxu0 %v4438_v35  ;;  %700 = vmatmul.mubr.bf16.vlgmr.msra.gmra.mrb[0].mxu1 %v4438_v35  ;;  %s5599_s9 = sshra.s32 %s3966_s28, 3  ;;  %s4010_s24 = sshll.u32 %s1567_s25, 4 }
  0x6e   : > { %1053 = vmatpush1.bf16.msra.mxu0 %v5176_v36  ;;  %596 = vmatprep.mubr.bf16.mxu0 %v4950_v0  ;;  %s4282_s10 = sshll.u32 %s5599_s9, 5  ;;  %s4009_s6 = sshll.u32 %s5599_s9, 2 }
  0x6f   : > { %709 = vmatprep.mubr.bf16.mxu1 %v4950_v0  ;;  %1054 = vmatprep.subr.bf16.mxu0 %v5180_v37  ;;  %s5602_s13 = scalar_lea.vmem [#allocation2], %s4282_s10  ;;  %s1564_s18 = scalar_lea.vmem %s5461_s15, %s4009_s6 }
  0x70   : > { %1096 = vmatpush1.bf16.msra.mxu1 %v5184_v38  ;;  %s5658_s29 = sshra.s32 %s4010_s24, 3  ;;  %p6060_p5 = pmov %p6058_p1 }
  0x71   : > { %1097 = vmatprep.subr.bf16.mxu1 %v5187_v39  ;;  %s4285_s5 = sshll.u32 %s5658_s29, 5  ;;  %s4053_s12 = sshll.u32 %s5658_s29, 2 }
  0x72   : > { %1055 = vmatpush1.bf16.msra.mxu0 %v5192_v40  ;;  %s5661_s11 = scalar_lea.vmem [#allocation2], %s4285_s5  ;;  %p6061_p9 = pmov %p6058_p1 }
  0x73   : > { %1056 = vmatprep.subr.bf16.mxu0 %v5197_v41  ;;  %s1928_s30 = scalar_select %p6058_p1, 3, 4 }
  0x74   : > { %1098 = vmatpush1.bf16.msra.mxu1 %v5201_v42  ;;  %s2289_s9 = scalar_select %p6059_p2, 4, 3 }
  0x75   : > { %597 = vmatmul.mubr.bf16.gmra.mrb[4].mxu0 %v4442_v43  ;;  %710 = vmatmul.mubr.bf16.gmra.mrb[4].mxu1 %v4442_v43  ;;  %s4054_s27 = sshll.u32 %s1928_s30, 4  ;;  %p6062_p3 = pmov %p6058_p1 }
  0x76   : > { %606 = vmatprep.mubr.bf16.mxu0 %v4950_v0  ;;  %719 = vmatprep.mubr.bf16.mxu1 %v4950_v0  ;;  %s5717_s8 = sshra.s32 %s4054_s27, 3  ;;  %s4098_s10 = sshll.u32 %s2289_s9, 4 }
  0x77   : > { %1057 = vmatpush1.bf16.msra.mxu0 %v5209_v44  ;;  %1099 = vmatprep.subr.bf16.mxu1 %v5213_v45  ;;  %s4288_s21 = sshll.u32 %s5717_s8, 5  ;;  %s4097_s22 = sshll.u32 %s5717_s8, 2 }
  0x78   : > { %1058 = vmatprep.subr.bf16.mxu0 %v5216_v46  ;;  %1100 = vmatpush1.bf16.msra.mxu1 %v5220_v47  ;;  %s2286_s28 = scalar_lea.vmem %s5461_s15, %s4097_s22 }
  0x79   : > { %1101 = vmatprep.subr.bf16.mxu1 %v5223_v48  ;;  %s2650_s29 = scalar_select %p6060_p5, 5, 2 }
  0x7a   : > { %s3011_s27 = scalar_select %p6061_p9, 6, 1 }
  0x7b   : > { %1059 = vmatpush1.bf16.msra.mxu0 %v5229_v49  ;;  %s4142_s5 = sshll.u32 %s2650_s29, 4 }
  0x7c   : > { %1060 = vmatprep.subr.bf16.mxu0 %v5233_v50  ;;  %1102 = vmatpush1.bf16.msra.mxu1 %v5238_v51  ;;  %s4186_s8 = sshll.u32 %s3011_s27, 4 }
  0x7d   : > { %607 = vmatmul.mubr.bf16.gmra.mrb[8].mxu0 %v4446_v52  ;;  %720 = vmatmul.mubr.bf16.gmra.mrb[8].mxu1 %v4446_v52 }
  0x7e   : > { %616 = vmatprep.mubr.bf16.mxu0 %v4950_v0  ;;  %729 = vmatprep.mubr.bf16.mxu1 %v4950_v0 }
  0x7f   : > { %1061 = vmatpush1.bf16.msra.mxu0 %v5245_v53  ;;  %1103 = vmatprep.subr.bf16.mxu1 %v5249_v54 }
  0x80   : > { %1062 = vmatprep.subr.bf16.mxu0 %v5253_v55  ;;  %1104 = vmatpush1.bf16.msra.mxu1 %v5257_v56 }
  0x81   : > { %1105 = vmatprep.subr.bf16.mxu1 %v5260_v57 }
  0x83   : > { %1063 = vmatpush1.bf16.msra.mxu0 %v5263_v58 }
  0x84   : > { %1064 = vmatprep.subr.bf16.mxu0 %v5268_v59  ;;  %1106 = vmatpush1.bf16.msra.mxu1 %v5271_v60 }
  0x85   : > { %617 = vmatmul.mubr.bf16.gmra.mrb[12].mxu0 %v4453_v61  ;;  %730 = vmatmul.mubr.bf16.gmra.mrb[12].mxu1 %v4453_v61 }
  0x86   : > { %626 = vmatprep.mubr.bf16.mxu0 %v4950_v0  ;;  %739 = vmatprep.mubr.bf16.mxu1 %v4950_v0 }
  0x87   : > { %1065 = vmatpush1.bf16.msra.mxu0 %v5281_v62  ;;  %1107 = vmatprep.subr.bf16.mxu1 %v5285_v63 }
  0x88   : > { %1066 = vmatprep.subr.bf16.mxu0 %v5288_v1  ;;  %1108 = vmatpush1.bf16.msra.mxu1 %v5291_v2 }
  0x89   : > { %1109 = vmatprep.subr.bf16.mxu1 %v5295_v3 }
  0x8b   : > { %1067 = vmatpush1.bf16.msra.mxu0 %v5300_v4 }
  0x8c   : > { %1110 = vmatpush1.bf16.msra.mxu1 %v4491_v5  ;;  %1413 = vmatprep.subr.bf16.mxu0 %v5167_v33 }
  0x8d   : > { %627 = vmatmul.mubr.bf16.gmra.mrb[16].mxu0 %v4460_v6  ;;  %740 = vmatmul.mubr.bf16.gmra.mrb[16].mxu1 %v4460_v6 }
  0x8e   : > { %636 = vmatprep.mubr.bf16.mxu0 %v4950_v0  ;;  %749 = vmatprep.mubr.bf16.mxu1 %v4950_v0 }
  0x8f   : > { %1456 = vmatprep.subr.bf16.mxu1 %v5170_v34 }
  0x95   : > { %637 = vmatmul.mubr.bf16.gmra.mrb[20].mxu0 %v4467_v7  ;;  %750 = vmatmul.mubr.bf16.gmra.mrb[20].mxu1 %v4467_v7 }
  0x96   : > { %646 = vmatprep.mubr.bf16.mxu0 %v4950_v0  ;;  %759 = vmatprep.mubr.bf16.mxu1 %v4950_v0 }
  0x9d   : > { %647 = vmatmul.mubr.bf16.gmra.mrb[24].mxu0 %v4474_v8  ;;  %760 = vmatmul.mubr.bf16.gmra.mrb[24].mxu1 %v4474_v8 }
  0x9e   : > { %656 = vmatprep.mubr.bf16.mxu0 %v4950_v0  ;;  %769 = vmatprep.mubr.bf16.mxu1 %v4950_v0 }
  0xa5   : > { %657 = vmatmul.mubr.bf16.gmra.mrb[28].mxu0 %v4484_v9  ;;  %770 = vmatmul.mubr.bf16.gmra.mrb[28].mxu1 %v4484_v9 }
  0xa6   : > { %1084 = vmatprep.mubr.bf16.mxu0 %v4950_v0  ;;  %1127 = vmatprep.mubr.bf16.mxu1 %v4950_v0 }
  0xad   : > { %1085 = vmatmul.mubr.bf16.vlgmr.msra.gmra.mrb[32].mxu0 %v4950_v0  ;;  %1128 = vmatmul.mubr.bf16.vlgmr.msra.gmra.mrb[32].mxu1 %v4950_v0 }
  0xae   : > { %1414 = vmatpush1.bf16.msra.mxu0 %v5176_v36  ;;  %1457 = vmatpush1.bf16.msra.mxu1 %v5184_v38 }
  0xaf   : > { %1415 = vmatprep.subr.bf16.mxu0 %v5180_v37  ;;  %1458 = vmatprep.subr.bf16.mxu1 %v5187_v39 }
  0xb0   : > { %1445 = vmatprep.mubr.bf16.mxu0 %v4950_v0  ;;  %1488 = vmatprep.mubr.bf16.mxu1 %v4950_v0 }
  0xb2   : > { %1416 = vmatpush1.bf16.msra.mxu0 %v5192_v40  ;;  %1459 = vmatpush1.bf16.msra.mxu1 %v5201_v42 }
  0xb3   : > { %1417 = vmatprep.subr.bf16.mxu0 %v5197_v41  ;;  %1460 = vmatprep.subr.bf16.mxu1 %v5213_v45 }
  0xb6   : > { %1418 = vmatpush1.bf16.msra.mxu0 %v5209_v44  ;;  %1461 = vmatpush1.bf16.msra.mxu1 %v5220_v47 }
  0xb7   : > { %1419 = vmatprep.subr.bf16.mxu0 %v5216_v46  ;;  %1462 = vmatprep.subr.bf16.mxu1 %v5223_v48 }
  0xba   : > { %1420 = vmatpush1.bf16.msra.mxu0 %v5229_v49  ;;  %1463 = vmatpush1.bf16.msra.mxu1 %v5238_v51 }
  0xbb   : > { %1421 = vmatprep.subr.bf16.mxu0 %v5233_v50  ;;  %1464 = vmatprep.subr.bf16.mxu1 %v5249_v54 }
  0xbe   : > { %1422 = vmatpush1.bf16.msra.mxu0 %v5245_v53  ;;  %1465 = vmatpush1.bf16.msra.mxu1 %v5257_v56 }
  0xbf   : > { %1423 = vmatprep.subr.bf16.mxu0 %v5253_v55  ;;  %1466 = vmatprep.subr.bf16.mxu1 %v5260_v57 }
  0xc2   : > { %1424 = vmatpush1.bf16.msra.mxu0 %v5263_v58  ;;  %1467 = vmatpush1.bf16.msra.mxu1 %v5271_v60 }
  0xc3   : > { %1425 = vmatprep.subr.bf16.mxu0 %v5268_v59  ;;  %1468 = vmatprep.subr.bf16.mxu1 %v5285_v63 }
  0xc6   : > { %1426 = vmatpush1.bf16.msra.mxu0 %v5281_v62  ;;  %1469 = vmatpush1.bf16.msra.mxu1 %v5291_v2 }
  0xc7   : > { %1427 = vmatprep.subr.bf16.mxu0 %v5288_v1  ;;  %1470 = vmatprep.subr.bf16.mxu1 %v5295_v3 }
  0xca   : > { %1428 = vmatpush1.bf16.msra.mxu0 %v5300_v4  ;;  %1471 = vmatpush1.bf16.msra.mxu1 %v4491_v5 }
 0x140   : > { %v588_v21 = vpop.f32.mrb[0].mxu0  ;;  %v701_v22 = vpop.f32.mrb[0].mxu1 }
 0x141   : > { %v589_v23 = vadd.f32 %v588_v21, %v5374_v17  ;;  %v590_v24 = vpop.f32.mrb[1].mxu0  ;;  %v702_v25 = vadd.f32 %v701_v22, %v5376_v18  ;;  %v703_v26 = vpop.f32.mrb[1].mxu1 }
 0x142   : > { %v591_v27 = vadd.f32 %v590_v24, %v5378_v19  ;;  %v592_v28 = vpop.f32.mrb[2].mxu0  ;;  %v704_v29 = vadd.f32 %v703_v26, %v5380_v20  ;;  %v705_v30 = vpop.f32.mrb[2].mxu1 }
 0x143   : > { %780 = vst [vmem:[#allocation2] sm:$0xff] %v589_v23  ;;  %v593_v31 = vadd.f32 %v592_v28, %v5374_v17  ;;  %v594_v32 = vpop.f32.mrb[3].mxu0  ;;  %782 = vst [vmem:[#allocation2 + $0x10] sm:$0xff] %v702_v25  ;;  %v706_v33 = vadd.f32 %v705_v30, %v5376_v18  ;;  %v707_v34 = vpop.f32.mrb[3].mxu1 }
 0x144   : > { %781 = vst [vmem:[#allocation2 + $0x8] sm:$0xff] %v591_v27  ;;  %v595_v35 = vadd.f32 %v594_v32, %v5378_v19  ;;  %783 = vst [vmem:[#allocation2 + $0x18] sm:$0xff] %v704_v29  ;;  %v708_v36 = vadd.f32 %v707_v34, %v5380_v20 }
 0x145   : > { %784 = vst [vmem:[#allocation2 + $0x20] sm:$0xff] %v593_v31  ;;  %786 = vst [vmem:[#allocation2 + $0x30] sm:$0xff] %v706_v33 }
 0x146   : > { %785 = vst [vmem:[#allocation2 + $0x28] sm:$0xff] %v595_v35  ;;  %787 = vst [vmem:[#allocation2 + $0x38] sm:$0xff] %v708_v36 }
 0x148   : > { %v598_v37 = vpop.f32.mrb[4].mxu0  ;;  %v711_v38 = vpop.f32.mrb[4].mxu1 }
 0x149   : > { %v599_v39 = vadd.f32 %v598_v37, %v5374_v17  ;;  %v600_v40 = vpop.f32.mrb[5].mxu0  ;;  %v712_v41 = vadd.f32 %v711_v38, %v5376_v18  ;;  %v713_v42 = vpop.f32.mrb[5].mxu1 }
 0x14a   : > { %v601_v43 = vadd.f32 %v600_v40, %v5378_v19  ;;  %v602_v44 = vpop.f32.mrb[6].mxu0  ;;  %v714_v45 = vadd.f32 %v713_v42, %v5380_v20  ;;  %v715_v46 = vpop.f32.mrb[6].mxu1 }
 0x14b   : > { %788 = vst [vmem:[#allocation2 + $0x40] sm:$0xff] %v599_v39  ;;  %v603_v47 = vadd.f32 %v602_v44, %v5374_v17  ;;  %v604_v48 = vpop.f32.mrb[7].mxu0  ;;  %790 = vst [vmem:[#allocation2 + $0x50] sm:$0xff] %v712_v41  ;;  %v716_v49 = vadd.f32 %v715_v46, %v5376_v18  ;;  %v717_v50 = vpop.f32.mrb[7].mxu1 }
 0x14c   : > { %789 = vst [vmem:[#allocation2 + $0x48] sm:$0xff] %v601_v43  ;;  %v605_v51 = vadd.f32 %v604_v48, %v5378_v19  ;;  %791 = vst [vmem:[#allocation2 + $0x58] sm:$0xff] %v714_v45  ;;  %v718_v52 = vadd.f32 %v717_v50, %v5380_v20 }
 0x14d   : > { %792 = vst [vmem:[#allocation2 + $0x60] sm:$0xff] %v603_v47  ;;  %794 = vst [vmem:[#allocation2 + $0x70] sm:$0xff] %v716_v49 }
 0x14e   : > { %793 = vst [vmem:[#allocation2 + $0x68] sm:$0xff] %v605_v51  ;;  %795 = vst [vmem:[#allocation2 + $0x78] sm:$0xff] %v718_v52 }
 0x150   : > { %v608_v53 = vpop.f32.mrb[8].mxu0  ;;  %v721_v54 = vpop.f32.mrb[8].mxu1 }
 0x151   : > { %v609_v55 = vadd.f32 %v608_v53, %v5374_v17  ;;  %v610_v56 = vpop.f32.mrb[9].mxu0  ;;  %v722_v57 = vadd.f32 %v721_v54, %v5376_v18  ;;  %v723_v58 = vpop.f32.mrb[9].mxu1 }
 0x152   : > { %v611_v59 = vadd.f32 %v610_v56, %v5378_v19  ;;  %v612_v60 = vpop.f32.mrb[10].mxu0  ;;  %v724_v61 = vadd.f32 %v723_v58, %v5380_v20  ;;  %v725_v62 = vpop.f32.mrb[10].mxu1 }
 0x153   : > { %796 = vst [vmem:[#allocation2 + $0x80] sm:$0xff] %v609_v55  ;;  %v613_v63 = vadd.f32 %v612_v60, %v5374_v17  ;;  %v614_v1 = vpop.f32.mrb[11].mxu0  ;;  %798 = vst [vmem:[#allocation2 + $0x90] sm:$0xff] %v722_v57  ;;  %v726_v2 = vadd.f32 %v725_v62, %v5376_v18  ;;  %v727_v3 = vpop.f32.mrb[11].mxu1 }
 0x154   : > { %797 = vst [vmem:[#allocation2 + $0x88] sm:$0xff] %v611_v59  ;;  %v615_v4 = vadd.f32 %v614_v1, %v5378_v19  ;;  %799 = vst [vmem:[#allocation2 + $0x98] sm:$0xff] %v724_v61  ;;  %v728_v5 = vadd.f32 %v727_v3, %v5380_v20 }
 0x155   : > { %800 = vst [vmem:[#allocation2 + $0xa0] sm:$0xff] %v613_v63  ;;  %802 = vst [vmem:[#allocation2 + $0xb0] sm:$0xff] %v726_v2 }
 0x156   : > { %801 = vst [vmem:[#allocation2 + $0xa8] sm:$0xff] %v615_v4  ;;  %803 = vst [vmem:[#allocation2 + $0xb8] sm:$0xff] %v728_v5 }
 0x158   : > { %v618_v6 = vpop.f32.mrb[12].mxu0  ;;  %v731_v7 = vpop.f32.mrb[12].mxu1 }
 0x159   : > { %v619_v8 = vadd.f32 %v618_v6, %v5374_v17  ;;  %v620_v9 = vpop.f32.mrb[13].mxu0  ;;  %v732_v10 = vadd.f32 %v731_v7, %v5376_v18  ;;  %v733_v11 = vpop.f32.mrb[13].mxu1 }
 0x15a   : > { %v621_v12 = vadd.f32 %v620_v9, %v5378_v19  ;;  %v622_v13 = vpop.f32.mrb[14].mxu0  ;;  %v734_v14 = vadd.f32 %v733_v11, %v5380_v20  ;;  %v735_v15 = vpop.f32.mrb[14].mxu1 }
 0x15b   : > { %804 = vst [vmem:[#allocation2 + $0xc0] sm:$0xff] %v619_v8  ;;  %v623_v16 = vadd.f32 %v622_v13, %v5374_v17  ;;  %v624_v21 = vpop.f32.mrb[15].mxu0  ;;  %806 = vst [vmem:[#allocation2 + $0xd0] sm:$0xff] %v732_v10  ;;  %v736_v22 = vadd.f32 %v735_v15, %v5376_v18  ;;  %v737_v23 = vpop.f32.mrb[15].mxu1 }
 0x15c   : > { %805 = vst [vmem:[#allocation2 + $0xc8] sm:$0xff] %v621_v12  ;;  %v625_v24 = vadd.f32 %v624_v21, %v5378_v19  ;;  %807 = vst [vmem:[#allocation2 + $0xd8] sm:$0xff] %v734_v14  ;;  %v738_v25 = vadd.f32 %v737_v23, %v5380_v20 }
 0x15d   : > { %808 = vst [vmem:[#allocation2 + $0xe0] sm:$0xff] %v623_v16  ;;  %810 = vst [vmem:[#allocation2 + $0xf0] sm:$0xff] %v736_v22 }
 0x15e   : > { %809 = vst [vmem:[#allocation2 + $0xe8] sm:$0xff] %v625_v24  ;;  %811 = vst [vmem:[#allocation2 + $0xf8] sm:$0xff] %v738_v25 }
 0x160   : > { %v628_v26 = vpop.f32.mrb[16].mxu0  ;;  %v741_v27 = vpop.f32.mrb[16].mxu1 }
 0x161   : > { %v629_v28 = vadd.f32 %v628_v26, %v5374_v17  ;;  %v630_v29 = vpop.f32.mrb[17].mxu0  ;;  %v742_v30 = vadd.f32 %v741_v27, %v5376_v18  ;;  %v743_v31 = vpop.f32.mrb[17].mxu1 }
 0x162   : > { %v631_v32 = vadd.f32 %v630_v29, %v5378_v19  ;;  %v632_v33 = vpop.f32.mrb[18].mxu0  ;;  %v744_v34 = vadd.f32 %v743_v31, %v5380_v20  ;;  %v745_v35 = vpop.f32.mrb[18].mxu1 }
 0x163   : > { %812 = vst [vmem:[#allocation2 + $0x100] sm:$0xff] %v629_v28  ;;  %v633_v36 = vadd.f32 %v632_v33, %v5374_v17  ;;  %v634_v37 = vpop.f32.mrb[19].mxu0  ;;  %814 = vst [vmem:[#allocation2 + $0x110] sm:$0xff] %v742_v30  ;;  %v746_v38 = vadd.f32 %v745_v35, %v5376_v18  ;;  %v747_v39 = vpop.f32.mrb[19].mxu1 }
 0x164   : > { %813 = vst [vmem:[#allocation2 + $0x108] sm:$0xff] %v631_v32  ;;  %v635_v40 = vadd.f32 %v634_v37, %v5378_v19  ;;  %815 = vst [vmem:[#allocation2 + $0x118] sm:$0xff] %v744_v34  ;;  %v748_v41 = vadd.f32 %v747_v39, %v5380_v20 }
 0x165   : > { %816 = vst [vmem:[#allocation2 + $0x120] sm:$0xff] %v633_v36  ;;  %818 = vst [vmem:[#allocation2 + $0x130] sm:$0xff] %v746_v38 }
 0x166   : > { %817 = vst [vmem:[#allocation2 + $0x128] sm:$0xff] %v635_v40  ;;  %819 = vst [vmem:[#allocation2 + $0x138] sm:$0xff] %v748_v41 }
 0x168   : > { %v638_v42 = vpop.f32.mrb[20].mxu0  ;;  %v751_v43 = vpop.f32.mrb[20].mxu1 }
 0x169   : > { %v639_v44 = vadd.f32 %v638_v42, %v5374_v17  ;;  %v752_v45 = vadd.f32 %v751_v43, %v5376_v18  ;;  %v640_v46 = vpop.f32.mrb[21].mxu0  ;;  %v753_v47 = vpop.f32.mrb[21].mxu1 }
 0x16a   : > { %v641_v48 = vadd.f32 %v640_v46, %v5378_v19  ;;  %v754_v49 = vadd.f32 %v753_v47, %v5380_v20  ;;  %v642_v50 = vpop.f32.mrb[22].mxu0  ;;  %v755_v51 = vpop.f32.mrb[22].mxu1 }
 0x16b   : > { %820 = vst [vmem:[#allocation2 + $0x140] sm:$0xff] %v639_v44  ;;  %822 = vst [vmem:[#allocation2 + $0x150] sm:$0xff] %v752_v45  ;;  %v643_v52 = vadd.f32 %v642_v50, %v5374_v17  ;;  %v756_v53 = vadd.f32 %v755_v51, %v5376_v18  ;;  %v644_v54 = vpop.f32.mrb[23].mxu0  ;;  %v757_v55 = vpop.f32.mrb[23].mxu1 }
 0x16c   : > { %821 = vst [vmem:[#allocation2 + $0x148] sm:$0xff] %v641_v48  ;;  %823 = vst [vmem:[#allocation2 + $0x158] sm:$0xff] %v754_v49  ;;  %v645_v56 = vadd.f32 %v644_v54, %v5378_v19  ;;  %v758_v57 = vadd.f32 %v757_v55, %v5380_v20 }
 0x16d   : > { %824 = vst [vmem:[#allocation2 + $0x160] sm:$0xff] %v643_v52  ;;  %826 = vst [vmem:[#allocation2 + $0x170] sm:$0xff] %v756_v53 }
 0x16e   : > { %825 = vst [vmem:[#allocation2 + $0x168] sm:$0xff] %v645_v56  ;;  %827 = vst [vmem:[#allocation2 + $0x178] sm:$0xff] %v758_v57 }
 0x170   : > { %v648_v58 = vpop.f32.mrb[24].mxu0  ;;  %v761_v59 = vpop.f32.mrb[24].mxu1 }
 0x171   : > { %v649_v60 = vadd.f32 %v648_v58, %v5374_v17  ;;  %v762_v61 = vadd.f32 %v761_v59, %v5376_v18  ;;  %v650_v62 = vpop.f32.mrb[25].mxu0  ;;  %v763_v63 = vpop.f32.mrb[25].mxu1 }
 0x172   : > { %v651_v1 = vadd.f32 %v650_v62, %v5378_v19  ;;  %v764_v2 = vadd.f32 %v763_v63, %v5380_v20  ;;  %v652_v3 = vpop.f32.mrb[26].mxu0  ;;  %v765_v4 = vpop.f32.mrb[26].mxu1 }
 0x173   : > { %828 = vst [vmem:[#allocation2 + $0x180] sm:$0xff] %v649_v60  ;;  %830 = vst [vmem:[#allocation2 + $0x190] sm:$0xff] %v762_v61  ;;  %v653_v5 = vadd.f32 %v652_v3, %v5374_v17  ;;  %v766_v6 = vadd.f32 %v765_v4, %v5376_v18  ;;  %v654_v7 = vpop.f32.mrb[27].mxu0  ;;  %v767_v8 = vpop.f32.mrb[27].mxu1 }
 0x174   : > { %829 = vst [vmem:[#allocation2 + $0x188] sm:$0xff] %v651_v1  ;;  %831 = vst [vmem:[#allocation2 + $0x198] sm:$0xff] %v764_v2  ;;  %v655_v9 = vadd.f32 %v654_v7, %v5378_v19  ;;  %v768_v10 = vadd.f32 %v767_v8, %v5380_v20 }
 0x175   : > { %832 = vst [vmem:[#allocation2 + $0x1a0] sm:$0xff] %v653_v5  ;;  %834 = vst [vmem:[#allocation2 + $0x1b0] sm:$0xff] %v766_v6 }
 0x176   : > { %833 = vst [vmem:[#allocation2 + $0x1a8] sm:$0xff] %v655_v9  ;;  %835 = vst [vmem:[#allocation2 + $0x1b8] sm:$0xff] %v768_v10 }
 0x178   : > { %v658_v11 = vpop.f32.mrb[28].mxu0  ;;  %v771_v12 = vpop.f32.mrb[28].mxu1 }
 0x179   : > { %v659_v13 = vadd.f32 %v658_v11, %v5374_v17  ;;  %v772_v14 = vadd.f32 %v771_v12, %v5376_v18  ;;  %v660_v15 = vpop.f32.mrb[29].mxu0  ;;  %v773_v16 = vpop.f32.mrb[29].mxu1 }
 0x17a   : > { %v661_v21 = vadd.f32 %v660_v15, %v5378_v19  ;;  %v774_v22 = vadd.f32 %v773_v16, %v5380_v20  ;;  %v662_v23 = vpop.f32.mrb[30].mxu0  ;;  %v775_v24 = vpop.f32.mrb[30].mxu1 }
 0x17b   : > { %836 = vst [vmem:[#allocation2 + $0x1c0] sm:$0xff] %v659_v13  ;;  %838 = vst [vmem:[#allocation2 + $0x1d0] sm:$0xff] %v772_v14  ;;  %v663_v25 = vadd.f32 %v662_v23, %v5374_v17  ;;  %v776_v26 = vadd.f32 %v775_v24, %v5376_v18  ;;  %v664_v27 = vpop.f32.mrb[31].mxu0  ;;  %v777_v28 = vpop.f32.mrb[31].mxu1 }
 0x17c   : > { %837 = vst [vmem:[#allocation2 + $0x1c8] sm:$0xff] %v661_v21  ;;  %839 = vst [vmem:[#allocation2 + $0x1d8] sm:$0xff] %v774_v22  ;;  %v665_v29 = vadd.f32 %v664_v27, %v5378_v19  ;;  %v778_v30 = vadd.f32 %v777_v28, %v5380_v20 }
 0x17d   : > { %840 = vst [vmem:[#allocation2 + $0x1e0] sm:$0xff] %v663_v25  ;;  %842 = vst [vmem:[#allocation2 + $0x1f0] sm:$0xff] %v776_v26 }
 0x17e   : > { %841 = vst [vmem:[#allocation2 + $0x1e8] sm:$0xff] %v665_v29  ;;  %843 = vst [vmem:[#allocation2 + $0x1f8] sm:$0xff] %v778_v30  ;;  %v5468_v29 = vld [vmem:[%s5126_s7 + $0x4] ss:$16 sps:$4 sm:$0xff]   ;;  %v5471_v30 = vld [vmem:[%s5126_s7 + $0xc] ss:$16 sps:$4 sm:$0xff]  }
 0x17f   : > { %1774 = vmatprep.subr.bf16.mxu0 %v5468_v29  ;;  %1817 = vmatprep.subr.bf16.mxu1 %v5471_v30 }
 0x180   : > { %v1086_v31 = vpop.f32.mrb[32].mxu0  ;;  %v1129_v32 = vpop.f32.mrb[32].mxu1 }
 0x181   : > { %v1088_v33 = vpop.f32.mrb[33].mxu0  ;;  %v1131_v34 = vpop.f32.mrb[33].mxu1 }
 0x182   : > { %v1090_v18 = vpop.f32.mrb[34].mxu0  ;;  %v1133_v35 = vpop.f32.mrb[34].mxu1 }
 0x183   : > { %v1092_v38 = vpop.f32.mrb[35].mxu0  ;;  %v1135_v39 = vpop.f32.mrb[35].mxu1 }
 0x185   : > { %v852_v17 = vld [vmem:[%s851_s14] sm:$0xff]  ;;  %v853_v37 = vld [vmem:[%s851_s14 + $0x8] sm:$0xff]  ;;  %v855_v45 = vld [vmem:[%s851_s14 + $0x18] sm:$0xff] }
 0x186   : > { %v1138_v36 = vadd.f32 %v1086_v31, %v852_v17  ;;  %v1139_v19 = vadd.f32 %v1088_v33, %v853_v37  ;;  %v856_v40 = vld [vmem:[%s851_s14 + $0x20] sm:$0xff]  ;;  %v857_v42 = vld [vmem:[%s851_s14 + $0x28] sm:$0xff]  ;;  %v859_v48 = vld [vmem:[%s851_s14 + $0x38] sm:$0xff]  ;;  %v1141_v50 = vadd.f32 %v1131_v34, %v855_v45 }
 0x187   : > { %v1142_v41 = vadd.f32 %v1090_v18, %v856_v40  ;;  %v1143_v44 = vadd.f32 %v1092_v38, %v857_v42  ;;  %v854_v49 = vld [vmem:[%s851_s14 + $0x10] sm:$0xff]  ;;  %v1145_v52 = vadd.f32 %v1135_v39, %v859_v48  ;;  %v5487_v34 = vld [vmem:[%s5126_s7 + $0x2c] ss:$16 sps:$4 sm:$0xff]   ;;  %v5493_v18 = vld [vmem:[%s5126_s7 + $0x28] ss:$16 sps:$4 sm:$0xff]  }
 0x188   : > { %v3957_v20 = vmul.f32 -1.442695, %v1138_v36  ;;  %v3959_v43 = vmul.f32 -1.442695, %v1139_v19  ;;  %v858_v51 = vld [vmem:[%s851_s14 + $0x30] sm:$0xff]  ;;  %v1140_v53 = vadd.f32 %v1129_v32, %v854_v49  ;;  %s1925_s14 = scalar_lea.vmem %s5461_s15, %s4053_s12 }
 0x189   : > { %v3958_v46 = vmul.f32 -1.442695, %v1142_v41  ;;  %v3960_v47 = vmul.f32 -1.442695, %v1143_v44  ;;  %v3961_v54 = vmul.f32 -1.442695, %v1141_v50  ;;  %v1144_v55 = vadd.f32 %v1133_v35, %v858_v51 }
 0x18a   : > { %4590 = vpow2.f32 %v3957_v20  ;;  %v3962_v56 = vmul.f32 -1.442695, %v1145_v52  ;;  %v5474_v31 = vld [vmem:[%s5126_s7] ss:$16 sps:$4 sm:$0xff]   ;;  %v5477_v32 = vld [vmem:[%s5126_s7 + $0x8] ss:$16 sps:$4 sm:$0xff]  }
 0x18b   : > { %4592 = vpow2.f32 %v3959_v43  ;;  %v5484_v33 = vld [vmem:[%s5126_s7 + $0x24] ss:$16 sps:$4 sm:$0xff]   ;;  %v5490_v17 = vld [vmem:[%s5126_s7 + $0x20] ss:$16 sps:$4 sm:$0xff]   ;;  %v5503_v36 = vld [vmem:[%s5126_s7 + $0x4c] ss:$16 sps:$4 sm:$0xff]  }
 0x18c   : > { %4594 = vpow2.f32 %v3958_v46  ;;  %v5500_v35 = vld [vmem:[%s5126_s7 + $0x44] ss:$16 sps:$4 sm:$0xff]   ;;  %v5506_v37 = vld [vmem:[%s5126_s7 + $0x40] ss:$16 sps:$4 sm:$0xff]   ;;  %v5509_v38 = vld [vmem:[%s5126_s7 + $0x48] ss:$16 sps:$4 sm:$0xff]  }
 0x18d   : > { %4596 = vpow2.f32 %v3960_v47  ;;  %v5516_v39 = vld [vmem:[%s5126_s7 + $0x64] ss:$16 sps:$4 sm:$0xff]   ;;  %v5519_v19 = vld [vmem:[%s5126_s7 + $0x6c] ss:$16 sps:$4 sm:$0xff]   ;;  %v5522_v40 = vld [vmem:[%s5126_s7 + $0x60] ss:$16 sps:$4 sm:$0xff]  }
 0x18e   : > { %4598 = vtanh.f32 %v1140_v53  ;;  %v5525_v20 = vld [vmem:[%s5126_s7 + $0x68] ss:$16 sps:$4 sm:$0xff]   ;;  %v5532_v41 = vld [vmem:[%s5126_s7 + $0x80] ss:$16 sps:$4 sm:$0xff]   ;;  %v5535_v42 = vld [vmem:[%s5126_s7 + $0x84] ss:$16 sps:$4 sm:$0xff]  }
 0x18f   : > { %4600 = vpow2.f32 %v3961_v54  ;;  %v5538_v43 = vld [vmem:[%s5126_s7 + $0x88] ss:$16 sps:$4 sm:$0xff]   ;;  %v5541_v44 = vld [vmem:[%s5126_s7 + $0x8c] ss:$16 sps:$4 sm:$0xff]   ;;  %v5544_v45 = vld [vmem:[%s5126_s7 + $0xa4] ss:$16 sps:$4 sm:$0xff]  }
 0x190   : > { %4602 = vtanh.f32 %v1144_v55  ;;  %v5548_v46 = vld [vmem:[%s5126_s7 + $0xac] ss:$16 sps:$4 sm:$0xff]   ;;  %v5553_v47 = vld [vmem:[%s5126_s7 + $0xa0] ss:$16 sps:$4 sm:$0xff]   ;;  %v5558_v48 = vld [vmem:[%s5126_s7 + $0xa8] ss:$16 sps:$4 sm:$0xff]  }
 0x191   : > { %4604 = vpow2.f32 %v3962_v56  ;;  %v5561_v49 = vld [vmem:[%s5126_s7 + $0xc4] ss:$16 sps:$4 sm:$0xff]   ;;  %v5565_v50 = vld [vmem:[%s5126_s7 + $0xcc] ss:$16 sps:$4 sm:$0xff]   ;;  %v5569_v51 = vld [vmem:[%s5126_s7 + $0xc0] ss:$16 sps:$4 sm:$0xff]  }
 0x192   : > { %v5574_v52 = vld [vmem:[%s5126_s7 + $0xc8] ss:$16 sps:$4 sm:$0xff]   ;;  %v5577_v53 = vld [vmem:[%s5126_s7 + $0xe4] ss:$16 sps:$4 sm:$0xff]   ;;  %v5581_v54 = vld [vmem:[%s5126_s7 + $0xec] ss:$16 sps:$4 sm:$0xff]  }
 0x193   : > { %v5585_v55 = vld [vmem:[%s5126_s7 + $0xe0] ss:$16 sps:$4 sm:$0xff]   ;;  %v5590_v56 = vld [vmem:[%s5126_s7 + $0xe8] ss:$16 sps:$4 sm:$0xff]  }
 0x194   : > { %v4591_v57 = vpop.eup %4590 }
 0x195   : > { %v4593_v58 = vpop.eup %4592  ;;  %v1152_v59 = vadd.f32 1.0, %v4591_v57  ;;  %v1213_v57 = vld [vmem:[%s5602_s13] sm:$0xff] }
 0x196   : > { %v4595_v60 = vpop.eup %4594  ;;  %v1164_v61 = vadd.f32 1.0, %v4593_v58 }
 0x197   : > { %v4597_v62 = vpop.eup %4596  ;;  %4606 = vrcp.f32 %v1152_v59  ;;  %v1153_v63 = vadd.f32 1.0, %v4595_v60 }
 0x198   : > { %4608 = vrcp.f32 %v1164_v61  ;;  %v1165_v1 = vadd.f32 1.0, %v4597_v62  ;;  %v4599_v2 = vpop.eup %4598  ;;  %v1214_v61 = vld [vmem:[%s5602_s13 + $0x8] sm:$0xff] }
 0x199   : > { %4610 = vrcp.f32 %v1153_v63  ;;  %v4601_v3 = vpop.eup %4600 }
 0x19a   : > { %4612 = vrcp.f32 %v1165_v1  ;;  %v4603_v4 = vpop.eup %4602  ;;  %v1178_v9 = vadd.f32 1.0, %v4601_v3 }
 0x19b   : > { %v4605_v5 = vpop.eup %4604 }
 0x19c   : > { %v1179_v14 = vadd.f32 1.0, %v4605_v5  ;;  %4614 = vrcp.f32 %v1178_v9 }
 0x1a1   : > { %v4607_v6 = vpop.eup %4606 }
 0x1a2   : > { %v4609_v7 = vpop.eup %4608  ;;  %v1186_v8 = vmul.f32 %v4607_v6, %v4599_v2  ;;  %v1217_v2 = vld [vmem:[%s5602_s13 + $0x20] sm:$0xff] }
 0x1a3   : > { %v4611_v10 = vpop.eup %4610  ;;  %v1184_v11 = vmul.f32 0.0, %v4609_v7  ;;  %v1218_v7 = vld [vmem:[%s5602_s13 + $0x28] sm:$0xff] }
 0x1a4   : > { %v4613_v12 = vpop.eup %4612  ;;  %v1187_v13 = vmul.f32 %v4611_v10, %v4603_v4 }
 0x1a5   : > { %v5451_v15 = vadd.f32 %v1186_v8, %v1184_v11  ;;  %v1185_v16 = vmul.f32 0.0, %v4613_v12 }
 0x1a6   : > { %v4615_v22 = vpop.eup %4614 }
 0x1a7   : > { %4616 = vtanh.f32 %v5451_v15  ;;  %v5454_v21 = vadd.f32 %v1187_v13, %v1185_v16 }
 0x1a8   : > { %4618 = vrcp.f32 %v1179_v14  ;;  %v1216_v14 = vld [vmem:[%s5602_s13 + $0x18] sm:$0xff] }
 0x1a9   : > { %4620 = vtanh.f32 %v5454_v21 }
 0x1b1   : > { %v4617_v23 = vpop.eup %4616 }
 0x1b2   : > { %v4619_v24 = vpop.eup %4618  ;;  %v1192_v26 = vmul.f32 %v4617_v23, %v4615_v22  ;;  %v1215_v22 = vld [vmem:[%s5602_s13 + $0x10] sm:$0xff] }
 0x1b3   : > { %v4621_v25 = vpop.eup %4620 }
 0x1b4   : > { %v1193_v27 = vmul.f32 %v4621_v25, %v4619_v24  ;;  %v1220_v24 = vld [vmem:[%s5602_s13 + $0x38] sm:$0xff] }
 0x1b6   : > { %v1194_v28 = vpack.c.bf16 %v1193_v27, %v1192_v26  ;;  %v1219_v26 = vld [vmem:[%s5602_s13 + $0x30] sm:$0xff]  ;;  %s5774_s13 = sshra.s32 %s4098_s10, 3 }
 0x1b7   : > { %s4291_s6 = sshll.u32 %s5774_s13, 5  ;;  %s4141_s25 = sshll.u32 %s5774_s13, 2 }
 0x1b8   : > { %4307 = vst [vmem:[%s1203_s26] sm:$0xff] %v1194_v28   ;;  %1446 = vmatmul.mubr.bf16.vlgmr.msra.gmra.mrb[36].mxu0 %v1194_v28  ;;  %1489 = vmatmul.mubr.bf16.vlgmr.msra.gmra.mrb[36].mxu1 %v1194_v28  ;;  %s5720_s26 = scalar_lea.vmem [#allocation2], %s4288_s21  ;;  %s2647_s24 = scalar_lea.vmem %s5461_s15, %s4141_s25 }
 0x1b9   : > { %1806 = vmatprep.mubr.bf16.mxu0 %v4950_v0  ;;  %1849 = vmatprep.mubr.bf16.mxu1 %v4950_v0  ;;  %s5988_s21 = sshra.s32 %s4186_s8, 3 }
 0x1ba   : > { %1775 = vmatpush1.bf16.msra.mxu0 %v5474_v31  ;;  %1818 = vmatpush1.bf16.msra.mxu1 %v5477_v32  ;;  %s3372_s10 = scalar_select %p6062_p3, 7, 0 }
 0x1bb   : > { %1776 = vmatprep.subr.bf16.mxu0 %v5484_v33  ;;  %1819 = vmatprep.subr.bf16.mxu1 %v5487_v34 }
 0x1bc   : > { %s4230_s13 = sshll.u32 %s3372_s10, 4 }
 0x1be   : > { %1777 = vmatpush1.bf16.msra.mxu0 %v5490_v17  ;;  %1820 = vmatpush1.bf16.msra.mxu1 %v5493_v18 }
 0x1bf   : > { %1778 = vmatprep.subr.bf16.mxu0 %v5500_v35  ;;  %1821 = vmatprep.subr.bf16.mxu1 %v5503_v36 }
 0x1c2   : > { %1779 = vmatpush1.bf16.msra.mxu0 %v5506_v37  ;;  %1822 = vmatpush1.bf16.msra.mxu1 %v5509_v38 }
 0x1c3   : > { %1780 = vmatprep.subr.bf16.mxu0 %v5516_v39  ;;  %1823 = vmatprep.subr.bf16.mxu1 %v5519_v19 }
 0x1c6   : > { %1781 = vmatpush1.bf16.msra.mxu0 %v5522_v40  ;;  %1824 = vmatpush1.bf16.msra.mxu1 %v5525_v20 }
 0x1c7   : > { %1782 = vmatprep.subr.bf16.mxu0 %v5535_v42  ;;  %1825 = vmatprep.subr.bf16.mxu1 %v5541_v44 }
 0x1ca   : > { %1783 = vmatpush1.bf16.msra.mxu0 %v5532_v41  ;;  %1826 = vmatpush1.bf16.msra.mxu1 %v5538_v43 }
 0x1cb   : > { %1784 = vmatprep.subr.bf16.mxu0 %v5544_v45  ;;  %1827 = vmatprep.subr.bf16.mxu1 %v5548_v46 }
 0x1ce   : > { %1785 = vmatpush1.bf16.msra.mxu0 %v5553_v47  ;;  %1828 = vmatpush1.bf16.msra.mxu1 %v5558_v48 }
 0x1cf   : > { %1786 = vmatprep.subr.bf16.mxu0 %v5561_v49  ;;  %1829 = vmatprep.subr.bf16.mxu1 %v5565_v50 }
 0x1d2   : > { %1787 = vmatpush1.bf16.msra.mxu0 %v5569_v51  ;;  %1830 = vmatpush1.bf16.msra.mxu1 %v5574_v52 }
 0x1d3   : > { %1788 = vmatprep.subr.bf16.mxu0 %v5577_v53  ;;  %1831 = vmatprep.subr.bf16.mxu1 %v5581_v54 }
 0x1d6   : > { %1789 = vmatpush1.bf16.msra.mxu0 %v5585_v55  ;;  %1832 = vmatpush1.bf16.msra.mxu1 %v5590_v56 }
 0x1d7   : > { %2135 = vmatprep.subr.bf16.mxu0 %v5468_v29  ;;  %2178 = vmatprep.subr.bf16.mxu1 %v5471_v30 }
 0x28b   : > { %v1447_v58 = vpop.f32.mrb[36].mxu0  ;;  %v1490_v59 = vpop.f32.mrb[36].mxu1 }
 0x28c   : > { %v1499_v60 = vadd.f32 %v1447_v58, %v1213_v57  ;;  %v1449_v62 = vpop.f32.mrb[37].mxu0  ;;  %v1492_v63 = vpop.f32.mrb[37].mxu1  ;;  %v1501_v23 = vadd.f32 %v1490_v59, %v1215_v22 }
 0x28d   : > { %v1500_v1 = vadd.f32 %v1449_v62, %v1214_v61  ;;  %v1451_v3 = vpop.f32.mrb[38].mxu0  ;;  %v1494_v4 = vpop.f32.mrb[38].mxu1  ;;  %v1502_v16 = vadd.f32 %v1492_v63, %v1216_v14 }
 0x28e   : > { %v4001_v5 = vmul.f32 -1.442695, %v1499_v60  ;;  %v1503_v6 = vadd.f32 %v1451_v3, %v1217_v2  ;;  %v1453_v8 = vpop.f32.mrb[39].mxu0  ;;  %v1496_v9 = vpop.f32.mrb[39].mxu1  ;;  %v1505_v28 = vadd.f32 %v1494_v4, %v1219_v26 }
 0x28f   : > { %v4003_v10 = vmul.f32 -1.442695, %v1500_v1  ;;  %v1504_v11 = vadd.f32 %v1453_v8, %v1218_v7  ;;  %v4005_v25 = vmul.f32 -1.442695, %v1502_v16  ;;  %v1506_v27 = vadd.f32 %v1496_v9, %v1220_v24 }
 0x290   : > { %4622 = vpow2.f32 %v4001_v5  ;;  %v4002_v12 = vmul.f32 -1.442695, %v1503_v6 }
 0x291   : > { %4624 = vpow2.f32 %v4003_v10  ;;  %v4004_v13 = vmul.f32 -1.442695, %v1504_v11  ;;  %v4006_v61 = vmul.f32 -1.442695, %v1506_v27 }
 0x292   : > { %4626 = vpow2.f32 %v4002_v12 }
 0x293   : > { %4628 = vpow2.f32 %v4004_v13 }
 0x294   : > { %4630 = vtanh.f32 %v1501_v23 }
 0x295   : > { %4632 = vpow2.f32 %v4005_v25 }
 0x296   : > { %4634 = vtanh.f32 %v1505_v28 }
 0x29a   : > { %v4623_v57 = vpop.eup %4622 }
 0x29b   : > { %v4625_v58 = vpop.eup %4624  ;;  %v1513_v60 = vadd.f32 1.0, %v4623_v57 }
 0x29c   : > { %v1525_v62 = vadd.f32 1.0, %v4625_v58  ;;  %v4627_v1 = vpop.eup %4626 }
 0x29d   : > { %4636 = vrcp.f32 %v1513_v60  ;;  %v1514_v63 = vadd.f32 1.0, %v4627_v1  ;;  %v4629_v2 = vpop.eup %4628  ;;  %v1575_v1 = vld [vmem:[%s5661_s11 + $0x8] sm:$0xff] }
 0x29e   : > { %4638 = vrcp.f32 %v1525_v62  ;;  %v1526_v59 = vadd.f32 1.0, %v4629_v2  ;;  %v4631_v3 = vpop.eup %4630 }
 0x29f   : > { %4640 = vpow2.f32 %v4006_v61  ;;  %v4633_v5 = vpop.eup %4632 }
 0x2a0   : > { %4642 = vrcp.f32 %v1514_v63  ;;  %v4635_v4 = vpop.eup %4634  ;;  %v1539_v12 = vadd.f32 1.0, %v4633_v5 }
 0x2a1   : > { %4644 = vrcp.f32 %v1526_v59 }
 0x2a2   : > { %4646 = vrcp.f32 %v1539_v12 }
 0x2a7   : > { %v4637_v6 = vpop.eup %4636 }
 0x2a8   : > { %v4639_v7 = vpop.eup %4638  ;;  %v1547_v8 = vmul.f32 %v4637_v6, %v4631_v3  ;;  %v1578_v3 = vld [vmem:[%s5661_s11 + $0x20] sm:$0xff] }
 0x2a9   : > { %v4641_v9 = vpop.eup %4640  ;;  %v1545_v10 = vmul.f32 %v4639_v7, %v5451_v15 }
 0x2aa   : > { %v4643_v11 = vpop.eup %4642  ;;  %v1540_v22 = vadd.f32 1.0, %v4641_v9 }
 0x2ab   : > { %v5613_v13 = vadd.f32 %v1547_v8, %v1545_v10  ;;  %v1548_v14 = vmul.f32 %v4643_v11, %v4635_v4  ;;  %v4645_v16 = vpop.eup %4644  ;;  %v1579_v8 = vld [vmem:[%s5661_s11 + $0x28] sm:$0xff] }
 0x2ac   : > { %v1546_v23 = vmul.f32 %v4645_v16, %v5454_v21  ;;  %v4647_v15 = vpop.eup %4646  ;;  %v1574_v21 = vld [vmem:[%s5661_s11] sm:$0xff] }
 0x2ad   : > { %4648 = vtanh.f32 %v5613_v13 }
 0x2ae   : > { %v5617_v24 = vadd.f32 %v1548_v14, %v1546_v23  ;;  %4650 = vrcp.f32 %v1540_v22  ;;  %v1577_v22 = vld [vmem:[%s5661_s11 + $0x18] sm:$0xff] }
 0x2b0   : > { %4652 = vtanh.f32 %v5617_v24 }
 0x2b7   : > { %v4649_v25 = vpop.eup %4648 }
 0x2b8   : > { %v4651_v26 = vpop.eup %4650  ;;  %v1553_v28 = vmul.f32 %v4649_v25, %v4647_v15  ;;  %v1576_v15 = vld [vmem:[%s5661_s11 + $0x10] sm:$0xff] }
 0x2ba   : > { %v4653_v27 = vpop.eup %4652 }
 0x2bb   : > { %v1554_v57 = vmul.f32 %v4653_v27, %v4651_v26  ;;  %v1581_v26 = vld [vmem:[%s5661_s11 + $0x38] sm:$0xff] }
 0x2bd   : > { %v1555_v58 = vpack.c.bf16 %v1554_v57, %v1553_v28  ;;  %v1580_v28 = vld [vmem:[%s5661_s11 + $0x30] sm:$0xff]  ;;  %s5931_s11 = sshra.s32 %s4142_s5, 3 }
 0x2bf   : > { %4312 = vst [vmem:[%s1564_s18] sm:$0xff] %v1555_v58   ;;  %1807 = vmatmul.mubr.bf16.vlgmr.msra.gmra.mrb[40].mxu0 %v1555_v58  ;;  %1850 = vmatmul.mubr.bf16.vlgmr.msra.gmra.mrb[40].mxu1 %v1555_v58  ;;  %s5777_s18 = scalar_lea.vmem [#allocation2], %s4291_s6  ;;  %s6013_s6 = sshra.s32 %s4230_s13, 3 }
 0x2c0   : > { %2136 = vmatpush1.bf16.msra.mxu0 %v5474_v31  ;;  %2179 = vmatpush1.bf16.msra.mxu1 %v5477_v32  ;;  %s4273_s19 = sshll.u32 %s6013_s6, 2 }
 0x2c1   : > { %2137 = vmatprep.subr.bf16.mxu0 %v5484_v33  ;;  %2180 = vmatprep.subr.bf16.mxu1 %v5487_v34 }
 0x2c2   : > { %2167 = vmatprep.mubr.bf16.mxu0 %v4950_v0  ;;  %2210 = vmatprep.mubr.bf16.mxu1 %v4950_v0 }
 0x2c4   : > { %2138 = vmatpush1.bf16.msra.mxu0 %v5490_v17  ;;  %2181 = vmatpush1.bf16.msra.mxu1 %v5493_v18 }
 0x2c5   : > { %2139 = vmatprep.subr.bf16.mxu0 %v5500_v35  ;;  %2182 = vmatprep.subr.bf16.mxu1 %v5503_v36 }
 0x2c8   : > { %2140 = vmatpush1.bf16.msra.mxu0 %v5506_v37  ;;  %2183 = vmatpush1.bf16.msra.mxu1 %v5509_v38 }
 0x2c9   : > { %2141 = vmatprep.subr.bf16.mxu0 %v5516_v39  ;;  %2184 = vmatprep.subr.bf16.mxu1 %v5519_v19 }
 0x2cc   : > { %2142 = vmatpush1.bf16.msra.mxu0 %v5522_v40  ;;  %2185 = vmatpush1.bf16.msra.mxu1 %v5525_v20 }
 0x2cd   : > { %2143 = vmatprep.subr.bf16.mxu0 %v5535_v42  ;;  %2186 = vmatprep.subr.bf16.mxu1 %v5541_v44 }
 0x2d0   : > { %2144 = vmatpush1.bf16.msra.mxu0 %v5532_v41  ;;  %2187 = vmatpush1.bf16.msra.mxu1 %v5538_v43 }
 0x2d1   : > { %2145 = vmatprep.subr.bf16.mxu0 %v5544_v45  ;;  %2188 = vmatprep.subr.bf16.mxu1 %v5548_v46 }
 0x2d4   : > { %2146 = vmatpush1.bf16.msra.mxu0 %v5553_v47  ;;  %2189 = vmatpush1.bf16.msra.mxu1 %v5558_v48 }
 0x2d5   : > { %2147 = vmatprep.subr.bf16.mxu0 %v5561_v49  ;;  %2190 = vmatprep.subr.bf16.mxu1 %v5565_v50 }
 0x2d8   : > { %2148 = vmatpush1.bf16.msra.mxu0 %v5569_v51  ;;  %2191 = vmatpush1.bf16.msra.mxu1 %v5574_v52 }
 0x2d9   : > { %2149 = vmatprep.subr.bf16.mxu0 %v5577_v53  ;;  %2192 = vmatprep.subr.bf16.mxu1 %v5581_v54 }
 0x2dc   : > { %2150 = vmatpush1.bf16.msra.mxu0 %v5585_v55  ;;  %2193 = vmatpush1.bf16.msra.mxu1 %v5590_v56 }
 0x2dd   : > { %2496 = vmatprep.subr.bf16.mxu0 %v5468_v29  ;;  %2539 = vmatprep.subr.bf16.mxu1 %v5471_v30 }
 0x392   : > { %v1808_v60 = vpop.f32.mrb[40].mxu0  ;;  %v1851_v61 = vpop.f32.mrb[40].mxu1 }
 0x393   : > { %v1860_v62 = vadd.f32 %v1808_v60, %v1574_v21  ;;  %v1810_v63 = vpop.f32.mrb[41].mxu0  ;;  %v1853_v2 = vpop.f32.mrb[41].mxu1  ;;  %v1862_v25 = vadd.f32 %v1851_v61, %v1576_v15 }
 0x394   : > { %v1861_v59 = vadd.f32 %v1810_v63, %v1575_v1  ;;  %v1812_v5 = vpop.f32.mrb[42].mxu0  ;;  %v1855_v4 = vpop.f32.mrb[42].mxu1  ;;  %v1863_v23 = vadd.f32 %v1853_v2, %v1577_v22 }
 0x395   : > { %v4045_v6 = vmul.f32 -1.442695, %v1860_v62  ;;  %v1864_v7 = vadd.f32 %v1812_v5, %v1578_v3  ;;  %v1814_v9 = vpop.f32.mrb[43].mxu0  ;;  %v1857_v10 = vpop.f32.mrb[43].mxu1  ;;  %v1866_v58 = vadd.f32 %v1855_v4, %v1580_v28 }
 0x396   : > { %v4047_v11 = vmul.f32 -1.442695, %v1861_v59  ;;  %v1865_v12 = vadd.f32 %v1814_v9, %v1579_v8  ;;  %v4049_v27 = vmul.f32 -1.442695, %v1863_v23  ;;  %v1867_v57 = vadd.f32 %v1857_v10, %v1581_v26 }
 0x397   : > { %4654 = vpow2.f32 %v4045_v6  ;;  %v4046_v14 = vmul.f32 -1.442695, %v1864_v7 }
 0x398   : > { %4656 = vpow2.f32 %v4047_v11  ;;  %v4048_v16 = vmul.f32 -1.442695, %v1865_v12  ;;  %v4050_v1 = vmul.f32 -1.442695, %v1867_v57 }
 0x399   : > { %4658 = vpow2.f32 %v4046_v14 }
 0x39a   : > { %4660 = vpow2.f32 %v4048_v16 }
 0x39b   : > { %4662 = vtanh.f32 %v1862_v25 }
 0x39c   : > { %4664 = vpow2.f32 %v4049_v27 }
 0x39d   : > { %4666 = vtanh.f32 %v1866_v58 }
 0x3a1   : > { %v4655_v21 = vpop.eup %4654 }
 0x3a2   : > { %v4657_v60 = vpop.eup %4656  ;;  %v1874_v62 = vadd.f32 1.0, %v4655_v21 }
 0x3a3   : > { %v1886_v63 = vadd.f32 1.0, %v4657_v60  ;;  %v4659_v59 = vpop.eup %4658 }
 0x3a4   : > { %4668 = vrcp.f32 %v1874_v62  ;;  %v1875_v2 = vadd.f32 1.0, %v4659_v59  ;;  %v4661_v3 = vpop.eup %4660 }
 0x3a5   : > { %4670 = vrcp.f32 %v1886_v63  ;;  %v1887_v61 = vadd.f32 1.0, %v4661_v3  ;;  %v4663_v5 = vpop.eup %4662  ;;  %v1939_v3 = vld [vmem:[%s5720_s26 + $0x20] sm:$0xff] }
 0x3a6   : > { %4672 = vpow2.f32 %v4050_v1  ;;  %v4665_v6 = vpop.eup %4664 }
 0x3a7   : > { %4674 = vrcp.f32 %v1875_v2  ;;  %v4667_v4 = vpop.eup %4666  ;;  %v1900_v14 = vadd.f32 1.0, %v4665_v6 }
 0x3a8   : > { %4676 = vrcp.f32 %v1887_v61 }
 0x3a9   : > { %4678 = vrcp.f32 %v1900_v14 }
 0x3ae   : > { %v4669_v7 = vpop.eup %4668 }
 0x3af   : > { %v4671_v8 = vpop.eup %4670  ;;  %v1908_v9 = vmul.f32 %v4669_v7, %v4663_v5  ;;  %v1940_v7 = vld [vmem:[%s5720_s26 + $0x28] sm:$0xff] }
 0x3b0   : > { %v4673_v10 = vpop.eup %4672  ;;  %v1906_v11 = vmul.f32 %v4671_v8, %v5613_v13 }
 0x3b1   : > { %v4675_v12 = vpop.eup %4674  ;;  %v1901_v15 = vadd.f32 1.0, %v4673_v10 }
 0x3b2   : > { %v5672_v16 = vadd.f32 %v1908_v9, %v1906_v11  ;;  %v1909_v22 = vmul.f32 %v4675_v12, %v4667_v4  ;;  %v4677_v23 = vpop.eup %4676 }
 0x3b3   : > { %v1907_v25 = vmul.f32 %v4677_v23, %v5617_v24  ;;  %v4679_v13 = vpop.eup %4678  ;;  %v1935_v24 = vld [vmem:[%s5720_s26] sm:$0xff] }
 0x3b4   : > { %4680 = vtanh.f32 %v5672_v16 }
 0x3b5   : > { %v5676_v26 = vadd.f32 %v1909_v22, %v1907_v25  ;;  %4682 = vrcp.f32 %v1901_v15  ;;  %v1938_v22 = vld [vmem:[%s5720_s26 + $0x18] sm:$0xff]  ;;  %v1937_v15 = vld [vmem:[%s5720_s26 + $0x10] sm:$0xff] }
 0x3b7   : > { %4684 = vtanh.f32 %v5676_v26 }
 0x3be   : > { %v4681_v27 = vpop.eup %4680 }
 0x3bf   : > { %v4683_v28 = vpop.eup %4682  ;;  %v1914_v58 = vmul.f32 %v4681_v27, %v4679_v13  ;;  %v1942_v13 = vld [vmem:[%s5720_s26 + $0x38] sm:$0xff] }
 0x3c1   : > { %v4685_v57 = vpop.eup %4684 }
 0x3c2   : > { %v1915_v21 = vmul.f32 %v4685_v57, %v4683_v28  ;;  %v1941_v28 = vld [vmem:[%s5720_s26 + $0x30] sm:$0xff] }
 0x3c4   : > { %v1916_v60 = vpack.c.bf16 %v1915_v21, %v1914_v58 }
 0x3c6   : > { %4317 = vst [vmem:[%s1925_s14] sm:$0xff] %v1916_v60   ;;  %2168 = vmatmul.mubr.bf16.vlgmr.msra.gmra.mrb[44].mxu0 %v1916_v60  ;;  %2211 = vmatmul.mubr.bf16.vlgmr.msra.gmra.mrb[44].mxu1 %v1916_v60  ;;  %s4185_s14 = sshll.u32 %s5931_s11, 2 }
 0x3c7   : > { %2497 = vmatpush1.bf16.msra.mxu0 %v5474_v31  ;;  %2540 = vmatpush1.bf16.msra.mxu1 %v5477_v32  ;;  %s3008_s30 = scalar_lea.vmem %s5461_s15, %s4185_s14 }
 0x3c8   : > { %2498 = vmatprep.subr.bf16.mxu0 %v5484_v33  ;;  %2541 = vmatprep.subr.bf16.mxu1 %v5487_v34 }
 0x3c9   : > { %2528 = vmatprep.mubr.bf16.mxu0 %v4950_v0  ;;  %2571 = vmatprep.mubr.bf16.mxu1 %v4950_v0 }
 0x3cb   : > { %2499 = vmatpush1.bf16.msra.mxu0 %v5490_v17  ;;  %2542 = vmatpush1.bf16.msra.mxu1 %v5493_v18 }
 0x3cc   : > { %2500 = vmatprep.subr.bf16.mxu0 %v5500_v35  ;;  %2543 = vmatprep.subr.bf16.mxu1 %v5503_v36 }
 0x3cf   : > { %2501 = vmatpush1.bf16.msra.mxu0 %v5506_v37  ;;  %2544 = vmatpush1.bf16.msra.mxu1 %v5509_v38 }
 0x3d0   : > { %2502 = vmatprep.subr.bf16.mxu0 %v5516_v39  ;;  %2545 = vmatprep.subr.bf16.mxu1 %v5519_v19 }
 0x3d3   : > { %2503 = vmatpush1.bf16.msra.mxu0 %v5522_v40  ;;  %2546 = vmatpush1.bf16.msra.mxu1 %v5525_v20 }
 0x3d4   : > { %2504 = vmatprep.subr.bf16.mxu0 %v5535_v42  ;;  %2547 = vmatprep.subr.bf16.mxu1 %v5541_v44 }
 0x3d7   : > { %2505 = vmatpush1.bf16.msra.mxu0 %v5532_v41  ;;  %2548 = vmatpush1.bf16.msra.mxu1 %v5538_v43 }
 0x3d8   : > { %2506 = vmatprep.subr.bf16.mxu0 %v5544_v45  ;;  %2549 = vmatprep.subr.bf16.mxu1 %v5548_v46 }
 0x3db   : > { %2507 = vmatpush1.bf16.msra.mxu0 %v5553_v47  ;;  %2550 = vmatpush1.bf16.msra.mxu1 %v5558_v48 }
 0x3dc   : > { %2508 = vmatprep.subr.bf16.mxu0 %v5561_v49  ;;  %2551 = vmatprep.subr.bf16.mxu1 %v5565_v50 }
 0x3df   : > { %2509 = vmatpush1.bf16.msra.mxu0 %v5569_v51  ;;  %2552 = vmatpush1.bf16.msra.mxu1 %v5574_v52 }
 0x3e0   : > { %2510 = vmatprep.subr.bf16.mxu0 %v5577_v53  ;;  %2553 = vmatprep.subr.bf16.mxu1 %v5581_v54 }
 0x3e3   : > { %2511 = vmatpush1.bf16.msra.mxu0 %v5585_v55  ;;  %2554 = vmatpush1.bf16.msra.mxu1 %v5590_v56 }
 0x3e4   : > { %2857 = vmatprep.subr.bf16.mxu0 %v5468_v29  ;;  %2900 = vmatprep.subr.bf16.mxu1 %v5471_v30  ;;  %v1936_v29 = vld [vmem:[%s5720_s26 + $0x8] sm:$0xff]  ;;  %s4297_s26 = sshll.u32 %s5988_s21, 5 }
 0x3e5   : > { %s5991_s22 = scalar_lea.vmem [#allocation2], %s4297_s26 }
 0x499   : > { %v2169_v62 = vpop.f32.mrb[44].mxu0  ;;  %v2212_v1 = vpop.f32.mrb[44].mxu1 }
 0x49a   : > { %v2221_v63 = vadd.f32 %v2169_v62, %v1935_v24  ;;  %v2171_v59 = vpop.f32.mrb[45].mxu0  ;;  %v2214_v30 = vpop.f32.mrb[45].mxu1  ;;  %v2223_v25 = vadd.f32 %v2212_v1, %v1937_v15 }
 0x49b   : > { %v2222_v2 = vadd.f32 %v2171_v59, %v1936_v29  ;;  %v2173_v61 = vpop.f32.mrb[46].mxu0  ;;  %v2216_v5 = vpop.f32.mrb[46].mxu1  ;;  %v2224_v23 = vadd.f32 %v2214_v30, %v1938_v22 }
 0x49c   : > { %v4089_v6 = vmul.f32 -1.442695, %v2221_v63  ;;  %v2225_v4 = vadd.f32 %v2173_v61, %v1939_v3  ;;  %v2175_v8 = vpop.f32.mrb[47].mxu0  ;;  %v2218_v9 = vpop.f32.mrb[47].mxu1  ;;  %v2227_v58 = vadd.f32 %v2216_v5, %v1941_v28 }
 0x49d   : > { %v4091_v10 = vmul.f32 -1.442695, %v2222_v2  ;;  %v2226_v11 = vadd.f32 %v2175_v8, %v1940_v7  ;;  %v4093_v27 = vmul.f32 -1.442695, %v2224_v23  ;;  %v2228_v57 = vadd.f32 %v2218_v9, %v1942_v13 }
 0x49e   : > { %4686 = vpow2.f32 %v4089_v6  ;;  %v4090_v12 = vmul.f32 -1.442695, %v2225_v4 }
 0x49f   : > { %4688 = vpow2.f32 %v4091_v10  ;;  %v4092_v14 = vmul.f32 -1.442695, %v2226_v11  ;;  %v4094_v62 = vmul.f32 -1.442695, %v2228_v57 }
 0x4a0   : > { %4690 = vpow2.f32 %v4090_v12 }
 0x4a1   : > { %4692 = vpow2.f32 %v4092_v14 }
 0x4a2   : > { %4694 = vtanh.f32 %v2223_v25 }
 0x4a3   : > { %4696 = vpow2.f32 %v4093_v27 }
 0x4a4   : > { %4698 = vtanh.f32 %v2227_v58 }
 0x4a8   : > { %v4687_v21 = vpop.eup %4686 }
 0x4a9   : > { %v4689_v60 = vpop.eup %4688  ;;  %v2235_v24 = vadd.f32 1.0, %v4687_v21 }
 0x4aa   : > { %v2247_v63 = vadd.f32 1.0, %v4689_v60  ;;  %v4691_v29 = vpop.eup %4690 }
 0x4ab   : > { %4700 = vrcp.f32 %v2235_v24  ;;  %v2236_v59 = vadd.f32 1.0, %v4691_v29  ;;  %v4693_v30 = vpop.eup %4692 }
 0x4ac   : > { %4702 = vrcp.f32 %v2247_v63  ;;  %v2248_v1 = vadd.f32 1.0, %v4693_v30  ;;  %v4695_v2 = vpop.eup %4694 }
 0x4ad   : > { %4704 = vpow2.f32 %v4094_v62  ;;  %v4697_v3 = vpop.eup %4696 }
 0x4ae   : > { %4706 = vrcp.f32 %v2236_v59  ;;  %v4699_v61 = vpop.eup %4698  ;;  %v2261_v10 = vadd.f32 1.0, %v4697_v3 }
 0x4af   : > { %4708 = vrcp.f32 %v2248_v1 }
 0x4b0   : > { %4710 = vrcp.f32 %v2261_v10 }
 0x4b5   : > { %v4701_v5 = vpop.eup %4700 }
 0x4b6   : > { %v4703_v6 = vpop.eup %4702  ;;  %v2269_v4 = vmul.f32 %v4701_v5, %v4695_v2 }
 0x4b7   : > { %v4705_v7 = vpop.eup %4704  ;;  %v2267_v8 = vmul.f32 %v4703_v6, %v5672_v16 }
 0x4b8   : > { %v4707_v9 = vpop.eup %4706  ;;  %v2262_v22 = vadd.f32 1.0, %v4705_v7 }
 0x4b9   : > { %v5731_v11 = vadd.f32 %v2269_v4, %v2267_v8  ;;  %v2270_v12 = vmul.f32 %v4707_v9, %v4699_v61  ;;  %v4709_v14 = vpop.eup %4708 }
 0x4ba   : > { %v2268_v23 = vmul.f32 %v4709_v14, %v5676_v26  ;;  %v4711_v16 = vpop.eup %4710 }
 0x4bb   : > { %4712 = vtanh.f32 %v5731_v11 }
 0x4bc   : > { %v5735_v15 = vadd.f32 %v2270_v12, %v2268_v23  ;;  %4714 = vrcp.f32 %v2262_v22 }
 0x4be   : > { %4716 = vtanh.f32 %v5735_v15 }
 0x4c5   : > { %v4713_v25 = vpop.eup %4712 }
 0x4c6   : > { %v4715_v13 = vpop.eup %4714  ;;  %v2275_v28 = vmul.f32 %v4713_v25, %v4711_v16 }
 0x4c8   : > { %v4717_v27 = vpop.eup %4716 }
 0x4c9   : > { %v2276_v57 = vmul.f32 %v4717_v27, %v4715_v13 }
 0x4cb   : > { %v2277_v58 = vpack.c.bf16 %v2276_v57, %v2275_v28  ;;  %v5800_v57 = vld [vmem:[%s5126_s7 + $0x4] ss:$16 sps:$4 sm:$0xff]  }
 0x4cd   : > { %4322 = vst [vmem:[%s2286_s28] sm:$0xff] %v2277_v58   ;;  %2529 = vmatmul.mubr.bf16.vlgmr.msra.gmra.mrb[48].mxu0 %v2277_v58  ;;  %2572 = vmatmul.mubr.bf16.vlgmr.msra.gmra.mrb[48].mxu1 %v2277_v58  ;;  %v5803_v58 = vld [vmem:[%s5126_s7 + $0xc] ss:$16 sps:$4 sm:$0xff]   ;;  %s4229_s28 = sshll.u32 %s5988_s21, 2 }
 0x4ce   : > { %2858 = vmatpush1.bf16.msra.mxu0 %v5474_v31  ;;  %2901 = vmatpush1.bf16.msra.mxu1 %v5477_v32  ;;  %v2296_v31 = vld [vmem:[%s5777_s18] sm:$0xff]  ;;  %s3369_s9 = scalar_lea.vmem %s5461_s15, %s4229_s28 }
 0x4cf   : > { %2859 = vmatprep.subr.bf16.mxu0 %v5484_v33  ;;  %2902 = vmatprep.subr.bf16.mxu1 %v5487_v34 }
 0x4d0   : > { %2889 = vmatprep.mubr.bf16.mxu0 %v4950_v0  ;;  %2932 = vmatprep.mubr.bf16.mxu1 %v4950_v0 }
 0x4d2   : > { %2860 = vmatpush1.bf16.msra.mxu0 %v5490_v17  ;;  %2903 = vmatpush1.bf16.msra.mxu1 %v5493_v18  ;;  %v2297_v17 = vld [vmem:[%s5777_s18 + $0x8] sm:$0xff] }
 0x4d3   : > { %2861 = vmatprep.subr.bf16.mxu0 %v5500_v35  ;;  %2904 = vmatprep.subr.bf16.mxu1 %v5503_v36 }
 0x4d6   : > { %2862 = vmatpush1.bf16.msra.mxu0 %v5506_v37  ;;  %2905 = vmatpush1.bf16.msra.mxu1 %v5509_v38  ;;  %v2300_v37 = vld [vmem:[%s5777_s18 + $0x20] sm:$0xff] }
 0x4d7   : > { %2863 = vmatprep.subr.bf16.mxu0 %v5516_v39  ;;  %2906 = vmatprep.subr.bf16.mxu1 %v5519_v19 }
 0x4da   : > { %2864 = vmatpush1.bf16.msra.mxu0 %v5522_v40  ;;  %2907 = vmatpush1.bf16.msra.mxu1 %v5525_v20  ;;  %v2301_v20 = vld [vmem:[%s5777_s18 + $0x28] sm:$0xff] }
 0x4db   : > { %2865 = vmatprep.subr.bf16.mxu0 %v5535_v42  ;;  %2908 = vmatprep.subr.bf16.mxu1 %v5541_v44 }
 0x4de   : > { %2866 = vmatpush1.bf16.msra.mxu0 %v5532_v41  ;;  %2909 = vmatpush1.bf16.msra.mxu1 %v5538_v43 }
 0x4df   : > { %2867 = vmatprep.subr.bf16.mxu0 %v5544_v45  ;;  %2910 = vmatprep.subr.bf16.mxu1 %v5548_v46 }
 0x4e2   : > { %2868 = vmatpush1.bf16.msra.mxu0 %v5553_v47  ;;  %2911 = vmatpush1.bf16.msra.mxu1 %v5558_v48  ;;  %v2299_v47 = vld [vmem:[%s5777_s18 + $0x18] sm:$0xff] }
 0x4e3   : > { %2869 = vmatprep.subr.bf16.mxu0 %v5561_v49  ;;  %2912 = vmatprep.subr.bf16.mxu1 %v5565_v50  ;;  %v2298_v49 = vld [vmem:[%s5777_s18 + $0x10] sm:$0xff] }
 0x4e6   : > { %2870 = vmatpush1.bf16.msra.mxu0 %v5569_v51  ;;  %2913 = vmatpush1.bf16.msra.mxu1 %v5574_v52  ;;  %v2303_v51 = vld [vmem:[%s5777_s18 + $0x38] sm:$0xff] }
 0x4e7   : > { %2871 = vmatprep.subr.bf16.mxu0 %v5577_v53  ;;  %2914 = vmatprep.subr.bf16.mxu1 %v5581_v54  ;;  %v2302_v53 = vld [vmem:[%s5777_s18 + $0x30] sm:$0xff]  ;;  %s4300_s18 = sshll.u32 %s6013_s6, 5 }
 0x4e8   : > { %s6016_s25 = scalar_lea.vmem [#allocation2], %s4300_s18 }
 0x4ea   : > { %2872 = vmatpush1.bf16.msra.mxu0 %v5585_v55  ;;  %2915 = vmatpush1.bf16.msra.mxu1 %v5590_v56 }
 0x4eb   : > { %3218 = vmatprep.subr.bf16.mxu0 %v5800_v57  ;;  %3261 = vmatprep.subr.bf16.mxu1 %v5803_v58 }
 0x5a0   : > { %v2530_v32 = vpop.f32.mrb[48].mxu0  ;;  %v2573_v33 = vpop.f32.mrb[48].mxu1 }
 0x5a1   : > { %v2582_v34 = vadd.f32 %v2530_v32, %v2296_v31  ;;  %v2532_v18 = vpop.f32.mrb[49].mxu0  ;;  %v2575_v35 = vpop.f32.mrb[49].mxu1  ;;  %v2584_v50 = vadd.f32 %v2573_v33, %v2298_v49  ;;  %v5806_v31 = vld [vmem:[%s5126_s7] ss:$16 sps:$4 sm:$0xff]   ;;  %v5809_v32 = vld [vmem:[%s5126_s7 + $0x8] ss:$16 sps:$4 sm:$0xff]  }
 0x5a2   : > { %v2583_v36 = vadd.f32 %v2532_v18, %v2297_v17  ;;  %v2534_v38 = vpop.f32.mrb[50].mxu0  ;;  %v2577_v39 = vpop.f32.mrb[50].mxu1  ;;  %v2585_v48 = vadd.f32 %v2575_v35, %v2299_v47  ;;  %v5816_v33 = vld [vmem:[%s5126_s7 + $0x24] ss:$16 sps:$4 sm:$0xff]   ;;  %v5822_v17 = vld [vmem:[%s5126_s7 + $0x20] ss:$16 sps:$4 sm:$0xff]  }
 0x5a3   : > { %v4133_v19 = vmul.f32 -1.442695, %v2582_v34  ;;  %v2586_v40 = vadd.f32 %v2534_v38, %v2300_v37  ;;  %v2536_v41 = vpop.f32.mrb[51].mxu0  ;;  %v2579_v42 = vpop.f32.mrb[51].mxu1  ;;  %v2588_v55 = vadd.f32 %v2577_v39, %v2302_v53  ;;  %v5819_v34 = vld [vmem:[%s5126_s7 + $0x2c] ss:$16 sps:$4 sm:$0xff]  }
 0x5a4   : > { %v4135_v43 = vmul.f32 -1.442695, %v2583_v36  ;;  %v2587_v44 = vadd.f32 %v2536_v41, %v2301_v20  ;;  %v4137_v52 = vmul.f32 -1.442695, %v2585_v48  ;;  %v2589_v54 = vadd.f32 %v2579_v42, %v2303_v51  ;;  %v5825_v18 = vld [vmem:[%s5126_s7 + $0x28] ss:$16 sps:$4 sm:$0xff]  }
 0x5a5   : > { %4718 = vpow2.f32 %v4133_v19  ;;  %v4134_v45 = vmul.f32 -1.442695, %v2586_v40  ;;  %v5832_v35 = vld [vmem:[%s5126_s7 + $0x44] ss:$16 sps:$4 sm:$0xff]   ;;  %v5835_v36 = vld [vmem:[%s5126_s7 + $0x4c] ss:$16 sps:$4 sm:$0xff]  }
 0x5a6   : > { %4720 = vpow2.f32 %v4135_v43  ;;  %v4136_v46 = vmul.f32 -1.442695, %v2587_v44  ;;  %v4138_v60 = vmul.f32 -1.442695, %v2589_v54  ;;  %v5838_v37 = vld [vmem:[%s5126_s7 + $0x40] ss:$16 sps:$4 sm:$0xff]  }
 0x5a7   : > { %4722 = vpow2.f32 %v4134_v45  ;;  %v5841_v38 = vld [vmem:[%s5126_s7 + $0x48] ss:$16 sps:$4 sm:$0xff]   ;;  %v5848_v39 = vld [vmem:[%s5126_s7 + $0x64] ss:$16 sps:$4 sm:$0xff]   ;;  %v5851_v19 = vld [vmem:[%s5126_s7 + $0x6c] ss:$16 sps:$4 sm:$0xff]  }
 0x5a8   : > { %4724 = vpow2.f32 %v4136_v46  ;;  %v5854_v40 = vld [vmem:[%s5126_s7 + $0x60] ss:$16 sps:$4 sm:$0xff]   ;;  %v5857_v20 = vld [vmem:[%s5126_s7 + $0x68] ss:$16 sps:$4 sm:$0xff]   ;;  %v5864_v41 = vld [vmem:[%s5126_s7 + $0x84] ss:$16 sps:$4 sm:$0xff]  }
 0x5a9   : > { %4726 = vtanh.f32 %v2584_v50  ;;  %v5867_v42 = vld [vmem:[%s5126_s7 + $0x8c] ss:$16 sps:$4 sm:$0xff]   ;;  %v5870_v43 = vld [vmem:[%s5126_s7 + $0x80] ss:$16 sps:$4 sm:$0xff]   ;;  %v5873_v44 = vld [vmem:[%s5126_s7 + $0x88] ss:$16 sps:$4 sm:$0xff]  }
 0x5aa   : > { %4728 = vpow2.f32 %v4137_v52  ;;  %v5878_v45 = vld [vmem:[%s5126_s7 + $0xa4] ss:$16 sps:$4 sm:$0xff]   ;;  %v5881_v46 = vld [vmem:[%s5126_s7 + $0xac] ss:$16 sps:$4 sm:$0xff]   ;;  %v5886_v47 = vld [vmem:[%s5126_s7 + $0xa0] ss:$16 sps:$4 sm:$0xff]  }
 0x5ab   : > { %4730 = vtanh.f32 %v2588_v55  ;;  %v5889_v48 = vld [vmem:[%s5126_s7 + $0xa8] ss:$16 sps:$4 sm:$0xff]   ;;  %v5894_v49 = vld [vmem:[%s5126_s7 + $0xc4] ss:$16 sps:$4 sm:$0xff]   ;;  %v5897_v50 = vld [vmem:[%s5126_s7 + $0xcc] ss:$16 sps:$4 sm:$0xff]  }
 0x5ac   : > { %v5902_v51 = vld [vmem:[%s5126_s7 + $0xc0] ss:$16 sps:$4 sm:$0xff]   ;;  %v5905_v52 = vld [vmem:[%s5126_s7 + $0xc8] ss:$16 sps:$4 sm:$0xff]   ;;  %v5910_v53 = vld [vmem:[%s5126_s7 + $0xe4] ss:$16 sps:$4 sm:$0xff]  }
 0x5ad   : > { %v5913_v54 = vld [vmem:[%s5126_s7 + $0xec] ss:$16 sps:$4 sm:$0xff]   ;;  %v5918_v55 = vld [vmem:[%s5126_s7 + $0xe0] ss:$16 sps:$4 sm:$0xff]  }
 0x5af   : > { %v4719_v56 = vpop.eup %4718 }
 0x5b0   : > { %v4721_v26 = vpop.eup %4720  ;;  %v2596_v21 = vadd.f32 1.0, %v4719_v56  ;;  %v5921_v56 = vld [vmem:[%s5126_s7 + $0xe8] ss:$16 sps:$4 sm:$0xff]   ;;  %s4294_s7 = sshll.u32 %s5931_s11, 5 }
 0x5b1   : > { %v2608_v24 = vadd.f32 1.0, %v4721_v26  ;;  %v4723_v62 = vpop.eup %4722  ;;  %s5934_s12 = scalar_lea.vmem [#allocation2], %s4294_s7 }
 0x5b2   : > { %4732 = vrcp.f32 %v2596_v21  ;;  %v2597_v63 = vadd.f32 1.0, %v4723_v62  ;;  %v4725_v29 = vpop.eup %4724  ;;  %v2657_v26 = vld [vmem:[%s5934_s12] sm:$0xff]  ;;  %v2658_v62 = vld [vmem:[%s5934_s12 + $0x8] sm:$0xff] }
 0x5b3   : > { %4734 = vrcp.f32 %v2608_v24  ;;  %v2609_v59 = vadd.f32 1.0, %v4725_v29  ;;  %v4727_v30 = vpop.eup %4726 }
 0x5b4   : > { %4736 = vpow2.f32 %v4138_v60  ;;  %v4729_v1 = vpop.eup %4728 }
 0x5b5   : > { %4738 = vrcp.f32 %v2597_v63  ;;  %v4731_v2 = vpop.eup %4730  ;;  %v2622_v8 = vadd.f32 1.0, %v4729_v1 }
 0x5b6   : > { %4740 = vrcp.f32 %v2609_v59 }
 0x5b7   : > { %4742 = vrcp.f32 %v2622_v8 }
 0x5bc   : > { %v4733_v3 = vpop.eup %4732 }
 0x5bd   : > { %v4735_v61 = vpop.eup %4734  ;;  %v2630_v5 = vmul.f32 %v4733_v3, %v4727_v30  ;;  %v2661_v30 = vld [vmem:[%s5934_s12 + $0x20] sm:$0xff] }
 0x5be   : > { %v4737_v6 = vpop.eup %4736  ;;  %v2628_v4 = vmul.f32 %v4735_v61, %v5731_v11 }
 0x5bf   : > { %v4739_v7 = vpop.eup %4738  ;;  %v2623_v14 = vadd.f32 1.0, %v4737_v6 }
 0x5c0   : > { %v5788_v9 = vadd.f32 %v2630_v5, %v2628_v4  ;;  %v2631_v10 = vmul.f32 %v4739_v7, %v4731_v2  ;;  %v4741_v12 = vpop.eup %4740  ;;  %v2662_v5 = vld [vmem:[%s5934_s12 + $0x28] sm:$0xff] }
 0x5c1   : > { %v2629_v22 = vmul.f32 %v4741_v12, %v5735_v15  ;;  %v4743_v11 = vpop.eup %4742 }
 0x5c2   : > { %4744 = vtanh.f32 %v5788_v9 }
 0x5c3   : > { %v5792_v23 = vadd.f32 %v2631_v10, %v2629_v22  ;;  %4746 = vrcp.f32 %v2623_v14  ;;  %v2660_v14 = vld [vmem:[%s5934_s12 + $0x18] sm:$0xff] }
 0x5c5   : > { %4748 = vtanh.f32 %v5792_v23 }
 0x5cc   : > { %v4745_v16 = vpop.eup %4744 }
 0x5cd   : > { %v4747_v25 = vpop.eup %4746  ;;  %v2636_v27 = vmul.f32 %v4745_v16, %v4743_v11  ;;  %v2659_v11 = vld [vmem:[%s5934_s12 + $0x10] sm:$0xff] }
 0x5cf   : > { %v4749_v13 = vpop.eup %4748 }
 0x5d0   : > { %v2637_v28 = vmul.f32 %v4749_v13, %v4747_v25  ;;  %v2664_v25 = vld [vmem:[%s5934_s12 + $0x38] sm:$0xff] }
 0x5d2   : > { %v2638_v15 = vpack.c.bf16 %v2637_v28, %v2636_v27  ;;  %v2663_v27 = vld [vmem:[%s5934_s12 + $0x30] sm:$0xff] }
 0x5d4   : > { %4327 = vst [vmem:[%s2647_s24] sm:$0xff] %v2638_v15   ;;  %2890 = vmatmul.mubr.bf16.vlgmr.msra.gmra.mrb[52].mxu0 %v2638_v15  ;;  %2933 = vmatmul.mubr.bf16.vlgmr.msra.gmra.mrb[52].mxu1 %v2638_v15  ;;  %s3730_s24 = scalar_lea.vmem %s5461_s15, %s4273_s19 }
 0x5d5   : > { %3250 = vmatprep.mubr.bf16.mxu0 %v4950_v0  ;;  %3293 = vmatprep.mubr.bf16.mxu1 %v4950_v0 }
 0x5d6   : > { %3219 = vmatpush1.bf16.msra.mxu0 %v5806_v31  ;;  %3262 = vmatpush1.bf16.msra.mxu1 %v5809_v32 }
 0x5d7   : > { %3220 = vmatprep.subr.bf16.mxu0 %v5816_v33  ;;  %3263 = vmatprep.subr.bf16.mxu1 %v5819_v34 }
 0x5da   : > { %3221 = vmatpush1.bf16.msra.mxu0 %v5822_v17  ;;  %3264 = vmatpush1.bf16.msra.mxu1 %v5825_v18 }
 0x5db   : > { %3222 = vmatprep.subr.bf16.mxu0 %v5832_v35  ;;  %3265 = vmatprep.subr.bf16.mxu1 %v5835_v36 }
 0x5de   : > { %3223 = vmatpush1.bf16.msra.mxu0 %v5838_v37  ;;  %3266 = vmatpush1.bf16.msra.mxu1 %v5841_v38 }
 0x5df   : > { %3224 = vmatprep.subr.bf16.mxu0 %v5848_v39  ;;  %3267 = vmatprep.subr.bf16.mxu1 %v5851_v19 }
 0x5e2   : > { %3225 = vmatpush1.bf16.msra.mxu0 %v5854_v40  ;;  %3268 = vmatpush1.bf16.msra.mxu1 %v5857_v20 }
 0x5e3   : > { %3226 = vmatprep.subr.bf16.mxu0 %v5864_v41  ;;  %3269 = vmatprep.subr.bf16.mxu1 %v5867_v42 }
 0x5e6   : > { %3227 = vmatpush1.bf16.msra.mxu0 %v5870_v43  ;;  %3270 = vmatpush1.bf16.msra.mxu1 %v5873_v44 }
 0x5e7   : > { %3228 = vmatprep.subr.bf16.mxu0 %v5878_v45  ;;  %3271 = vmatprep.subr.bf16.mxu1 %v5881_v46 }
 0x5ea   : > { %3229 = vmatpush1.bf16.msra.mxu0 %v5886_v47  ;;  %3272 = vmatpush1.bf16.msra.mxu1 %v5889_v48 }
 0x5eb   : > { %3230 = vmatprep.subr.bf16.mxu0 %v5894_v49  ;;  %3273 = vmatprep.subr.bf16.mxu1 %v5897_v50 }
 0x5ee   : > { %3231 = vmatpush1.bf16.msra.mxu0 %v5902_v51  ;;  %3274 = vmatpush1.bf16.msra.mxu1 %v5905_v52 }
 0x5ef   : > { %3232 = vmatprep.subr.bf16.mxu0 %v5910_v53  ;;  %3275 = vmatprep.subr.bf16.mxu1 %v5913_v54 }
 0x5f2   : > { %3233 = vmatpush1.bf16.msra.mxu0 %v5918_v55  ;;  %3276 = vmatpush1.bf16.msra.mxu1 %v5921_v56 }
 0x5f3   : > { %3579 = vmatprep.subr.bf16.mxu0 %v5800_v57  ;;  %3622 = vmatprep.subr.bf16.mxu1 %v5803_v58 }
 0x6a7   : > { %v2891_v21 = vpop.f32.mrb[52].mxu0  ;;  %v2934_v60 = vpop.f32.mrb[52].mxu1 }
 0x6a8   : > { %v2943_v24 = vadd.f32 %v2891_v21, %v2657_v26  ;;  %v2893_v63 = vpop.f32.mrb[53].mxu0  ;;  %v2936_v29 = vpop.f32.mrb[53].mxu1  ;;  %v2945_v16 = vadd.f32 %v2934_v60, %v2659_v11 }
 0x6a9   : > { %v2944_v59 = vadd.f32 %v2893_v63, %v2658_v62  ;;  %v2895_v1 = vpop.f32.mrb[54].mxu0  ;;  %v2938_v2 = vpop.f32.mrb[54].mxu1  ;;  %v2946_v22 = vadd.f32 %v2936_v29, %v2660_v14 }
 0x6aa   : > { %v4177_v3 = vmul.f32 -1.442695, %v2943_v24  ;;  %v2947_v61 = vadd.f32 %v2895_v1, %v2661_v30  ;;  %v2897_v6 = vpop.f32.mrb[55].mxu0  ;;  %v2940_v4 = vpop.f32.mrb[55].mxu1  ;;  %v2949_v15 = vadd.f32 %v2938_v2, %v2663_v27 }
 0x6ab   : > { %v4179_v7 = vmul.f32 -1.442695, %v2944_v59  ;;  %v2948_v8 = vadd.f32 %v2897_v6, %v2662_v5  ;;  %v4181_v13 = vmul.f32 -1.442695, %v2946_v22  ;;  %v2950_v28 = vadd.f32 %v2940_v4, %v2664_v25 }
 0x6ac   : > { %4750 = vpow2.f32 %v4177_v3  ;;  %v4178_v10 = vmul.f32 -1.442695, %v2947_v61 }
 0x6ad   : > { %4752 = vpow2.f32 %v4179_v7  ;;  %v4180_v12 = vmul.f32 -1.442695, %v2948_v8  ;;  %v4182_v21 = vmul.f32 -1.442695, %v2950_v28 }
 0x6ae   : > { %4754 = vpow2.f32 %v4178_v10 }
 0x6af   : > { %4756 = vpow2.f32 %v4180_v12 }
 0x6b0   : > { %4758 = vtanh.f32 %v2945_v16 }
 0x6b1   : > { %4760 = vpow2.f32 %v4181_v13 }
 0x6b2   : > { %4762 = vtanh.f32 %v2949_v15 }
 0x6b6   : > { %v4751_v57 = vpop.eup %4750 }
 0x6b7   : > { %v4753_v58 = vpop.eup %4752  ;;  %v2957_v26 = vadd.f32 1.0, %v4751_v57 }
 0x6b8   : > { %v2969_v24 = vadd.f32 1.0, %v4753_v58  ;;  %v4755_v62 = vpop.eup %4754 }
 0x6b9   : > { %4764 = vrcp.f32 %v2957_v26  ;;  %v2958_v63 = vadd.f32 1.0, %v4755_v62  ;;  %v4757_v29 = vpop.eup %4756 }
 0x6ba   : > { %4766 = vrcp.f32 %v2969_v24  ;;  %v2970_v60 = vadd.f32 1.0, %v4757_v29  ;;  %v4759_v59 = vpop.eup %4758 }
 0x6bb   : > { %4768 = vpow2.f32 %v4182_v21  ;;  %v4761_v30 = vpop.eup %4760 }
 0x6bc   : > { %4770 = vrcp.f32 %v2958_v63  ;;  %v4763_v1 = vpop.eup %4762  ;;  %v2983_v7 = vadd.f32 1.0, %v4761_v30 }
 0x6bd   : > { %4772 = vrcp.f32 %v2970_v60 }
 0x6be   : > { %4774 = vrcp.f32 %v2983_v7 }
 0x6c3   : > { %v4765_v2 = vpop.eup %4764 }
 0x6c4   : > { %v4767_v3 = vpop.eup %4766  ;;  %v2991_v61 = vmul.f32 %v4765_v2, %v4759_v59 }
 0x6c5   : > { %v4769_v5 = vpop.eup %4768  ;;  %v2989_v6 = vmul.f32 %v4767_v3, %v5788_v9 }
 0x6c6   : > { %v4771_v4 = vpop.eup %4770  ;;  %v2984_v14 = vadd.f32 1.0, %v4769_v5 }
 0x6c7   : > { %v5945_v8 = vadd.f32 %v2991_v61, %v2989_v6  ;;  %v2992_v10 = vmul.f32 %v4771_v4, %v4763_v1  ;;  %v4773_v12 = vpop.eup %4772 }
 0x6c8   : > { %v2990_v22 = vmul.f32 %v4773_v12, %v5792_v23  ;;  %v4775_v9 = vpop.eup %4774 }
 0x6c9   : > { %4776 = vtanh.f32 %v5945_v8 }
 0x6ca   : > { %v5949_v11 = vadd.f32 %v2992_v10, %v2990_v22  ;;  %4778 = vrcp.f32 %v2984_v14 }
 0x6cc   : > { %4780 = vtanh.f32 %v5949_v11 }
 0x6d3   : > { %v4777_v16 = vpop.eup %4776 }
 0x6d4   : > { %v4779_v25 = vpop.eup %4778  ;;  %v2997_v27 = vmul.f32 %v4777_v16, %v4775_v9 }
 0x6d6   : > { %v4781_v13 = vpop.eup %4780 }
 0x6d7   : > { %v2998_v28 = vmul.f32 %v4781_v13, %v4779_v25 }
 0x6d9   : > { %v2999_v15 = vpack.c.bf16 %v2998_v28, %v2997_v27 }
 0x6db   : > { %4332 = vst [vmem:[%s3008_s30] sm:$0xff] %v2999_v15   ;;  %3251 = vmatmul.mubr.bf16.vlgmr.msra.gmra.mrb[56].mxu0 %v2999_v15  ;;  %3294 = vmatmul.mubr.bf16.vlgmr.msra.gmra.mrb[56].mxu1 %v2999_v15 }
 0x6dc   : > { %3580 = vmatpush1.bf16.msra.mxu0 %v5806_v31  ;;  %3623 = vmatpush1.bf16.msra.mxu1 %v5809_v32 }
 0x6dd   : > { %3581 = vmatprep.subr.bf16.mxu0 %v5816_v33  ;;  %3624 = vmatprep.subr.bf16.mxu1 %v5819_v34  ;;  %v3019_v33 = vld [vmem:[%s5991_s22 + $0x8] sm:$0xff] }
 0x6de   : > { %3611 = vmatprep.mubr.bf16.mxu0 %v4950_v0  ;;  %3654 = vmatprep.mubr.bf16.mxu1 %v4950_v0  ;;  %v3018_v0 = vld [vmem:[%s5991_s22] sm:$0xff] }
 0x6e0   : > { %3582 = vmatpush1.bf16.msra.mxu0 %v5822_v17  ;;  %3625 = vmatpush1.bf16.msra.mxu1 %v5825_v18 }
 0x6e1   : > { %3583 = vmatprep.subr.bf16.mxu0 %v5832_v35  ;;  %3626 = vmatprep.subr.bf16.mxu1 %v5835_v36  ;;  %v3022_v35 = vld [vmem:[%s5991_s22 + $0x20] sm:$0xff] }
 0x6e4   : > { %3584 = vmatpush1.bf16.msra.mxu0 %v5838_v37  ;;  %3627 = vmatpush1.bf16.msra.mxu1 %v5841_v38 }
 0x6e5   : > { %3585 = vmatprep.subr.bf16.mxu0 %v5848_v39  ;;  %3628 = vmatprep.subr.bf16.mxu1 %v5851_v19  ;;  %v3023_v19 = vld [vmem:[%s5991_s22 + $0x28] sm:$0xff] }
 0x6e8   : > { %3586 = vmatpush1.bf16.msra.mxu0 %v5854_v40  ;;  %3629 = vmatpush1.bf16.msra.mxu1 %v5857_v20 }
 0x6e9   : > { %3587 = vmatprep.subr.bf16.mxu0 %v5864_v41  ;;  %3630 = vmatprep.subr.bf16.mxu1 %v5867_v42 }
 0x6ec   : > { %3588 = vmatpush1.bf16.msra.mxu0 %v5870_v43  ;;  %3631 = vmatpush1.bf16.msra.mxu1 %v5873_v44 }
 0x6ed   : > { %3589 = vmatprep.subr.bf16.mxu0 %v5878_v45  ;;  %3632 = vmatprep.subr.bf16.mxu1 %v5881_v46  ;;  %v3021_v45 = vld [vmem:[%s5991_s22 + $0x18] sm:$0xff] }
 0x6f0   : > { %3590 = vmatpush1.bf16.msra.mxu0 %v5886_v47  ;;  %3633 = vmatpush1.bf16.msra.mxu1 %v5889_v48  ;;  %v3020_v47 = vld [vmem:[%s5991_s22 + $0x10] sm:$0xff] }
 0x6f1   : > { %3591 = vmatprep.subr.bf16.mxu0 %v5894_v49  ;;  %3634 = vmatprep.subr.bf16.mxu1 %v5897_v50  ;;  %v3025_v49 = vld [vmem:[%s5991_s22 + $0x38] sm:$0xff] }
 0x6f4   : > { %3592 = vmatpush1.bf16.msra.mxu0 %v5902_v51  ;;  %3635 = vmatpush1.bf16.msra.mxu1 %v5905_v52  ;;  %v3024_v51 = vld [vmem:[%s5991_s22 + $0x30] sm:$0xff] }
 0x6f5   : > { %3593 = vmatprep.subr.bf16.mxu0 %v5910_v53  ;;  %3636 = vmatprep.subr.bf16.mxu1 %v5913_v54 }
 0x6f8   : > { %3594 = vmatpush1.bf16.msra.mxu0 %v5918_v55  ;;  %3637 = vmatpush1.bf16.msra.mxu1 %v5921_v56 }
 0x7ae   : > { %v3252_v23 = vpop.f32.mrb[56].mxu0  ;;  %v3295_v31 = vpop.f32.mrb[56].mxu1 }
 0x7af   : > { %v3304_v32 = vadd.f32 %v3252_v23, %v3018_v0  ;;  %v3254_v34 = vpop.f32.mrb[57].mxu0  ;;  %v3297_v17 = vpop.f32.mrb[57].mxu1  ;;  %v3306_v48 = vadd.f32 %v3295_v31, %v3020_v47  ;;  %v3380_v23 = vld [vmem:[%s6016_s25 + $0x8] sm:$0xff] }
 0x7b0   : > { %v3305_v18 = vadd.f32 %v3254_v34, %v3019_v33  ;;  %v3256_v36 = vpop.f32.mrb[58].mxu0  ;;  %v3299_v37 = vpop.f32.mrb[58].mxu1  ;;  %v3307_v46 = vadd.f32 %v3297_v17, %v3021_v45  ;;  %v3383_v34 = vld [vmem:[%s6016_s25 + $0x20] sm:$0xff] }
 0x7b1   : > { %v4221_v38 = vmul.f32 -1.442695, %v3304_v32  ;;  %v3308_v39 = vadd.f32 %v3256_v36, %v3022_v35  ;;  %v3258_v40 = vpop.f32.mrb[59].mxu0  ;;  %v3301_v20 = vpop.f32.mrb[59].mxu1  ;;  %v3310_v53 = vadd.f32 %v3299_v37, %v3024_v51  ;;  %v3384_v37 = vld [vmem:[%s6016_s25 + $0x28] sm:$0xff] }
 0x7b2   : > { %v4223_v41 = vmul.f32 -1.442695, %v3305_v18  ;;  %v3309_v42 = vadd.f32 %v3258_v40, %v3023_v19  ;;  %v4225_v50 = vmul.f32 -1.442695, %v3307_v46  ;;  %v3311_v52 = vadd.f32 %v3301_v20, %v3025_v49  ;;  %v3386_v46 = vld [vmem:[%s6016_s25 + $0x38] sm:$0xff] }
 0x7b3   : > { %4782 = vpow2.f32 %v4221_v38  ;;  %v4222_v43 = vmul.f32 -1.442695, %v3308_v39 }
 0x7b4   : > { %4784 = vpow2.f32 %v4223_v41  ;;  %v4224_v44 = vmul.f32 -1.442695, %v3309_v42  ;;  %v4226_v57 = vmul.f32 -1.442695, %v3311_v52  ;;  %v3382_v42 = vld [vmem:[%s6016_s25 + $0x18] sm:$0xff] }
 0x7b5   : > { %4786 = vpow2.f32 %v4222_v43 }
 0x7b6   : > { %4788 = vpow2.f32 %v4224_v44  ;;  %v3381_v44 = vld [vmem:[%s6016_s25 + $0x10] sm:$0xff] }
 0x7b7   : > { %4790 = vtanh.f32 %v3306_v48  ;;  %v3385_v48 = vld [vmem:[%s6016_s25 + $0x30] sm:$0xff] }
 0x7b8   : > { %4792 = vpow2.f32 %v4225_v50 }
 0x7b9   : > { %4794 = vtanh.f32 %v3310_v53 }
 0x7bd   : > { %v4783_v54 = vpop.eup %4782 }
 0x7be   : > { %v4785_v55 = vpop.eup %4784  ;;  %v3318_v56 = vadd.f32 1.0, %v4783_v54 }
 0x7bf   : > { %v3330_v58 = vadd.f32 1.0, %v4785_v55  ;;  %v4787_v26 = vpop.eup %4786 }
 0x7c0   : > { %4796 = vrcp.f32 %v3318_v56  ;;  %v3319_v21 = vadd.f32 1.0, %v4787_v26  ;;  %v4789_v24 = vpop.eup %4788 }
 0x7c1   : > { %4798 = vrcp.f32 %v3330_v58  ;;  %v3331_v62 = vadd.f32 1.0, %v4789_v24  ;;  %v4791_v63 = vpop.eup %4790 }
 0x7c2   : > { %4800 = vpow2.f32 %v4226_v57  ;;  %v4793_v29 = vpop.eup %4792 }
 0x7c3   : > { %4802 = vrcp.f32 %v3319_v21  ;;  %v4795_v60 = vpop.eup %4794  ;;  %v3344_v5 = vadd.f32 1.0, %v4793_v29 }
 0x7c4   : > { %4804 = vrcp.f32 %v3331_v62 }
 0x7c5   : > { %4806 = vrcp.f32 %v3344_v5 }
 0x7ca   : > { %v4797_v59 = vpop.eup %4796 }
 0x7cb   : > { %v4799_v30 = vpop.eup %4798  ;;  %v3352_v1 = vmul.f32 %v4797_v59, %v4791_v63 }
 0x7cc   : > { %v4801_v2 = vpop.eup %4800  ;;  %v3350_v3 = vmul.f32 %v4799_v30, %v5945_v8 }
 0x7cd   : > { %v4803_v61 = vpop.eup %4802  ;;  %v3345_v10 = vadd.f32 1.0, %v4801_v2 }
 0x7ce   : > { %v6002_v6 = vadd.f32 %v3352_v1, %v3350_v3  ;;  %v3353_v4 = vmul.f32 %v4803_v61, %v4795_v60  ;;  %v4805_v7 = vpop.eup %4804 }
 0x7cf   : > { %v3351_v12 = vmul.f32 %v4805_v7, %v5949_v11  ;;  %v4807_v8 = vpop.eup %4806  ;;  %v3379_v11 = vld [vmem:[%s6016_s25] sm:$0xff] }
 0x7d0   : > { %4808 = vtanh.f32 %v6002_v6 }
 0x7d1   : > { %v6006_v14 = vadd.f32 %v3353_v4, %v3351_v12  ;;  %4810 = vrcp.f32 %v3345_v10 }
 0x7d3   : > { %4812 = vtanh.f32 %v6006_v14 }
 0x7da   : > { %v4809_v22 = vpop.eup %4808 }
 0x7db   : > { %v4811_v9 = vpop.eup %4810  ;;  %v3358_v25 = vmul.f32 %v4809_v22, %v4807_v8 }
 0x7dd   : > { %v4813_v16 = vpop.eup %4812 }
 0x7de   : > { %v3359_v13 = vmul.f32 %v4813_v16, %v4811_v9 }
 0x7e0   : > { %v3360_v27 = vpack.c.bf16 %v3359_v13, %v3358_v25 }
 0x7e2   : > { %4337 = vst [vmem:[%s3369_s9] sm:$0xff] %v3360_v27   ;;  %3612 = vmatmul.mubr.bf16.vlgmr.msra.gmra.mrb[60].mxu0 %v3360_v27  ;;  %3655 = vmatmul.mubr.bf16.vlgmr.msra.gmra.mrb[60].mxu1 %v3360_v27 }
 0x8b5   : > { %v3613_v28 = vpop.f32.mrb[60].mxu0  ;;  %v3656_v15 = vpop.f32.mrb[60].mxu1 }
 0x8b6   : > { %v3665_v0 = vadd.f32 %v3613_v28, %v3379_v11  ;;  %v3615_v31 = vpop.f32.mrb[61].mxu0  ;;  %v3658_v32 = vpop.f32.mrb[61].mxu1  ;;  %v3667_v45 = vadd.f32 %v3656_v15, %v3381_v44 }
 0x8b7   : > { %v3666_v33 = vadd.f32 %v3615_v31, %v3380_v23  ;;  %v3617_v17 = vpop.f32.mrb[62].mxu0  ;;  %v3660_v18 = vpop.f32.mrb[62].mxu1  ;;  %v3668_v43 = vadd.f32 %v3658_v32, %v3382_v42 }
 0x8b8   : > { %v4265_v35 = vmul.f32 -1.442695, %v3665_v0  ;;  %v3669_v36 = vadd.f32 %v3617_v17, %v3383_v34  ;;  %v3619_v38 = vpop.f32.mrb[63].mxu0  ;;  %v3662_v39 = vpop.f32.mrb[63].mxu1  ;;  %v3671_v50 = vadd.f32 %v3660_v18, %v3385_v48 }
 0x8b9   : > { %v4267_v19 = vmul.f32 -1.442695, %v3666_v33  ;;  %v3670_v40 = vadd.f32 %v3619_v38, %v3384_v37  ;;  %v4269_v47 = vmul.f32 -1.442695, %v3668_v43  ;;  %v3672_v49 = vadd.f32 %v3662_v39, %v3386_v46 }
 0x8ba   : > { %4814 = vpow2.f32 %v4265_v35  ;;  %v4266_v20 = vmul.f32 -1.442695, %v3669_v36 }
 0x8bb   : > { %4816 = vpow2.f32 %v4267_v19  ;;  %v4268_v41 = vmul.f32 -1.442695, %v3670_v40  ;;  %v4270_v54 = vmul.f32 -1.442695, %v3672_v49 }
 0x8bc   : > { %4818 = vpow2.f32 %v4266_v20 }
 0x8bd   : > { %4820 = vpow2.f32 %v4268_v41 }
 0x8be   : > { %4822 = vtanh.f32 %v3667_v45 }
 0x8bf   : > { %4824 = vpow2.f32 %v4269_v47 }
 0x8c0   : > { %4826 = vtanh.f32 %v3671_v50 }
 0x8c4   : > { %v4815_v51 = vpop.eup %4814 }
 0x8c5   : > { %v4817_v52 = vpop.eup %4816  ;;  %v3679_v53 = vadd.f32 1.0, %v4815_v51 }
 0x8c6   : > { %v3691_v55 = vadd.f32 1.0, %v4817_v52  ;;  %v4819_v56 = vpop.eup %4818 }
 0x8c7   : > { %4828 = vrcp.f32 %v3679_v53  ;;  %v3680_v57 = vadd.f32 1.0, %v4819_v56  ;;  %v4821_v58 = vpop.eup %4820 }
 0x8c8   : > { %4830 = vrcp.f32 %v3691_v55  ;;  %v3692_v26 = vadd.f32 1.0, %v4821_v58  ;;  %v4823_v21 = vpop.eup %4822 }
 0x8c9   : > { %4832 = vpow2.f32 %v4270_v54  ;;  %v4825_v24 = vpop.eup %4824 }
 0x8ca   : > { %4834 = vrcp.f32 %v3680_v57  ;;  %v4827_v62 = vpop.eup %4826  ;;  %v3705_v59 = vadd.f32 1.0, %v4825_v24 }
 0x8cb   : > { %4836 = vrcp.f32 %v3692_v26 }
 0x8cc   : > { %4838 = vrcp.f32 %v3705_v59 }
 0x8d1   : > { %v4829_v63 = vpop.eup %4828 }
 0x8d2   : > { %v4831_v29 = vpop.eup %4830  ;;  %v3713_v60 = vmul.f32 %v4829_v63, %v4823_v21 }
 0x8d3   : > { %v4833_v30 = vpop.eup %4832  ;;  %v3711_v1 = vmul.f32 %v4831_v29, %v6002_v6 }
 0x8d4   : > { %v4835_v2 = vpop.eup %4834  ;;  %v3706_v4 = vadd.f32 1.0, %v4833_v30 }
 0x8d5   : > { %v3715_v3 = vadd.f32 %v3713_v60, %v3711_v1  ;;  %v3714_v61 = vmul.f32 %v4835_v2, %v4827_v62  ;;  %v4837_v5 = vpop.eup %4836 }
 0x8d6   : > { %v3712_v7 = vmul.f32 %v4837_v5, %v6006_v14  ;;  %v4839_v12 = vpop.eup %4838 }
 0x8d7   : > { %4840 = vtanh.f32 %v3715_v3 }
 0x8d8   : > { %v3716_v10 = vadd.f32 %v3714_v61, %v3712_v7  ;;  %4842 = vrcp.f32 %v3706_v4 }
 0x8da   : > { %4844 = vtanh.f32 %v3716_v10 }
 0x8e1   : > { %v4841_v8 = vpop.eup %4840 }
 0x8e2   : > { %v3719_v22 = vmul.f32 %v4841_v8, %v4839_v12  ;;  %v4843_v9 = vpop.eup %4842 }
 0x8e4   : > { %v4845_v6 = vpop.eup %4844 }
 0x8e5   : > { %v3720_v16 = vmul.f32 %v4845_v6, %v4843_v9 }
 0x8e7   : > { %v4341_v25 = vpack.c.bf16 %v3720_v16, %v3719_v22 }
 0x8e9   : > { %4342 = vst [vmem:[%s3730_s24] sm:$0xff] %v4341_v25  }
 0x8ea PF: > { %p17_p4 = scmp.ge.s32.totalorder %s4998_s20, 4   ;;  %s6063_s15 = smov %s4936_s16 }
 0x8eb   : > { %s6064_s16 = smov %s4940_s17  ;;  %s6065_s17 = smov %s5008_s23 }
 0x8ec   : > { %s6066_s18 = smov %s4998_s20  ;;  %19 = sbr.rel (!%p17_p4) target bundleno = 5 (0x5), region = 108 }
 0x8f3   :  { %3754 = vsyncpa [#allocation4], 1 }
 0x8f4   :  { %3756 = vsyncpa [#allocation4 + $0x1], 1 }
 0x8f5   :  { %3757 = vsyncpa [#allocation6], 1 }
 0x8f6   :  { %3759 = vsyncpa [#allocation6 + $0x1], 1 }

</bundles_post_ra>
